<compile_context>
chip_gen: v7x
topology: tpu7x:2x2x1
jax: 0.10.0
libtpu: 0.0.40
codegen_flags: <defaults>
</compile_context>

<pallas_src>
import functools
import math

import jax
import jax.numpy as jnp
from jax.experimental import pallas as pl
from jax.experimental.pallas import tpu as pltpu

KSIZE = 5
PAD = (KSIZE - 1) // 2          # 2
LANE = 128
CHUNK = 8                       # output rows fused per inner-loop step


def _cdiv(a, b):
    return -(-a // b)


def _round_up(a, b):
    return _cdiv(a, b) * b


def _gaussian_taps(window_size, sigma):
    """1-D Gaussian taps as plain Python floats (compile-time constants)."""
    c = window_size // 2
    g = [math.exp(-((i - c) ** 2) / (2.0 * float(sigma) ** 2))
         for i in range(window_size)]
    s = sum(g)
    return tuple(v / s for v in g)


# ------------------------------- Pallas kernel -------------------------------
def _blur_kernel(x_ref, halo_ref, o_ref, *, TH, W8, kx, ky):
    """Separable 5x5 blur of one (TH, W8, TN) output slab.

    x_ref    : (TH, W8+4, TN)  zero-padded input rows [r*TH, r*TH+TH)
    halo_ref : (4,  W8+4, TN)  zero-padded input rows [r*TH+TH, r*TH+TH+4)
    o_ref    : (TH, W8,   TN)  output rows            [r*TH, r*TH+TH)
    """
    kx0, kx1, kx2 = kx[0], kx[1], kx[2]     # symmetric: kx[0]==kx[4], kx[1]==kx[3]
    ky0, ky1, ky2 = ky[0], ky[1], ky[2]
    out_dtype = o_ref.dtype

    def emit_rows(row_fn, out_base):
        # CHUNK output rows; window row i (i in [0, CHUNK+4)) comes from row_fn.
        for rr in range(CHUNK):
            # Vertical 5-tap pass, symmetric form; values stay in vregs.
            v = kx0 * (row_fn(rr) + row_fn(rr + 4))
            v = v + kx1 * (row_fn(rr + 1) + row_fn(rr + 3))
            v = v + kx2 * row_fn(rr + 2)
            # Horizontal 5-tap pass (sublane shifts), symmetric form.
            h = ky0 * (v[0:W8] + v[4:4 + W8])
            h = h + ky1 * (v[1:1 + W8] + v[3:3 + W8])
            h = h + ky2 * v[2:2 + W8]
            o_ref[out_base + rr] = h.astype(out_dtype)

    n_chunks = TH // CHUNK

    # All chunks except the last read only from x_ref (window stays in-tile).
    if n_chunks > 1:
        @pl.loop(0, n_chunks - 1)
        def _(ci):
            base = pl.multiple_of(ci * CHUNK, CHUNK)
            emit_rows(lambda i: x_ref[base + i].astype(jnp.float32), base)

    # Last chunk: the bottom 4 window rows come from the halo block.
    tail = TH - CHUNK

    def tail_row(i):
        j = tail + i
        r = x_ref[j] if j < TH else halo_ref[j - TH]
        return r.astype(jnp.float32)

    emit_rows(tail_row, tail)


# --------------------------------- Wrapper -----------------------------------
class GaussianBlur:
    """Depthwise 5x5 Gaussian blur == torch conv2d(x, k, padding=2, groups=C)."""

    def __init__(self, std, row_tile=None):
        self.kernel_size = (KSIZE, KSIZE)
        self.sigma = (float(std), float(std))
        self.padding = (PAD, PAD)
        self.kx = _gaussian_taps(KSIZE, self.sigma[0])   # along H (rows)
        self.ky = _gaussian_taps(KSIZE, self.sigma[1])   # along W (cols)
        self.kernel = jnp.outer(jnp.array(self.kx, jnp.float32),
                                jnp.array(self.ky, jnp.float32))
        self._row_tile = row_tile                        # None = auto

        # Generation-aware VMEM budget (v7x: 64 MiB physical, v5e/v6e: 128 MiB).
        try:
            vmem_cap = int(pltpu.get_tpu_info().vmem_capacity_bytes)
        except Exception:
            vmem_cap = 64 << 20
        if vmem_cap <= (64 << 20):          # v7x-class
            self._vmem_limit = 48 << 20
            self._buf_budget = 24 << 20     # all pipeline buffers (2x in/out/halo)
        else:                               # v5e / v6e
            self._vmem_limit = 96 << 20
            self._buf_budget = 64 << 20

    def __call__(self, x):
        assert x.ndim == 4, "expect (B, C, H, W)"
        B, C, H, W = x.shape
        N = B * C
        itemsize = jnp.dtype(x.dtype).itemsize

        # Output width padded to a sublane multiple -> unmasked vector stores.
        W8 = _round_up(W, 8)
        WP = W8 + 2 * PAD

        # Lane tile: flattened image/channel index padded to a lane multiple.
        n_ceil = _round_up(N, LANE)
        TN = LANE
        for cand in (4 * LANE, 2 * LANE):
            # keep one slab row to a bounded number of vregs (register pressure)
            if n_ceil >= cand and WP * cand * 4 <= (128 << 10):
                TN = cand
                break
        Npad = _round_up(n_ceil, TN)

        # Row tile from the per-generation buffer budget (double-buffered
        # input + output blocks plus the small 4-row halo block).
        if self._row_tile is not None:
            TH = _round_up(int(self._row_tile), CHUNK)
        else:
            row_bytes_in = WP * TN * itemsize
            row_bytes_out = W8 * TN * itemsize
            fixed = 2 * 4 * row_bytes_in                    # halo, double-buffered
            TH = (self._buf_budget - fixed) // (2 * (row_bytes_in + row_bytes_out))
            TH = (TH // CHUNK) * CHUNK
        TH = max(CHUNK, min(TH, _round_up(H, CHUNK)))
        R = _cdiv(H, TH)
        Hpad = R * TH + 2 * PAD

        # Single fused relayout+pad: NCHW -> (Hpad, WP, Npad), images on lanes.
        xt = jnp.transpose(x.reshape(N, H, W), (1, 2, 0))              # (H, W, N)
        xp = jnp.pad(xt, ((PAD, Hpad - H - PAD),
                          (PAD, WP - W - PAD),
                          (0, Npad - N)))

        kern = functools.partial(_blur_kernel, TH=TH, W8=W8,
                                 kx=self.kx, ky=self.ky)

        out_p = pl.pallas_call(
            kern,
            out_shape=jax.ShapeDtypeStruct((R * TH, W8, Npad), x.dtype),
            grid_spec=pltpu.PrefetchScalarGridSpec(
                num_scalar_prefetch=0,
                grid=(Npad // TN, R),                # (lane chunks, row tiles)
                in_specs=[
                    # main TH-row window of this tile
                    pl.BlockSpec((TH, WP, TN), lambda n, r: (r, 0, n)),
                    # 4-row halo just below the tile (same array, re-read)
                    pl.BlockSpec((4, WP, TN),
                                 lambda n, r: ((r + 1) * (TH // 4), 0, n)),
                ],
                out_specs=pl.BlockSpec((TH, W8, TN), lambda n, r: (r, 0, n)),
            ),
            compiler_params=pltpu.CompilerParams(
                dimension_semantics=("parallel", "parallel"),
                vmem_limit_bytes=self._vmem_limit,
            ),
        )(xp, xp)

        out = out_p[:H, :W, :N]                                        # (H, W, N)
        return jnp.transpose(out, (2, 0, 1)).reshape(B, C, H, W)


# ----------------------------- Reference (JAX) --------------------------------
def _reference_blur(x, kernel2d, padding):
    C = x.shape[1]
    w = jnp.broadcast_to(kernel2d[None, None], (C, 1) + kernel2d.shape)
    return jax.lax.conv_general_dilated(
        x, w.astype(x.dtype), window_strides=(1, 1),
        padding=((padding[0], padding[0]), (padding[1], padding[1])),
        dimension_numbers=("NCHW", "OIHW", "NCHW"),
        feature_group_count=C)


if __name__ == "__main__":
    key = jax.random.PRNGKey(0)
    k0, k1 = jax.random.split(key)

    # Primary small demo shape.
    x = jax.random.uniform(k0, (2, 4, 16, 16), dtype=jnp.float32)
    blur = GaussianBlur(std=1.5)
    out = jax.block_until_ready(blur(x))
    ref = _reference_blur(x, blur.kernel, blur.padding)
    assert out.shape == x.shape
    err = float(jnp.max(jnp.abs(out - ref)))
    if err > 1e-5:
        raise AssertionError(f"mismatch (primary), max_err={err}")

    # Exercise the multi-row-tile halo re-read path + non-multiple-of-8 width.
    x2 = jax.random.uniform(k1, (2, 3, 20, 12), dtype=jnp.float32)
    blur2 = GaussianBlur(std=1.5, row_tile=8)
    out2 = jax.block_until_ready(blur2(x2))
    ref2 = _reference_blur(x2, blur2.kernel, blur2.padding)
    err2 = float(jnp.max(jnp.abs(out2 - ref2)))
    if err2 > 1e-5:
        raise AssertionError(f"mismatch (row-tiled), max_err={err2}")

    print("KERNEL_OK")
</pallas_src>

<mosaic_0001>
module attributes {stable_mosaic.version = 11 : i64} {
  func.func @_blur_kernel(%arg0: i32, %arg1: i32, %arg2: memref<16x20x128xf32, #tpu.memory_space<vmem>>, %arg3: memref<4x20x128xf32, #tpu.memory_space<vmem>>, %arg4: memref<16x16x128xf32, #tpu.memory_space<vmem>>) attributes {dimension_semantics = [#tpu.dimension_semantics<parallel>, #tpu.dimension_semantics<parallel>], iteration_bounds = array<i64: 1, 1>, scalar_prefetch = 0 : i64, scratch_operands = 0 : i64, tpu.core_type = #tpu.core_type<tc>, window_params = [{transform_indices = @transform_0, window_bounds = array<i64: 16, 20, 128>}, {transform_indices = @transform_1, window_bounds = array<i64: 4, 20, 128>}, {transform_indices = @transform_2, window_bounds = array<i64: 16, 16, 128>}]} {
    %c0_i32 = arith.constant 0 : i32
    %c1_i32 = arith.constant 1 : i32
    %0 = arith.muli %c0_i32, %c1_i32 : i32
    %c0_i32_0 = arith.constant 0 : i32
    %1 = arith.addi %c0_i32_0, %0 : i32
    %c8_i32 = arith.constant 8 : i32
    %2 = arith.muli %1, %c8_i32 : i32
    %3 = tpu.assume_multiple %2, 8 : i32
    %c0_i32_1 = arith.constant 0 : i32
    %4 = arith.addi %3, %c0_i32_1 : i32
    %5 = arith.index_cast %4 : i32 to index
    %c0 = arith.constant 0 : index
    %c0_2 = arith.constant 0 : index
    %6 = vector.load %arg2[%5, %c0, %c0_2] : memref<16x20x128xf32, #tpu.memory_space<vmem>>, vector<1x20x128xf32>
    %7 = vector.shape_cast %6 : vector<1x20x128xf32> to vector<20x128xf32>
    %c4_i32 = arith.constant 4 : i32
    %8 = arith.addi %3, %c4_i32 : i32
    %9 = arith.index_cast %8 : i32 to index
    %c0_3 = arith.constant 0 : index
    %c0_4 = arith.constant 0 : index
    %10 = vector.load %arg2[%9, %c0_3, %c0_4] : memref<16x20x128xf32, #tpu.memory_space<vmem>>, vector<1x20x128xf32>
    %11 = vector.shape_cast %10 : vector<1x20x128xf32> to vector<20x128xf32>
    %12 = arith.addf %7, %11 : vector<20x128xf32>
    %cst = arith.constant 0.120078385 : f32
    %13 = vector.broadcast %cst : f32 to vector<20x128xf32>
    %14 = arith.mulf %13, %12 : vector<20x128xf32>
    %c1_i32_5 = arith.constant 1 : i32
    %15 = arith.addi %3, %c1_i32_5 : i32
    %16 = arith.index_cast %15 : i32 to index
    %c0_6 = arith.constant 0 : index
    %c0_7 = arith.constant 0 : index
    %17 = vector.load %arg2[%16, %c0_6, %c0_7] : memref<16x20x128xf32, #tpu.memory_space<vmem>>, vector<1x20x128xf32>
    %18 = vector.shape_cast %17 : vector<1x20x128xf32> to vector<20x128xf32>
    %c3_i32 = arith.constant 3 : i32
    %19 = arith.addi %3, %c3_i32 : i32
    %20 = arith.index_cast %19 : i32 to index
    %c0_8 = arith.constant 0 : index
    %c0_9 = arith.constant 0 : index
    %21 = vector.load %arg2[%20, %c0_8, %c0_9] : memref<16x20x128xf32, #tpu.memory_space<vmem>>, vector<1x20x128xf32>
    %22 = vector.shape_cast %21 : vector<1x20x128xf32> to vector<20x128xf32>
    %23 = arith.addf %18, %22 : vector<20x128xf32>
    %cst_10 = arith.constant 0.233880758 : f32
    %24 = vector.broadcast %cst_10 : f32 to vector<20x128xf32>
    %25 = arith.mulf %24, %23 : vector<20x128xf32>
    %26 = arith.addf %14, %25 : vector<20x128xf32>
    %c2_i32 = arith.constant 2 : i32
    %27 = arith.addi %3, %c2_i32 : i32
    %28 = arith.index_cast %27 : i32 to index
    %c0_11 = arith.constant 0 : index
    %c0_12 = arith.constant 0 : index
    %29 = vector.load %arg2[%28, %c0_11, %c0_12] : memref<16x20x128xf32, #tpu.memory_space<vmem>>, vector<1x20x128xf32>
    %30 = vector.shape_cast %29 : vector<1x20x128xf32> to vector<20x128xf32>
    %cst_13 = arith.constant 0.292081714 : f32
    %31 = vector.broadcast %cst_13 : f32 to vector<20x128xf32>
    %32 = arith.mulf %31, %30 : vector<20x128xf32>
    %33 = arith.addf %26, %32 : vector<20x128xf32>
    %34 = vector.extract_strided_slice %33 {offsets = [0, 0], sizes = [16, 128], strides = [1, 1]} : vector<20x128xf32> to vector<16x128xf32>
    %35 = vector.extract_strided_slice %33 {offsets = [4, 0], sizes = [16, 128], strides = [1, 1]} : vector<20x128xf32> to vector<16x128xf32>
    %36 = arith.addf %34, %35 : vector<16x128xf32>
    %cst_14 = arith.constant 0.120078385 : f32
    %37 = vector.broadcast %cst_14 : f32 to vector<16x128xf32>
    %38 = arith.mulf %37, %36 : vector<16x128xf32>
    %39 = vector.extract_strided_slice %33 {offsets = [1, 0], sizes = [16, 128], strides = [1, 1]} : vector<20x128xf32> to vector<16x128xf32>
    %40 = vector.extract_strided_slice %33 {offsets = [3, 0], sizes = [16, 128], strides = [1, 1]} : vector<20x128xf32> to vector<16x128xf32>
    %41 = arith.addf %39, %40 : vector<16x128xf32>
    %cst_15 = arith.constant 0.233880758 : f32
    %42 = vector.broadcast %cst_15 : f32 to vector<16x128xf32>
    %43 = arith.mulf %42, %41 : vector<16x128xf32>
    %44 = arith.addf %38, %43 : vector<16x128xf32>
    %45 = vector.extract_strided_slice %33 {offsets = [2, 0], sizes = [16, 128], strides = [1, 1]} : vector<20x128xf32> to vector<16x128xf32>
    %cst_16 = arith.constant 0.292081714 : f32
    %46 = vector.broadcast %cst_16 : f32 to vector<16x128xf32>
    %47 = arith.mulf %46, %45 : vector<16x128xf32>
    %48 = arith.addf %44, %47 : vector<16x128xf32>
    %c0_i32_17 = arith.constant 0 : i32
    %49 = arith.addi %3, %c0_i32_17 : i32
    %50 = arith.index_cast %49 : i32 to index
    %c0_18 = arith.constant 0 : index
    %c0_19 = arith.constant 0 : index
    %51 = vector.load %arg4[%50, %c0_18, %c0_19] : memref<16x16x128xf32, #tpu.memory_space<vmem>>, vector<1x16x128xf32>
    %52 = vector.shape_cast %51 : vector<1x16x128xf32> to vector<16x128xf32>
    %53 = vector.shape_cast %48 : vector<16x128xf32> to vector<1x16x128xf32>
    tpu.vector_store %arg4[%50, %c0_18, %c0_19], %53 {strides = array<i32>} : memref<16x16x128xf32, #tpu.memory_space<vmem>>, vector<1x16x128xf32>,
    %c1_i32_20 = arith.constant 1 : i32
    %54 = arith.addi %3, %c1_i32_20 : i32
    %55 = arith.index_cast %54 : i32 to index
    %c0_21 = arith.constant 0 : index
    %c0_22 = arith.constant 0 : index
    %56 = vector.load %arg2[%55, %c0_21, %c0_22] : memref<16x20x128xf32, #tpu.memory_space<vmem>>, vector<1x20x128xf32>
    %57 = vector.shape_cast %56 : vector<1x20x128xf32> to vector<20x128xf32>
    %c5_i32 = arith.constant 5 : i32
    %58 = arith.addi %3, %c5_i32 : i32
    %59 = arith.index_cast %58 : i32 to index
    %c0_23 = arith.constant 0 : index
    %c0_24 = arith.constant 0 : index
    %60 = vector.load %arg2[%59, %c0_23, %c0_24] : memref<16x20x128xf32, #tpu.memory_space<vmem>>, vector<1x20x128xf32>
    %61 = vector.shape_cast %60 : vector<1x20x128xf32> to vector<20x128xf32>
    %62 = arith.addf %57, %61 : vector<20x128xf32>
    %cst_25 = arith.constant 0.120078385 : f32
    %63 = vector.broadcast %cst_25 : f32 to vector<20x128xf32>
    %64 = arith.mulf %63, %62 : vector<20x128xf32>
    %c2_i32_26 = arith.constant 2 : i32
    %65 = arith.addi %3, %c2_i32_26 : i32
    %66 = arith.index_cast %65 : i32 to index
    %c0_27 = arith.constant 0 : index
    %c0_28 = arith.constant 0 : index
    %67 = vector.load %arg2[%66, %c0_27, %c0_28] : memref<16x20x128xf32, #tpu.memory_space<vmem>>, vector<1x20x128xf32>
    %68 = vector.shape_cast %67 : vector<1x20x128xf32> to vector<20x128xf32>
    %c4_i32_29 = arith.constant 4 : i32
    %69 = arith.addi %3, %c4_i32_29 : i32
    %70 = arith.index_cast %69 : i32 to index
    %c0_30 = arith.constant 0 : index
    %c0_31 = arith.constant 0 : index
    %71 = vector.load %arg2[%70, %c0_30, %c0_31] : memref<16x20x128xf32, #tpu.memory_space<vmem>>, vector<1x20x128xf32>
    %72 = vector.shape_cast %71 : vector<1x20x128xf32> to vector<20x128xf32>
    %73 = arith.addf %68, %72 : vector<20x128xf32>
    %cst_32 = arith.constant 0.233880758 : f32
    %74 = vector.broadcast %cst_32 : f32 to vector<20x128xf32>
    %75 = arith.mulf %74, %73 : vector<20x128xf32>
    %76 = arith.addf %64, %75 : vector<20x128xf32>
    %c3_i32_33 = arith.constant 3 : i32
    %77 = arith.addi %3, %c3_i32_33 : i32
    %78 = arith.index_cast %77 : i32 to index
    %c0_34 = arith.constant 0 : index
    %c0_35 = arith.constant 0 : index
    %79 = vector.load %arg2[%78, %c0_34, %c0_35] : memref<16x20x128xf32, #tpu.memory_space<vmem>>, vector<1x20x128xf32>
    %80 = vector.shape_cast %79 : vector<1x20x128xf32> to vector<20x128xf32>
    %cst_36 = arith.constant 0.292081714 : f32
    %81 = vector.broadcast %cst_36 : f32 to vector<20x128xf32>
    %82 = arith.mulf %81, %80 : vector<20x128xf32>
    %83 = arith.addf %76, %82 : vector<20x128xf32>
    %84 = vector.extract_strided_slice %83 {offsets = [0, 0], sizes = [16, 128], strides = [1, 1]} : vector<20x128xf32> to vector<16x128xf32>
    %85 = vector.extract_strided_slice %83 {offsets = [4, 0], sizes = [16, 128], strides = [1, 1]} : vector<20x128xf32> to vector<16x128xf32>
    %86 = arith.addf %84, %85 : vector<16x128xf32>
    %cst_37 = arith.constant 0.120078385 : f32
    %87 = vector.broadcast %cst_37 : f32 to vector<16x128xf32>
    %88 = arith.mulf %87, %86 : vector<16x128xf32>
    %89 = vector.extract_strided_slice %83 {offsets = [1, 0], sizes = [16, 128], strides = [1, 1]} : vector<20x128xf32> to vector<16x128xf32>
    %90 = vector.extract_strided_slice %83 {offsets = [3, 0], sizes = [16, 128], strides = [1, 1]} : vector<20x128xf32> to vector<16x128xf32>
    %91 = arith.addf %89, %90 : vector<16x128xf32>
    %cst_38 = arith.constant 0.233880758 : f32
    %92 = vector.broadcast %cst_38 : f32 to vector<16x128xf32>
    %93 = arith.mulf %92, %91 : vector<16x128xf32>
    %94 = arith.addf %88, %93 : vector<16x128xf32>
    %95 = vector.extract_strided_slice %83 {offsets = [2, 0], sizes = [16, 128], strides = [1, 1]} : vector<20x128xf32> to vector<16x128xf32>
    %cst_39 = arith.constant 0.292081714 : f32
    %96 = vector.broadcast %cst_39 : f32 to vector<16x128xf32>
    %97 = arith.mulf %96, %95 : vector<16x128xf32>
    %98 = arith.addf %94, %97 : vector<16x128xf32>
    %c1_i32_40 = arith.constant 1 : i32
    %99 = arith.addi %3, %c1_i32_40 : i32
    %100 = arith.index_cast %99 : i32 to index
    %c0_41 = arith.constant 0 : index
    %c0_42 = arith.constant 0 : index
    %101 = vector.load %arg4[%100, %c0_41, %c0_42] : memref<16x16x128xf32, #tpu.memory_space<vmem>>, vector<1x16x128xf32>
    %102 = vector.shape_cast %101 : vector<1x16x128xf32> to vector<16x128xf32>
    %103 = vector.shape_cast %98 : vector<16x128xf32> to vector<1x16x128xf32>
    tpu.vector_store %arg4[%100, %c0_41, %c0_42], %103 {strides = array<i32>} : memref<16x16x128xf32, #tpu.memory_space<vmem>>, vector<1x16x128xf32>,
    %c2_i32_43 = arith.constant 2 : i32
    %104 = arith.addi %3, %c2_i32_43 : i32
    %105 = arith.index_cast %104 : i32 to index
    %c0_44 = arith.constant 0 : index
    %c0_45 = arith.constant 0 : index
    %106 = vector.load %arg2[%105, %c0_44, %c0_45] : memref<16x20x128xf32, #tpu.memory_space<vmem>>, vector<1x20x128xf32>
    %107 = vector.shape_cast %106 : vector<1x20x128xf32> to vector<20x128xf32>
    %c6_i32 = arith.constant 6 : i32
    %108 = arith.addi %3, %c6_i32 : i32
    %109 = arith.index_cast %108 : i32 to index
    %c0_46 = arith.constant 0 : index
    %c0_47 = arith.constant 0 : index
    %110 = vector.load %arg2[%109, %c0_46, %c0_47] : memref<16x20x128xf32, #tpu.memory_space<vmem>>, vector<1x20x128xf32>
    %111 = vector.shape_cast %110 : vector<1x20x128xf32> to vector<20x128xf32>
    %112 = arith.addf %107, %111 : vector<20x128xf32>
    %cst_48 = arith.constant 0.120078385 : f32
    %113 = vector.broadcast %cst_48 : f32 to vector<20x128xf32>
    %114 = arith.mulf %113, %112 : vector<20x128xf32>
    %c3_i32_49 = arith.constant 3 : i32
    %115 = arith.addi %3, %c3_i32_49 : i32
    %116 = arith.index_cast %115 : i32 to index
    %c0_50 = arith.constant 0 : index
    %c0_51 = arith.constant 0 : index
    %117 = vector.load %arg2[%116, %c0_50, %c0_51] : memref<16x20x128xf32, #tpu.memory_space<vmem>>, vector<1x20x128xf32>
    %118 = vector.shape_cast %117 : vector<1x20x128xf32> to vector<20x128xf32>
    %c5_i32_52 = arith.constant 5 : i32
    %119 = arith.addi %3, %c5_i32_52 : i32
    %120 = arith.index_cast %119 : i32 to index
    %c0_53 = arith.constant 0 : index
    %c0_54 = arith.constant 0 : index
    %121 = vector.load %arg2[%120, %c0_53, %c0_54] : memref<16x20x128xf32, #tpu.memory_space<vmem>>, vector<1x20x128xf32>
    %122 = vector.shape_cast %121 : vector<1x20x128xf32> to vector<20x128xf32>
    %123 = arith.addf %118, %122 : vector<20x128xf32>
    %cst_55 = arith.constant 0.233880758 : f32
    %124 = vector.broadcast %cst_55 : f32 to vector<20x128xf32>
    %125 = arith.mulf %124, %123 : vector<20x128xf32>
    %126 = arith.addf %114, %125 : vector<20x128xf32>
    %c4_i32_56 = arith.constant 4 : i32
    %127 = arith.addi %3, %c4_i32_56 : i32
    %128 = arith.index_cast %127 : i32 to index
    %c0_57 = arith.constant 0 : index
    %c0_58 = arith.constant 0 : index
    %129 = vector.load %arg2[%128, %c0_57, %c0_58] : memref<16x20x128xf32, #tpu.memory_space<vmem>>, vector<1x20x128xf32>
    %130 = vector.shape_cast %129 : vector<1x20x128xf32> to vector<20x128xf32>
    %cst_59 = arith.constant 0.292081714 : f32
    %131 = vector.broadcast %cst_59 : f32 to vector<20x128xf32>
    %132 = arith.mulf %131, %130 : vector<20x128xf32>
    %133 = arith.addf %126, %132 : vector<20x128xf32>
    %134 = vector.extract_strided_slice %133 {offsets = [0, 0], sizes = [16, 128], strides = [1, 1]} : vector<20x128xf32> to vector<16x128xf32>
    %135 = vector.extract_strided_slice %133 {offsets = [4, 0], sizes = [16, 128], strides = [1, 1]} : vector<20x128xf32> to vector<16x128xf32>
    %136 = arith.addf %134, %135 : vector<16x128xf32>
    %cst_60 = arith.constant 0.120078385 : f32
    %137 = vector.broadcast %cst_60 : f32 to vector<16x128xf32>
    %138 = arith.mulf %137, %136 : vector<16x128xf32>
    %139 = vector.extract_strided_slice %133 {offsets = [1, 0], sizes = [16, 128], strides = [1, 1]} : vector<20x128xf32> to vector<16x128xf32>
    %140 = vector.extract_strided_slice %133 {offsets = [3, 0], sizes = [16, 128], strides = [1, 1]} : vector<20x128xf32> to vector<16x128xf32>
    %141 = arith.addf %139, %140 : vector<16x128xf32>
    %cst_61 = arith.constant 0.233880758 : f32
    %142 = vector.broadcast %cst_61 : f32 to vector<16x128xf32>
    %143 = arith.mulf %142, %141 : vector<16x128xf32>
    %144 = arith.addf %138, %143 : vector<16x128xf32>
    %145 = vector.extract_strided_slice %133 {offsets = [2, 0], sizes = [16, 128], strides = [1, 1]} : vector<20x128xf32> to vector<16x128xf32>
    %cst_62 = arith.constant 0.292081714 : f32
    %146 = vector.broadcast %cst_62 : f32 to vector<16x128xf32>
    %147 = arith.mulf %146, %145 : vector<16x128xf32>
    %148 = arith.addf %144, %147 : vector<16x128xf32>
    %c2_i32_63 = arith.constant 2 : i32
    %149 = arith.addi %3, %c2_i32_63 : i32
    %150 = arith.index_cast %149 : i32 to index
    %c0_64 = arith.constant 0 : index
    %c0_65 = arith.constant 0 : index
    %151 = vector.load %arg4[%150, %c0_64, %c0_65] : memref<16x16x128xf32, #tpu.memory_space<vmem>>, vector<1x16x128xf32>
    %152 = vector.shape_cast %151 : vector<1x16x128xf32> to vector<16x128xf32>
    %153 = vector.shape_cast %148 : vector<16x128xf32> to vector<1x16x128xf32>
    tpu.vector_store %arg4[%150, %c0_64, %c0_65], %153 {strides = array<i32>} : memref<16x16x128xf32, #tpu.memory_space<vmem>>, vector<1x16x128xf32>,
    %c3_i32_66 = arith.constant 3 : i32
    %154 = arith.addi %3, %c3_i32_66 : i32
    %155 = arith.index_cast %154 : i32 to index
    %c0_67 = arith.constant 0 : index
    %c0_68 = arith.constant 0 : index
    %156 = vector.load %arg2[%155, %c0_67, %c0_68] : memref<16x20x128xf32, #tpu.memory_space<vmem>>, vector<1x20x128xf32>
    %157 = vector.shape_cast %156 : vector<1x20x128xf32> to vector<20x128xf32>
    %c7_i32 = arith.constant 7 : i32
    %158 = arith.addi %3, %c7_i32 : i32
    %159 = arith.index_cast %158 : i32 to index
    %c0_69 = arith.constant 0 : index
    %c0_70 = arith.constant 0 : index
    %160 = vector.load %arg2[%159, %c0_69, %c0_70] : memref<16x20x128xf32, #tpu.memory_space<vmem>>, vector<1x20x128xf32>
    %161 = vector.shape_cast %160 : vector<1x20x128xf32> to vector<20x128xf32>
    %162 = arith.addf %157, %161 : vector<20x128xf32>
    %cst_71 = arith.constant 0.120078385 : f32
    %163 = vector.broadcast %cst_71 : f32 to vector<20x128xf32>
    %164 = arith.mulf %163, %162 : vector<20x128xf32>
    %c4_i32_72 = arith.constant 4 : i32
    %165 = arith.addi %3, %c4_i32_72 : i32
    %166 = arith.index_cast %165 : i32 to index
    %c0_73 = arith.constant 0 : index
    %c0_74 = arith.constant 0 : index
    %167 = vector.load %arg2[%166, %c0_73, %c0_74] : memref<16x20x128xf32, #tpu.memory_space<vmem>>, vector<1x20x128xf32>
    %168 = vector.shape_cast %167 : vector<1x20x128xf32> to vector<20x128xf32>
    %c6_i32_75 = arith.constant 6 : i32
    %169 = arith.addi %3, %c6_i32_75 : i32
    %170 = arith.index_cast %169 : i32 to index
    %c0_76 = arith.constant 0 : index
    %c0_77 = arith.constant 0 : index
    %171 = vector.load %arg2[%170, %c0_76, %c0_77] : memref<16x20x128xf32, #tpu.memory_space<vmem>>, vector<1x20x128xf32>
    %172 = vector.shape_cast %171 : vector<1x20x128xf32> to vector<20x128xf32>
    %173 = arith.addf %168, %172 : vector<20x128xf32>
    %cst_78 = arith.constant 0.233880758 : f32
    %174 = vector.broadcast %cst_78 : f32 to vector<20x128xf32>
    %175 = arith.mulf %174, %173 : vector<20x128xf32>
    %176 = arith.addf %164, %175 : vector<20x128xf32>
    %c5_i32_79 = arith.constant 5 : i32
    %177 = arith.addi %3, %c5_i32_79 : i32
    %178 = arith.index_cast %177 : i32 to index
    %c0_80 = arith.constant 0 : index
    %c0_81 = arith.constant 0 : index
    %179 = vector.load %arg2[%178, %c0_80, %c0_81] : memref<16x20x128xf32, #tpu.memory_space<vmem>>, vector<1x20x128xf32>
    %180 = vector.shape_cast %179 : vector<1x20x128xf32> to vector<20x128xf32>
    %cst_82 = arith.constant 0.292081714 : f32
    %181 = vector.broadcast %cst_82 : f32 to vector<20x128xf32>
    %182 = arith.mulf %181, %180 : vector<20x128xf32>
    %183 = arith.addf %176, %182 : vector<20x128xf32>
    %184 = vector.extract_strided_slice %183 {offsets = [0, 0], sizes = [16, 128], strides = [1, 1]} : vector<20x128xf32> to vector<16x128xf32>
    %185 = vector.extract_strided_slice %183 {offsets = [4, 0], sizes = [16, 128], strides = [1, 1]} : vector<20x128xf32> to vector<16x128xf32>
    %186 = arith.addf %184, %185 : vector<16x128xf32>
    %cst_83 = arith.constant 0.120078385 : f32
    %187 = vector.broadcast %cst_83 : f32 to vector<16x128xf32>
    %188 = arith.mulf %187, %186 : vector<16x128xf32>
    %189 = vector.extract_strided_slice %183 {offsets = [1, 0], sizes = [16, 128], strides = [1, 1]} : vector<20x128xf32> to vector<16x128xf32>
    %190 = vector.extract_strided_slice %183 {offsets = [3, 0], sizes = [16, 128], strides = [1, 1]} : vector<20x128xf32> to vector<16x128xf32>
    %191 = arith.addf %189, %190 : vector<16x128xf32>
    %cst_84 = arith.constant 0.233880758 : f32
    %192 = vector.broadcast %cst_84 : f32 to vector<16x128xf32>
    %193 = arith.mulf %192, %191 : vector<16x128xf32>
    %194 = arith.addf %188, %193 : vector<16x128xf32>
    %195 = vector.extract_strided_slice %183 {offsets = [2, 0], sizes = [16, 128], strides = [1, 1]} : vector<20x128xf32> to vector<16x128xf32>
    %cst_85 = arith.constant 0.292081714 : f32
    %196 = vector.broadcast %cst_85 : f32 to vector<16x128xf32>
    %197 = arith.mulf %196, %195 : vector<16x128xf32>
    %198 = arith.addf %194, %197 : vector<16x128xf32>
    %c3_i32_86 = arith.constant 3 : i32
    %199 = arith.addi %3, %c3_i32_86 : i32
    %200 = arith.index_cast %199 : i32 to index
    %c0_87 = arith.constant 0 : index
    %c0_88 = arith.constant 0 : index
    %201 = vector.load %arg4[%200, %c0_87, %c0_88] : memref<16x16x128xf32, #tpu.memory_space<vmem>>, vector<1x16x128xf32>
    %202 = vector.shape_cast %201 : vector<1x16x128xf32> to vector<16x128xf32>
    %203 = vector.shape_cast %198 : vector<16x128xf32> to vector<1x16x128xf32>
    tpu.vector_store %arg4[%200, %c0_87, %c0_88], %203 {strides = array<i32>} : memref<16x16x128xf32, #tpu.memory_space<vmem>>, vector<1x16x128xf32>,
    %c4_i32_89 = arith.constant 4 : i32
    %204 = arith.addi %3, %c4_i32_89 : i32
    %205 = arith.index_cast %204 : i32 to index
    %c0_90 = arith.constant 0 : index
    %c0_91 = arith.constant 0 : index
    %206 = vector.load %arg2[%205, %c0_90, %c0_91] : memref<16x20x128xf32, #tpu.memory_space<vmem>>, vector<1x20x128xf32>
    %207 = vector.shape_cast %206 : vector<1x20x128xf32> to vector<20x128xf32>
    %c8_i32_92 = arith.constant 8 : i32
    %208 = arith.addi %3, %c8_i32_92 : i32
    %209 = arith.index_cast %208 : i32 to index
    %c0_93 = arith.constant 0 : index
    %c0_94 = arith.constant 0 : index
    %210 = vector.load %arg2[%209, %c0_93, %c0_94] : memref<16x20x128xf32, #tpu.memory_space<vmem>>, vector<1x20x128xf32>
    %211 = vector.shape_cast %210 : vector<1x20x128xf32> to vector<20x128xf32>
    %212 = arith.addf %207, %211 : vector<20x128xf32>
    %cst_95 = arith.constant 0.120078385 : f32
    %213 = vector.broadcast %cst_95 : f32 to vector<20x128xf32>
    %214 = arith.mulf %213, %212 : vector<20x128xf32>
    %c5_i32_96 = arith.constant 5 : i32
    %215 = arith.addi %3, %c5_i32_96 : i32
    %216 = arith.index_cast %215 : i32 to index
    %c0_97 = arith.constant 0 : index
    %c0_98 = arith.constant 0 : index
    %217 = vector.load %arg2[%216, %c0_97, %c0_98] : memref<16x20x128xf32, #tpu.memory_space<vmem>>, vector<1x20x128xf32>
    %218 = vector.shape_cast %217 : vector<1x20x128xf32> to vector<20x128xf32>
    %c7_i32_99 = arith.constant 7 : i32
    %219 = arith.addi %3, %c7_i32_99 : i32
    %220 = arith.index_cast %219 : i32 to index
    %c0_100 = arith.constant 0 : index
    %c0_101 = arith.constant 0 : index
    %221 = vector.load %arg2[%220, %c0_100, %c0_101] : memref<16x20x128xf32, #tpu.memory_space<vmem>>, vector<1x20x128xf32>
    %222 = vector.shape_cast %221 : vector<1x20x128xf32> to vector<20x128xf32>
    %223 = arith.addf %218, %222 : vector<20x128xf32>
    %cst_102 = arith.constant 0.233880758 : f32
    %224 = vector.broadcast %cst_102 : f32 to vector<20x128xf32>
    %225 = arith.mulf %224, %223 : vector<20x128xf32>
    %226 = arith.addf %214, %225 : vector<20x128xf32>
    %c6_i32_103 = arith.constant 6 : i32
    %227 = arith.addi %3, %c6_i32_103 : i32
    %228 = arith.index_cast %227 : i32 to index
    %c0_104 = arith.constant 0 : index
    %c0_105 = arith.constant 0 : index
    %229 = vector.load %arg2[%228, %c0_104, %c0_105] : memref<16x20x128xf32, #tpu.memory_space<vmem>>, vector<1x20x128xf32>
    %230 = vector.shape_cast %229 : vector<1x20x128xf32> to vector<20x128xf32>
    %cst_106 = arith.constant 0.292081714 : f32
    %231 = vector.broadcast %cst_106 : f32 to vector<20x128xf32>
    %232 = arith.mulf %231, %230 : vector<20x128xf32>
    %233 = arith.addf %226, %232 : vector<20x128xf32>
    %234 = vector.extract_strided_slice %233 {offsets = [0, 0], sizes = [16, 128], strides = [1, 1]} : vector<20x128xf32> to vector<16x128xf32>
    %235 = vector.extract_strided_slice %233 {offsets = [4, 0], sizes = [16, 128], strides = [1, 1]} : vector<20x128xf32> to vector<16x128xf32>
    %236 = arith.addf %234, %235 : vector<16x128xf32>
    %cst_107 = arith.constant 0.120078385 : f32
    %237 = vector.broadcast %cst_107 : f32 to vector<16x128xf32>
    %238 = arith.mulf %237, %236 : vector<16x128xf32>
    %239 = vector.extract_strided_slice %233 {offsets = [1, 0], sizes = [16, 128], strides = [1, 1]} : vector<20x128xf32> to vector<16x128xf32>
    %240 = vector.extract_strided_slice %233 {offsets = [3, 0], sizes = [16, 128], strides = [1, 1]} : vector<20x128xf32> to vector<16x128xf32>
    %241 = arith.addf %239, %240 : vector<16x128xf32>
    %cst_108 = arith.constant 0.233880758 : f32
    %242 = vector.broadcast %cst_108 : f32 to vector<16x128xf32>
    %243 = arith.mulf %242, %241 : vector<16x128xf32>
    %244 = arith.addf %238, %243 : vector<16x128xf32>
    %245 = vector.extract_strided_slice %233 {offsets = [2, 0], sizes = [16, 128], strides = [1, 1]} : vector<20x128xf32> to vector<16x128xf32>
    %cst_109 = arith.constant 0.292081714 : f32
    %246 = vector.broadcast %cst_109 : f32 to vector<16x128xf32>
    %247 = arith.mulf %246, %245 : vector<16x128xf32>
    %248 = arith.addf %244, %247 : vector<16x128xf32>
    %c4_i32_110 = arith.constant 4 : i32
    %249 = arith.addi %3, %c4_i32_110 : i32
    %250 = arith.index_cast %249 : i32 to index
    %c0_111 = arith.constant 0 : index
    %c0_112 = arith.constant 0 : index
    %251 = vector.load %arg4[%250, %c0_111, %c0_112] : memref<16x16x128xf32, #tpu.memory_space<vmem>>, vector<1x16x128xf32>
    %252 = vector.shape_cast %251 : vector<1x16x128xf32> to vector<16x128xf32>
    %253 = vector.shape_cast %248 : vector<16x128xf32> to vector<1x16x128xf32>
    tpu.vector_store %arg4[%250, %c0_111, %c0_112], %253 {strides = array<i32>} : memref<16x16x128xf32, #tpu.memory_space<vmem>>, vector<1x16x128xf32>,
    %c5_i32_113 = arith.constant 5 : i32
    %254 = arith.addi %3, %c5_i32_113 : i32
    %255 = arith.index_cast %254 : i32 to index
    %c0_114 = arith.constant 0 : index
    %c0_115 = arith.constant 0 : index
    %256 = vector.load %arg2[%255, %c0_114, %c0_115] : memref<16x20x128xf32, #tpu.memory_space<vmem>>, vector<1x20x128xf32>
    %257 = vector.shape_cast %256 : vector<1x20x128xf32> to vector<20x128xf32>
    %c9_i32 = arith.constant 9 : i32
    %258 = arith.addi %3, %c9_i32 : i32
    %259 = arith.index_cast %258 : i32 to index
    %c0_116 = arith.constant 0 : index
    %c0_117 = arith.constant 0 : index
    %260 = vector.load %arg2[%259, %c0_116, %c0_117] : memref<16x20x128xf32, #tpu.memory_space<vmem>>, vector<1x20x128xf32>
    %261 = vector.shape_cast %260 : vector<1x20x128xf32> to vector<20x128xf32>
    %262 = arith.addf %257, %261 : vector<20x128xf32>
    %cst_118 = arith.constant 0.120078385 : f32
    %263 = vector.broadcast %cst_118 : f32 to vector<20x128xf32>
    %264 = arith.mulf %263, %262 : vector<20x128xf32>
    %c6_i32_119 = arith.constant 6 : i32
    %265 = arith.addi %3, %c6_i32_119 : i32
    %266 = arith.index_cast %265 : i32 to index
    %c0_120 = arith.constant 0 : index
    %c0_121 = arith.constant 0 : index
    %267 = vector.load %arg2[%266, %c0_120, %c0_121] : memref<16x20x128xf32, #tpu.memory_space<vmem>>, vector<1x20x128xf32>
    %268 = vector.shape_cast %267 : vector<1x20x128xf32> to vector<20x128xf32>
    %c8_i32_122 = arith.constant 8 : i32
    %269 = arith.addi %3, %c8_i32_122 : i32
    %270 = arith.index_cast %269 : i32 to index
    %c0_123 = arith.constant 0 : index
    %c0_124 = arith.constant 0 : index
    %271 = vector.load %arg2[%270, %c0_123, %c0_124] : memref<16x20x128xf32, #tpu.memory_space<vmem>>, vector<1x20x128xf32>
    %272 = vector.shape_cast %271 : vector<1x20x128xf32> to vector<20x128xf32>
    %273 = arith.addf %268, %272 : vector<20x128xf32>
    %cst_125 = arith.constant 0.233880758 : f32
    %274 = vector.broadcast %cst_125 : f32 to vector<20x128xf32>
    %275 = arith.mulf %274, %273 : vector<20x128xf32>
    %276 = arith.addf %264, %275 : vector<20x128xf32>
    %c7_i32_126 = arith.constant 7 : i32
    %277 = arith.addi %3, %c7_i32_126 : i32
    %278 = arith.index_cast %277 : i32 to index
    %c0_127 = arith.constant 0 : index
    %c0_128 = arith.constant 0 : index
    %279 = vector.load %arg2[%278, %c0_127, %c0_128] : memref<16x20x128xf32, #tpu.memory_space<vmem>>, vector<1x20x128xf32>
    %280 = vector.shape_cast %279 : vector<1x20x128xf32> to vector<20x128xf32>
    %cst_129 = arith.constant 0.292081714 : f32
    %281 = vector.broadcast %cst_129 : f32 to vector<20x128xf32>
    %282 = arith.mulf %281, %280 : vector<20x128xf32>
    %283 = arith.addf %276, %282 : vector<20x128xf32>
    %284 = vector.extract_strided_slice %283 {offsets = [0, 0], sizes = [16, 128], strides = [1, 1]} : vector<20x128xf32> to vector<16x128xf32>
    %285 = vector.extract_strided_slice %283 {offsets = [4, 0], sizes = [16, 128], strides = [1, 1]} : vector<20x128xf32> to vector<16x128xf32>
    %286 = arith.addf %284, %285 : vector<16x128xf32>
    %cst_130 = arith.constant 0.120078385 : f32
    %287 = vector.broadcast %cst_130 : f32 to vector<16x128xf32>
    %288 = arith.mulf %287, %286 : vector<16x128xf32>
    %289 = vector.extract_strided_slice %283 {offsets = [1, 0], sizes = [16, 128], strides = [1, 1]} : vector<20x128xf32> to vector<16x128xf32>
    %290 = vector.extract_strided_slice %283 {offsets = [3, 0], sizes = [16, 128], strides = [1, 1]} : vector<20x128xf32> to vector<16x128xf32>
    %291 = arith.addf %289, %290 : vector<16x128xf32>
    %cst_131 = arith.constant 0.233880758 : f32
    %292 = vector.broadcast %cst_131 : f32 to vector<16x128xf32>
    %293 = arith.mulf %292, %291 : vector<16x128xf32>
    %294 = arith.addf %288, %293 : vector<16x128xf32>
    %295 = vector.extract_strided_slice %283 {offsets = [2, 0], sizes = [16, 128], strides = [1, 1]} : vector<20x128xf32> to vector<16x128xf32>
    %cst_132 = arith.constant 0.292081714 : f32
    %296 = vector.broadcast %cst_132 : f32 to vector<16x128xf32>
    %297 = arith.mulf %296, %295 : vector<16x128xf32>
    %298 = arith.addf %294, %297 : vector<16x128xf32>
    %c5_i32_133 = arith.constant 5 : i32
    %299 = arith.addi %3, %c5_i32_133 : i32
    %300 = arith.index_cast %299 : i32 to index
    %c0_134 = arith.constant 0 : index
    %c0_135 = arith.constant 0 : index
    %301 = vector.load %arg4[%300, %c0_134, %c0_135] : memref<16x16x128xf32, #tpu.memory_space<vmem>>, vector<1x16x128xf32>
    %302 = vector.shape_cast %301 : vector<1x16x128xf32> to vector<16x128xf32>
    %303 = vector.shape_cast %298 : vector<16x128xf32> to vector<1x16x128xf32>
    tpu.vector_store %arg4[%300, %c0_134, %c0_135], %303 {strides = array<i32>} : memref<16x16x128xf32, #tpu.memory_space<vmem>>, vector<1x16x128xf32>,
    %c6_i32_136 = arith.constant 6 : i32
    %304 = arith.addi %3, %c6_i32_136 : i32
    %305 = arith.index_cast %304 : i32 to index
    %c0_137 = arith.constant 0 : index
    %c0_138 = arith.constant 0 : index
    %306 = vector.load %arg2[%305, %c0_137, %c0_138] : memref<16x20x128xf32, #tpu.memory_space<vmem>>, vector<1x20x128xf32>
    %307 = vector.shape_cast %306 : vector<1x20x128xf32> to vector<20x128xf32>
    %c10_i32 = arith.constant 10 : i32
    %308 = arith.addi %3, %c10_i32 : i32
    %309 = arith.index_cast %308 : i32 to index
    %c0_139 = arith.constant 0 : index
    %c0_140 = arith.constant 0 : index
    %310 = vector.load %arg2[%309, %c0_139, %c0_140] : memref<16x20x128xf32, #tpu.memory_space<vmem>>, vector<1x20x128xf32>
    %311 = vector.shape_cast %310 : vector<1x20x128xf32> to vector<20x128xf32>
    %312 = arith.addf %307, %311 : vector<20x128xf32>
    %cst_141 = arith.constant 0.120078385 : f32
    %313 = vector.broadcast %cst_141 : f32 to vector<20x128xf32>
    %314 = arith.mulf %313, %312 : vector<20x128xf32>
    %c7_i32_142 = arith.constant 7 : i32
    %315 = arith.addi %3, %c7_i32_142 : i32
    %316 = arith.index_cast %315 : i32 to index
    %c0_143 = arith.constant 0 : index
    %c0_144 = arith.constant 0 : index
    %317 = vector.load %arg2[%316, %c0_143, %c0_144] : memref<16x20x128xf32, #tpu.memory_space<vmem>>, vector<1x20x128xf32>
    %318 = vector.shape_cast %317 : vector<1x20x128xf32> to vector<20x128xf32>
    %c9_i32_145 = arith.constant 9 : i32
    %319 = arith.addi %3, %c9_i32_145 : i32
    %320 = arith.index_cast %319 : i32 to index
    %c0_146 = arith.constant 0 : index
    %c0_147 = arith.constant 0 : index
    %321 = vector.load %arg2[%320, %c0_146, %c0_147] : memref<16x20x128xf32, #tpu.memory_space<vmem>>, vector<1x20x128xf32>
    %322 = vector.shape_cast %321 : vector<1x20x128xf32> to vector<20x128xf32>
    %323 = arith.addf %318, %322 : vector<20x128xf32>
    %cst_148 = arith.constant 0.233880758 : f32
    %324 = vector.broadcast %cst_148 : f32 to vector<20x128xf32>
    %325 = arith.mulf %324, %323 : vector<20x128xf32>
    %326 = arith.addf %314, %325 : vector<20x128xf32>
    %c8_i32_149 = arith.constant 8 : i32
    %327 = arith.addi %3, %c8_i32_149 : i32
    %328 = arith.index_cast %327 : i32 to index
    %c0_150 = arith.constant 0 : index
    %c0_151 = arith.constant 0 : index
    %329 = vector.load %arg2[%328, %c0_150, %c0_151] : memref<16x20x128xf32, #tpu.memory_space<vmem>>, vector<1x20x128xf32>
    %330 = vector.shape_cast %329 : vector<1x20x128xf32> to vector<20x128xf32>
    %cst_152 = arith.constant 0.292081714 : f32
    %331 = vector.broadcast %cst_152 : f32 to vector<20x128xf32>
    %332 = arith.mulf %331, %330 : vector<20x128xf32>
    %333 = arith.addf %326, %332 : vector<20x128xf32>
    %334 = vector.extract_strided_slice %333 {offsets = [0, 0], sizes = [16, 128], strides = [1, 1]} : vector<20x128xf32> to vector<16x128xf32>
    %335 = vector.extract_strided_slice %333 {offsets = [4, 0], sizes = [16, 128], strides = [1, 1]} : vector<20x128xf32> to vector<16x128xf32>
    %336 = arith.addf %334, %335 : vector<16x128xf32>
    %cst_153 = arith.constant 0.120078385 : f32
    %337 = vector.broadcast %cst_153 : f32 to vector<16x128xf32>
    %338 = arith.mulf %337, %336 : vector<16x128xf32>
    %339 = vector.extract_strided_slice %333 {offsets = [1, 0], sizes = [16, 128], strides = [1, 1]} : vector<20x128xf32> to vector<16x128xf32>
    %340 = vector.extract_strided_slice %333 {offsets = [3, 0], sizes = [16, 128], strides = [1, 1]} : vector<20x128xf32> to vector<16x128xf32>
    %341 = arith.addf %339, %340 : vector<16x128xf32>
    %cst_154 = arith.constant 0.233880758 : f32
    %342 = vector.broadcast %cst_154 : f32 to vector<16x128xf32>
    %343 = arith.mulf %342, %341 : vector<16x128xf32>
    %344 = arith.addf %338, %343 : vector<16x128xf32>
    %345 = vector.extract_strided_slice %333 {offsets = [2, 0], sizes = [16, 128], strides = [1, 1]} : vector<20x128xf32> to vector<16x128xf32>
    %cst_155 = arith.constant 0.292081714 : f32
    %346 = vector.broadcast %cst_155 : f32 to vector<16x128xf32>
    %347 = arith.mulf %346, %345 : vector<16x128xf32>
    %348 = arith.addf %344, %347 : vector<16x128xf32>
    %c6_i32_156 = arith.constant 6 : i32
    %349 = arith.addi %3, %c6_i32_156 : i32
    %350 = arith.index_cast %349 : i32 to index
    %c0_157 = arith.constant 0 : index
    %c0_158 = arith.constant 0 : index
    %351 = vector.load %arg4[%350, %c0_157, %c0_158] : memref<16x16x128xf32, #tpu.memory_space<vmem>>, vector<1x16x128xf32>
    %352 = vector.shape_cast %351 : vector<1x16x128xf32> to vector<16x128xf32>
    %353 = vector.shape_cast %348 : vector<16x128xf32> to vector<1x16x128xf32>
    tpu.vector_store %arg4[%350, %c0_157, %c0_158], %353 {strides = array<i32>} : memref<16x16x128xf32, #tpu.memory_space<vmem>>, vector<1x16x128xf32>,
    %c7_i32_159 = arith.constant 7 : i32
    %354 = arith.addi %3, %c7_i32_159 : i32
    %355 = arith.index_cast %354 : i32 to index
    %c0_160 = arith.constant 0 : index
    %c0_161 = arith.constant 0 : index
    %356 = vector.load %arg2[%355, %c0_160, %c0_161] : memref<16x20x128xf32, #tpu.memory_space<vmem>>, vector<1x20x128xf32>
    %357 = vector.shape_cast %356 : vector<1x20x128xf32> to vector<20x128xf32>
    %c11_i32 = arith.constant 11 : i32
    %358 = arith.addi %3, %c11_i32 : i32
    %359 = arith.index_cast %358 : i32 to index
    %c0_162 = arith.constant 0 : index
    %c0_163 = arith.constant 0 : index
    %360 = vector.load %arg2[%359, %c0_162, %c0_163] : memref<16x20x128xf32, #tpu.memory_space<vmem>>, vector<1x20x128xf32>
    %361 = vector.shape_cast %360 : vector<1x20x128xf32> to vector<20x128xf32>
    %362 = arith.addf %357, %361 : vector<20x128xf32>
    %cst_164 = arith.constant 0.120078385 : f32
    %363 = vector.broadcast %cst_164 : f32 to vector<20x128xf32>
    %364 = arith.mulf %363, %362 : vector<20x128xf32>
    %c8_i32_165 = arith.constant 8 : i32
    %365 = arith.addi %3, %c8_i32_165 : i32
    %366 = arith.index_cast %365 : i32 to index
    %c0_166 = arith.constant 0 : index
    %c0_167 = arith.constant 0 : index
    %367 = vector.load %arg2[%366, %c0_166, %c0_167] : memref<16x20x128xf32, #tpu.memory_space<vmem>>, vector<1x20x128xf32>
    %368 = vector.shape_cast %367 : vector<1x20x128xf32> to vector<20x128xf32>
    %c10_i32_168 = arith.constant 10 : i32
    %369 = arith.addi %3, %c10_i32_168 : i32
    %370 = arith.index_cast %369 : i32 to index
    %c0_169 = arith.constant 0 : index
    %c0_170 = arith.constant 0 : index
    %371 = vector.load %arg2[%370, %c0_169, %c0_170] : memref<16x20x128xf32, #tpu.memory_space<vmem>>, vector<1x20x128xf32>
    %372 = vector.shape_cast %371 : vector<1x20x128xf32> to vector<20x128xf32>
    %373 = arith.addf %368, %372 : vector<20x128xf32>
    %cst_171 = arith.constant 0.233880758 : f32
    %374 = vector.broadcast %cst_171 : f32 to vector<20x128xf32>
    %375 = arith.mulf %374, %373 : vector<20x128xf32>
    %376 = arith.addf %364, %375 : vector<20x128xf32>
    %c9_i32_172 = arith.constant 9 : i32
    %377 = arith.addi %3, %c9_i32_172 : i32
    %378 = arith.index_cast %377 : i32 to index
    %c0_173 = arith.constant 0 : index
    %c0_174 = arith.constant 0 : index
    %379 = vector.load %arg2[%378, %c0_173, %c0_174] : memref<16x20x128xf32, #tpu.memory_space<vmem>>, vector<1x20x128xf32>
    %380 = vector.shape_cast %379 : vector<1x20x128xf32> to vector<20x128xf32>
    %cst_175 = arith.constant 0.292081714 : f32
    %381 = vector.broadcast %cst_175 : f32 to vector<20x128xf32>
    %382 = arith.mulf %381, %380 : vector<20x128xf32>
    %383 = arith.addf %376, %382 : vector<20x128xf32>
    %384 = vector.extract_strided_slice %383 {offsets = [0, 0], sizes = [16, 128], strides = [1, 1]} : vector<20x128xf32> to vector<16x128xf32>
    %385 = vector.extract_strided_slice %383 {offsets = [4, 0], sizes = [16, 128], strides = [1, 1]} : vector<20x128xf32> to vector<16x128xf32>
    %386 = arith.addf %384, %385 : vector<16x128xf32>
    %cst_176 = arith.constant 0.120078385 : f32
    %387 = vector.broadcast %cst_176 : f32 to vector<16x128xf32>
    %388 = arith.mulf %387, %386 : vector<16x128xf32>
    %389 = vector.extract_strided_slice %383 {offsets = [1, 0], sizes = [16, 128], strides = [1, 1]} : vector<20x128xf32> to vector<16x128xf32>
    %390 = vector.extract_strided_slice %383 {offsets = [3, 0], sizes = [16, 128], strides = [1, 1]} : vector<20x128xf32> to vector<16x128xf32>
    %391 = arith.addf %389, %390 : vector<16x128xf32>
    %cst_177 = arith.constant 0.233880758 : f32
    %392 = vector.broadcast %cst_177 : f32 to vector<16x128xf32>
    %393 = arith.mulf %392, %391 : vector<16x128xf32>
    %394 = arith.addf %388, %393 : vector<16x128xf32>
    %395 = vector.extract_strided_slice %383 {offsets = [2, 0], sizes = [16, 128], strides = [1, 1]} : vector<20x128xf32> to vector<16x128xf32>
    %cst_178 = arith.constant 0.292081714 : f32
    %396 = vector.broadcast %cst_178 : f32 to vector<16x128xf32>
    %397 = arith.mulf %396, %395 : vector<16x128xf32>
    %398 = arith.addf %394, %397 : vector<16x128xf32>
    %c7_i32_179 = arith.constant 7 : i32
    %399 = arith.addi %3, %c7_i32_179 : i32
    %400 = arith.index_cast %399 : i32 to index
    %c0_180 = arith.constant 0 : index
    %c0_181 = arith.constant 0 : index
    %401 = vector.load %arg4[%400, %c0_180, %c0_181] : memref<16x16x128xf32, #tpu.memory_space<vmem>>, vector<1x16x128xf32>
    %402 = vector.shape_cast %401 : vector<1x16x128xf32> to vector<16x128xf32>
    %403 = vector.shape_cast %398 : vector<16x128xf32> to vector<1x16x128xf32>
    tpu.vector_store %arg4[%400, %c0_180, %c0_181], %403 {strides = array<i32>} : memref<16x16x128xf32, #tpu.memory_space<vmem>>, vector<1x16x128xf32>,
    %c1_i32_182 = arith.constant 1 : i32
    %c8 = arith.constant 8 : index
    %c0_183 = arith.constant 0 : index
    %c0_184 = arith.constant 0 : index
    %404 = vector.load %arg2[%c8, %c0_183, %c0_184] : memref<16x20x128xf32, #tpu.memory_space<vmem>>, vector<1x20x128xf32>
    %405 = vector.shape_cast %404 : vector<1x20x128xf32> to vector<20x128xf32>
    %c12 = arith.constant 12 : index
    %c0_185 = arith.constant 0 : index
    %c0_186 = arith.constant 0 : index
    %406 = vector.load %arg2[%c12, %c0_185, %c0_186] : memref<16x20x128xf32, #tpu.memory_space<vmem>>, vector<1x20x128xf32>
    %407 = vector.shape_cast %406 : vector<1x20x128xf32> to vector<20x128xf32>
    %408 = arith.addf %405, %407 : vector<20x128xf32>
    %cst_187 = arith.constant 0.120078385 : f32
    %409 = vector.broadcast %cst_187 : f32 to vector<20x128xf32>
    %410 = arith.mulf %409, %408 : vector<20x128xf32>
    %c9 = arith.constant 9 : index
    %c0_188 = arith.constant 0 : index
    %c0_189 = arith.constant 0 : index
    %411 = vector.load %arg2[%c9, %c0_188, %c0_189] : memref<16x20x128xf32, #tpu.memory_space<vmem>>, vector<1x20x128xf32>
    %412 = vector.shape_cast %411 : vector<1x20x128xf32> to vector<20x128xf32>
    %c11 = arith.constant 11 : index
    %c0_190 = arith.constant 0 : index
    %c0_191 = arith.constant 0 : index
    %413 = vector.load %arg2[%c11, %c0_190, %c0_191] : memref<16x20x128xf32, #tpu.memory_space<vmem>>, vector<1x20x128xf32>
    %414 = vector.shape_cast %413 : vector<1x20x128xf32> to vector<20x128xf32>
    %415 = arith.addf %412, %414 : vector<20x128xf32>
    %cst_192 = arith.constant 0.233880758 : f32
    %416 = vector.broadcast %cst_192 : f32 to vector<20x128xf32>
    %417 = arith.mulf %416, %415 : vector<20x128xf32>
    %418 = arith.addf %410, %417 : vector<20x128xf32>
    %c10 = arith.constant 10 : index
    %c0_193 = arith.constant 0 : index
    %c0_194 = arith.constant 0 : index
    %419 = vector.load %arg2[%c10, %c0_193, %c0_194] : memref<16x20x128xf32, #tpu.memory_space<vmem>>, vector<1x20x128xf32>
    %420 = vector.shape_cast %419 : vector<1x20x128xf32> to vector<20x128xf32>
    %cst_195 = arith.constant 0.292081714 : f32
    %421 = vector.broadcast %cst_195 : f32 to vector<20x128xf32>
    %422 = arith.mulf %421, %420 : vector<20x128xf32>
    %423 = arith.addf %418, %422 : vector<20x128xf32>
    %424 = vector.extract_strided_slice %423 {offsets = [0, 0], sizes = [16, 128], strides = [1, 1]} : vector<20x128xf32> to vector<16x128xf32>
    %425 = vector.extract_strided_slice %423 {offsets = [4, 0], sizes = [16, 128], strides = [1, 1]} : vector<20x128xf32> to vector<16x128xf32>
    %426 = arith.addf %424, %425 : vector<16x128xf32>
    %cst_196 = arith.constant 0.120078385 : f32
    %427 = vector.broadcast %cst_196 : f32 to vector<16x128xf32>
    %428 = arith.mulf %427, %426 : vector<16x128xf32>
    %429 = vector.extract_strided_slice %423 {offsets = [1, 0], sizes = [16, 128], strides = [1, 1]} : vector<20x128xf32> to vector<16x128xf32>
    %430 = vector.extract_strided_slice %423 {offsets = [3, 0], sizes = [16, 128], strides = [1, 1]} : vector<20x128xf32> to vector<16x128xf32>
    %431 = arith.addf %429, %430 : vector<16x128xf32>
    %cst_197 = arith.constant 0.233880758 : f32
    %432 = vector.broadcast %cst_197 : f32 to vector<16x128xf32>
    %433 = arith.mulf %432, %431 : vector<16x128xf32>
    %434 = arith.addf %428, %433 : vector<16x128xf32>
    %435 = vector.extract_strided_slice %423 {offsets = [2, 0], sizes = [16, 128], strides = [1, 1]} : vector<20x128xf32> to vector<16x128xf32>
    %cst_198 = arith.constant 0.292081714 : f32
    %436 = vector.broadcast %cst_198 : f32 to vector<16x128xf32>
    %437 = arith.mulf %436, %435 : vector<16x128xf32>
    %438 = arith.addf %434, %437 : vector<16x128xf32>
    %c8_199 = arith.constant 8 : index
    %c0_200 = arith.constant 0 : index
    %c0_201 = arith.constant 0 : index
    %439 = vector.load %arg4[%c8_199, %c0_200, %c0_201] : memref<16x16x128xf32, #tpu.memory_space<vmem>>, vector<1x16x128xf32>
    %440 = vector.shape_cast %439 : vector<1x16x128xf32> to vector<16x128xf32>
    %441 = vector.shape_cast %438 : vector<16x128xf32> to vector<1x16x128xf32>
    tpu.vector_store %arg4[%c8_199, %c0_200, %c0_201], %441 {strides = array<i32>} : memref<16x16x128xf32, #tpu.memory_space<vmem>>, vector<1x16x128xf32>,
    %c9_202 = arith.constant 9 : index
    %c0_203 = arith.constant 0 : index
    %c0_204 = arith.constant 0 : index
    %442 = vector.load %arg2[%c9_202, %c0_203, %c0_204] : memref<16x20x128xf32, #tpu.memory_space<vmem>>, vector<1x20x128xf32>
    %443 = vector.shape_cast %442 : vector<1x20x128xf32> to vector<20x128xf32>
    %c13 = arith.constant 13 : index
    %c0_205 = arith.constant 0 : index
    %c0_206 = arith.constant 0 : index
    %444 = vector.load %arg2[%c13, %c0_205, %c0_206] : memref<16x20x128xf32, #tpu.memory_space<vmem>>, vector<1x20x128xf32>
    %445 = vector.shape_cast %444 : vector<1x20x128xf32> to vector<20x128xf32>
    %446 = arith.addf %443, %445 : vector<20x128xf32>
    %cst_207 = arith.constant 0.120078385 : f32
    %447 = vector.broadcast %cst_207 : f32 to vector<20x128xf32>
    %448 = arith.mulf %447, %446 : vector<20x128xf32>
    %c10_208 = arith.constant 10 : index
    %c0_209 = arith.constant 0 : index
    %c0_210 = arith.constant 0 : index
    %449 = vector.load %arg2[%c10_208, %c0_209, %c0_210] : memref<16x20x128xf32, #tpu.memory_space<vmem>>, vector<1x20x128xf32>
    %450 = vector.shape_cast %449 : vector<1x20x128xf32> to vector<20x128xf32>
    %c12_211 = arith.constant 12 : index
    %c0_212 = arith.constant 0 : index
    %c0_213 = arith.constant 0 : index
    %451 = vector.load %arg2[%c12_211, %c0_212, %c0_213] : memref<16x20x128xf32, #tpu.memory_space<vmem>>, vector<1x20x128xf32>
    %452 = vector.shape_cast %451 : vector<1x20x128xf32> to vector<20x128xf32>
    %453 = arith.addf %450, %452 : vector<20x128xf32>
    %cst_214 = arith.constant 0.233880758 : f32
    %454 = vector.broadcast %cst_214 : f32 to vector<20x128xf32>
    %455 = arith.mulf %454, %453 : vector<20x128xf32>
    %456 = arith.addf %448, %455 : vector<20x128xf32>
    %c11_215 = arith.constant 11 : index
    %c0_216 = arith.constant 0 : index
    %c0_217 = arith.constant 0 : index
    %457 = vector.load %arg2[%c11_215, %c0_216, %c0_217] : memref<16x20x128xf32, #tpu.memory_space<vmem>>, vector<1x20x128xf32>
    %458 = vector.shape_cast %457 : vector<1x20x128xf32> to vector<20x128xf32>
    %cst_218 = arith.constant 0.292081714 : f32
    %459 = vector.broadcast %cst_218 : f32 to vector<20x128xf32>
    %460 = arith.mulf %459, %458 : vector<20x128xf32>
    %461 = arith.addf %456, %460 : vector<20x128xf32>
    %462 = vector.extract_strided_slice %461 {offsets = [0, 0], sizes = [16, 128], strides = [1, 1]} : vector<20x128xf32> to vector<16x128xf32>
    %463 = vector.extract_strided_slice %461 {offsets = [4, 0], sizes = [16, 128], strides = [1, 1]} : vector<20x128xf32> to vector<16x128xf32>
    %464 = arith.addf %462, %463 : vector<16x128xf32>
    %cst_219 = arith.constant 0.120078385 : f32
    %465 = vector.broadcast %cst_219 : f32 to vector<16x128xf32>
    %466 = arith.mulf %465, %464 : vector<16x128xf32>
    %467 = vector.extract_strided_slice %461 {offsets = [1, 0], sizes = [16, 128], strides = [1, 1]} : vector<20x128xf32> to vector<16x128xf32>
    %468 = vector.extract_strided_slice %461 {offsets = [3, 0], sizes = [16, 128], strides = [1, 1]} : vector<20x128xf32> to vector<16x128xf32>
    %469 = arith.addf %467, %468 : vector<16x128xf32>
    %cst_220 = arith.constant 0.233880758 : f32
    %470 = vector.broadcast %cst_220 : f32 to vector<16x128xf32>
    %471 = arith.mulf %470, %469 : vector<16x128xf32>
    %472 = arith.addf %466, %471 : vector<16x128xf32>
    %473 = vector.extract_strided_slice %461 {offsets = [2, 0], sizes = [16, 128], strides = [1, 1]} : vector<20x128xf32> to vector<16x128xf32>
    %cst_221 = arith.constant 0.292081714 : f32
    %474 = vector.broadcast %cst_221 : f32 to vector<16x128xf32>
    %475 = arith.mulf %474, %473 : vector<16x128xf32>
    %476 = arith.addf %472, %475 : vector<16x128xf32>
    %c9_222 = arith.constant 9 : index
    %c0_223 = arith.constant 0 : index
    %c0_224 = arith.constant 0 : index
    %477 = vector.load %arg4[%c9_222, %c0_223, %c0_224] : memref<16x16x128xf32, #tpu.memory_space<vmem>>, vector<1x16x128xf32>
    %478 = vector.shape_cast %477 : vector<1x16x128xf32> to vector<16x128xf32>
    %479 = vector.shape_cast %476 : vector<16x128xf32> to vector<1x16x128xf32>
    tpu.vector_store %arg4[%c9_222, %c0_223, %c0_224], %479 {strides = array<i32>} : memref<16x16x128xf32, #tpu.memory_space<vmem>>, vector<1x16x128xf32>,
    %c10_225 = arith.constant 10 : index
    %c0_226 = arith.constant 0 : index
    %c0_227 = arith.constant 0 : index
    %480 = vector.load %arg2[%c10_225, %c0_226, %c0_227] : memref<16x20x128xf32, #tpu.memory_space<vmem>>, vector<1x20x128xf32>
    %481 = vector.shape_cast %480 : vector<1x20x128xf32> to vector<20x128xf32>
    %c14 = arith.constant 14 : index
    %c0_228 = arith.constant 0 : index
    %c0_229 = arith.constant 0 : index
    %482 = vector.load %arg2[%c14, %c0_228, %c0_229] : memref<16x20x128xf32, #tpu.memory_space<vmem>>, vector<1x20x128xf32>
    %483 = vector.shape_cast %482 : vector<1x20x128xf32> to vector<20x128xf32>
    %484 = arith.addf %481, %483 : vector<20x128xf32>
    %cst_230 = arith.constant 0.120078385 : f32
    %485 = vector.broadcast %cst_230 : f32 to vector<20x128xf32>
    %486 = arith.mulf %485, %484 : vector<20x128xf32>
    %c11_231 = arith.constant 11 : index
    %c0_232 = arith.constant 0 : index
    %c0_233 = arith.constant 0 : index
    %487 = vector.load %arg2[%c11_231, %c0_232, %c0_233] : memref<16x20x128xf32, #tpu.memory_space<vmem>>, vector<1x20x128xf32>
    %488 = vector.shape_cast %487 : vector<1x20x128xf32> to vector<20x128xf32>
    %c13_234 = arith.constant 13 : index
    %c0_235 = arith.constant 0 : index
    %c0_236 = arith.constant 0 : index
    %489 = vector.load %arg2[%c13_234, %c0_235, %c0_236] : memref<16x20x128xf32, #tpu.memory_space<vmem>>, vector<1x20x128xf32>
    %490 = vector.shape_cast %489 : vector<1x20x128xf32> to vector<20x128xf32>
    %491 = arith.addf %488, %490 : vector<20x128xf32>
    %cst_237 = arith.constant 0.233880758 : f32
    %492 = vector.broadcast %cst_237 : f32 to vector<20x128xf32>
    %493 = arith.mulf %492, %491 : vector<20x128xf32>
    %494 = arith.addf %486, %493 : vector<20x128xf32>
    %c12_238 = arith.constant 12 : index
    %c0_239 = arith.constant 0 : index
    %c0_240 = arith.constant 0 : index
    %495 = vector.load %arg2[%c12_238, %c0_239, %c0_240] : memref<16x20x128xf32, #tpu.memory_space<vmem>>, vector<1x20x128xf32>
    %496 = vector.shape_cast %495 : vector<1x20x128xf32> to vector<20x128xf32>
    %cst_241 = arith.constant 0.292081714 : f32
    %497 = vector.broadcast %cst_241 : f32 to vector<20x128xf32>
    %498 = arith.mulf %497, %496 : vector<20x128xf32>
    %499 = arith.addf %494, %498 : vector<20x128xf32>
    %500 = vector.extract_strided_slice %499 {offsets = [0, 0], sizes = [16, 128], strides = [1, 1]} : vector<20x128xf32> to vector<16x128xf32>
    %501 = vector.extract_strided_slice %499 {offsets = [4, 0], sizes = [16, 128], strides = [1, 1]} : vector<20x128xf32> to vector<16x128xf32>
    %502 = arith.addf %500, %501 : vector<16x128xf32>
    %cst_242 = arith.constant 0.120078385 : f32
    %503 = vector.broadcast %cst_242 : f32 to vector<16x128xf32>
    %504 = arith.mulf %503, %502 : vector<16x128xf32>
    %505 = vector.extract_strided_slice %499 {offsets = [1, 0], sizes = [16, 128], strides = [1, 1]} : vector<20x128xf32> to vector<16x128xf32>
    %506 = vector.extract_strided_slice %499 {offsets = [3, 0], sizes = [16, 128], strides = [1, 1]} : vector<20x128xf32> to vector<16x128xf32>
    %507 = arith.addf %505, %506 : vector<16x128xf32>
    %cst_243 = arith.constant 0.233880758 : f32
    %508 = vector.broadcast %cst_243 : f32 to vector<16x128xf32>
    %509 = arith.mulf %508, %507 : vector<16x128xf32>
    %510 = arith.addf %504, %509 : vector<16x128xf32>
    %511 = vector.extract_strided_slice %499 {offsets = [2, 0], sizes = [16, 128], strides = [1, 1]} : vector<20x128xf32> to vector<16x128xf32>
    %cst_244 = arith.constant 0.292081714 : f32
    %512 = vector.broadcast %cst_244 : f32 to vector<16x128xf32>
    %513 = arith.mulf %512, %511 : vector<16x128xf32>
    %514 = arith.addf %510, %513 : vector<16x128xf32>
    %c10_245 = arith.constant 10 : index
    %c0_246 = arith.constant 0 : index
    %c0_247 = arith.constant 0 : index
    %515 = vector.load %arg4[%c10_245, %c0_246, %c0_247] : memref<16x16x128xf32, #tpu.memory_space<vmem>>, vector<1x16x128xf32>
    %516 = vector.shape_cast %515 : vector<1x16x128xf32> to vector<16x128xf32>
    %517 = vector.shape_cast %514 : vector<16x128xf32> to vector<1x16x128xf32>
    tpu.vector_store %arg4[%c10_245, %c0_246, %c0_247], %517 {strides = array<i32>} : memref<16x16x128xf32, #tpu.memory_space<vmem>>, vector<1x16x128xf32>,
    %c11_248 = arith.constant 11 : index
    %c0_249 = arith.constant 0 : index
    %c0_250 = arith.constant 0 : index
    %518 = vector.load %arg2[%c11_248, %c0_249, %c0_250] : memref<16x20x128xf32, #tpu.memory_space<vmem>>, vector<1x20x128xf32>
    %519 = vector.shape_cast %518 : vector<1x20x128xf32> to vector<20x128xf32>
    %c15 = arith.constant 15 : index
    %c0_251 = arith.constant 0 : index
    %c0_252 = arith.constant 0 : index
    %520 = vector.load %arg2[%c15, %c0_251, %c0_252] : memref<16x20x128xf32, #tpu.memory_space<vmem>>, vector<1x20x128xf32>
    %521 = vector.shape_cast %520 : vector<1x20x128xf32> to vector<20x128xf32>
    %522 = arith.addf %519, %521 : vector<20x128xf32>
    %cst_253 = arith.constant 0.120078385 : f32
    %523 = vector.broadcast %cst_253 : f32 to vector<20x128xf32>
    %524 = arith.mulf %523, %522 : vector<20x128xf32>
    %c12_254 = arith.constant 12 : index
    %c0_255 = arith.constant 0 : index
    %c0_256 = arith.constant 0 : index
    %525 = vector.load %arg2[%c12_254, %c0_255, %c0_256] : memref<16x20x128xf32, #tpu.memory_space<vmem>>, vector<1x20x128xf32>
    %526 = vector.shape_cast %525 : vector<1x20x128xf32> to vector<20x128xf32>
    %c14_257 = arith.constant 14 : index
    %c0_258 = arith.constant 0 : index
    %c0_259 = arith.constant 0 : index
    %527 = vector.load %arg2[%c14_257, %c0_258, %c0_259] : memref<16x20x128xf32, #tpu.memory_space<vmem>>, vector<1x20x128xf32>
    %528 = vector.shape_cast %527 : vector<1x20x128xf32> to vector<20x128xf32>
    %529 = arith.addf %526, %528 : vector<20x128xf32>
    %cst_260 = arith.constant 0.233880758 : f32
    %530 = vector.broadcast %cst_260 : f32 to vector<20x128xf32>
    %531 = arith.mulf %530, %529 : vector<20x128xf32>
    %532 = arith.addf %524, %531 : vector<20x128xf32>
    %c13_261 = arith.constant 13 : index
    %c0_262 = arith.constant 0 : index
    %c0_263 = arith.constant 0 : index
    %533 = vector.load %arg2[%c13_261, %c0_262, %c0_263] : memref<16x20x128xf32, #tpu.memory_space<vmem>>, vector<1x20x128xf32>
    %534 = vector.shape_cast %533 : vector<1x20x128xf32> to vector<20x128xf32>
    %cst_264 = arith.constant 0.292081714 : f32
    %535 = vector.broadcast %cst_264 : f32 to vector<20x128xf32>
    %536 = arith.mulf %535, %534 : vector<20x128xf32>
    %537 = arith.addf %532, %536 : vector<20x128xf32>
    %538 = vector.extract_strided_slice %537 {offsets = [0, 0], sizes = [16, 128], strides = [1, 1]} : vector<20x128xf32> to vector<16x128xf32>
    %539 = vector.extract_strided_slice %537 {offsets = [4, 0], sizes = [16, 128], strides = [1, 1]} : vector<20x128xf32> to vector<16x128xf32>
    %540 = arith.addf %538, %539 : vector<16x128xf32>
    %cst_265 = arith.constant 0.120078385 : f32
    %541 = vector.broadcast %cst_265 : f32 to vector<16x128xf32>
    %542 = arith.mulf %541, %540 : vector<16x128xf32>
    %543 = vector.extract_strided_slice %537 {offsets = [1, 0], sizes = [16, 128], strides = [1, 1]} : vector<20x128xf32> to vector<16x128xf32>
    %544 = vector.extract_strided_slice %537 {offsets = [3, 0], sizes = [16, 128], strides = [1, 1]} : vector<20x128xf32> to vector<16x128xf32>
    %545 = arith.addf %543, %544 : vector<16x128xf32>
    %cst_266 = arith.constant 0.233880758 : f32
    %546 = vector.broadcast %cst_266 : f32 to vector<16x128xf32>
    %547 = arith.mulf %546, %545 : vector<16x128xf32>
    %548 = arith.addf %542, %547 : vector<16x128xf32>
    %549 = vector.extract_strided_slice %537 {offsets = [2, 0], sizes = [16, 128], strides = [1, 1]} : vector<20x128xf32> to vector<16x128xf32>
    %cst_267 = arith.constant 0.292081714 : f32
    %550 = vector.broadcast %cst_267 : f32 to vector<16x128xf32>
    %551 = arith.mulf %550, %549 : vector<16x128xf32>
    %552 = arith.addf %548, %551 : vector<16x128xf32>
    %c11_268 = arith.constant 11 : index
    %c0_269 = arith.constant 0 : index
    %c0_270 = arith.constant 0 : index
    %553 = vector.load %arg4[%c11_268, %c0_269, %c0_270] : memref<16x16x128xf32, #tpu.memory_space<vmem>>, vector<1x16x128xf32>
    %554 = vector.shape_cast %553 : vector<1x16x128xf32> to vector<16x128xf32>
    %555 = vector.shape_cast %552 : vector<16x128xf32> to vector<1x16x128xf32>
    tpu.vector_store %arg4[%c11_268, %c0_269, %c0_270], %555 {strides = array<i32>} : memref<16x16x128xf32, #tpu.memory_space<vmem>>, vector<1x16x128xf32>,
    %c12_271 = arith.constant 12 : index
    %c0_272 = arith.constant 0 : index
    %c0_273 = arith.constant 0 : index
    %556 = vector.load %arg2[%c12_271, %c0_272, %c0_273] : memref<16x20x128xf32, #tpu.memory_space<vmem>>, vector<1x20x128xf32>
    %557 = vector.shape_cast %556 : vector<1x20x128xf32> to vector<20x128xf32>
    %c0_274 = arith.constant 0 : index
    %c0_275 = arith.constant 0 : index
    %c0_276 = arith.constant 0 : index
    %558 = vector.load %arg3[%c0_274, %c0_275, %c0_276] : memref<4x20x128xf32, #tpu.memory_space<vmem>>, vector<1x20x128xf32>
    %559 = vector.shape_cast %558 : vector<1x20x128xf32> to vector<20x128xf32>
    %560 = arith.addf %557, %559 : vector<20x128xf32>
    %cst_277 = arith.constant 0.120078385 : f32
    %561 = vector.broadcast %cst_277 : f32 to vector<20x128xf32>
    %562 = arith.mulf %561, %560 : vector<20x128xf32>
    %c13_278 = arith.constant 13 : index
    %c0_279 = arith.constant 0 : index
    %c0_280 = arith.constant 0 : index
    %563 = vector.load %arg2[%c13_278, %c0_279, %c0_280] : memref<16x20x128xf32, #tpu.memory_space<vmem>>, vector<1x20x128xf32>
    %564 = vector.shape_cast %563 : vector<1x20x128xf32> to vector<20x128xf32>
    %c15_281 = arith.constant 15 : index
    %c0_282 = arith.constant 0 : index
    %c0_283 = arith.constant 0 : index
    %565 = vector.load %arg2[%c15_281, %c0_282, %c0_283] : memref<16x20x128xf32, #tpu.memory_space<vmem>>, vector<1x20x128xf32>
    %566 = vector.shape_cast %565 : vector<1x20x128xf32> to vector<20x128xf32>
    %567 = arith.addf %564, %566 : vector<20x128xf32>
    %cst_284 = arith.constant 0.233880758 : f32
    %568 = vector.broadcast %cst_284 : f32 to vector<20x128xf32>
    %569 = arith.mulf %568, %567 : vector<20x128xf32>
    %570 = arith.addf %562, %569 : vector<20x128xf32>
    %c14_285 = arith.constant 14 : index
    %c0_286 = arith.constant 0 : index
    %c0_287 = arith.constant 0 : index
    %571 = vector.load %arg2[%c14_285, %c0_286, %c0_287] : memref<16x20x128xf32, #tpu.memory_space<vmem>>, vector<1x20x128xf32>
    %572 = vector.shape_cast %571 : vector<1x20x128xf32> to vector<20x128xf32>
    %cst_288 = arith.constant 0.292081714 : f32
    %573 = vector.broadcast %cst_288 : f32 to vector<20x128xf32>
    %574 = arith.mulf %573, %572 : vector<20x128xf32>
    %575 = arith.addf %570, %574 : vector<20x128xf32>
    %576 = vector.extract_strided_slice %575 {offsets = [0, 0], sizes = [16, 128], strides = [1, 1]} : vector<20x128xf32> to vector<16x128xf32>
    %577 = vector.extract_strided_slice %575 {offsets = [4, 0], sizes = [16, 128], strides = [1, 1]} : vector<20x128xf32> to vector<16x128xf32>
    %578 = arith.addf %576, %577 : vector<16x128xf32>
    %cst_289 = arith.constant 0.120078385 : f32
    %579 = vector.broadcast %cst_289 : f32 to vector<16x128xf32>
    %580 = arith.mulf %579, %578 : vector<16x128xf32>
    %581 = vector.extract_strided_slice %575 {offsets = [1, 0], sizes = [16, 128], strides = [1, 1]} : vector<20x128xf32> to vector<16x128xf32>
    %582 = vector.extract_strided_slice %575 {offsets = [3, 0], sizes = [16, 128], strides = [1, 1]} : vector<20x128xf32> to vector<16x128xf32>
    %583 = arith.addf %581, %582 : vector<16x128xf32>
    %cst_290 = arith.constant 0.233880758 : f32
    %584 = vector.broadcast %cst_290 : f32 to vector<16x128xf32>
    %585 = arith.mulf %584, %583 : vector<16x128xf32>
    %586 = arith.addf %580, %585 : vector<16x128xf32>
    %587 = vector.extract_strided_slice %575 {offsets = [2, 0], sizes = [16, 128], strides = [1, 1]} : vector<20x128xf32> to vector<16x128xf32>
    %cst_291 = arith.constant 0.292081714 : f32
    %588 = vector.broadcast %cst_291 : f32 to vector<16x128xf32>
    %589 = arith.mulf %588, %587 : vector<16x128xf32>
    %590 = arith.addf %586, %589 : vector<16x128xf32>
    %c12_292 = arith.constant 12 : index
    %c0_293 = arith.constant 0 : index
    %c0_294 = arith.constant 0 : index
    %591 = vector.load %arg4[%c12_292, %c0_293, %c0_294] : memref<16x16x128xf32, #tpu.memory_space<vmem>>, vector<1x16x128xf32>
    %592 = vector.shape_cast %591 : vector<1x16x128xf32> to vector<16x128xf32>
    %593 = vector.shape_cast %590 : vector<16x128xf32> to vector<1x16x128xf32>
    tpu.vector_store %arg4[%c12_292, %c0_293, %c0_294], %593 {strides = array<i32>} : memref<16x16x128xf32, #tpu.memory_space<vmem>>, vector<1x16x128xf32>,
    %c13_295 = arith.constant 13 : index
    %c0_296 = arith.constant 0 : index
    %c0_297 = arith.constant 0 : index
    %594 = vector.load %arg2[%c13_295, %c0_296, %c0_297] : memref<16x20x128xf32, #tpu.memory_space<vmem>>, vector<1x20x128xf32>
    %595 = vector.shape_cast %594 : vector<1x20x128xf32> to vector<20x128xf32>
    %c1 = arith.constant 1 : index
    %c0_298 = arith.constant 0 : index
    %c0_299 = arith.constant 0 : index
    %596 = vector.load %arg3[%c1, %c0_298, %c0_299] : memref<4x20x128xf32, #tpu.memory_space<vmem>>, vector<1x20x128xf32>
    %597 = vector.shape_cast %596 : vector<1x20x128xf32> to vector<20x128xf32>
    %598 = arith.addf %595, %597 : vector<20x128xf32>
    %cst_300 = arith.constant 0.120078385 : f32
    %599 = vector.broadcast %cst_300 : f32 to vector<20x128xf32>
    %600 = arith.mulf %599, %598 : vector<20x128xf32>
    %c14_301 = arith.constant 14 : index
    %c0_302 = arith.constant 0 : index
    %c0_303 = arith.constant 0 : index
    %601 = vector.load %arg2[%c14_301, %c0_302, %c0_303] : memref<16x20x128xf32, #tpu.memory_space<vmem>>, vector<1x20x128xf32>
    %602 = vector.shape_cast %601 : vector<1x20x128xf32> to vector<20x128xf32>
    %c0_304 = arith.constant 0 : index
    %c0_305 = arith.constant 0 : index
    %c0_306 = arith.constant 0 : index
    %603 = vector.load %arg3[%c0_304, %c0_305, %c0_306] : memref<4x20x128xf32, #tpu.memory_space<vmem>>, vector<1x20x128xf32>
    %604 = vector.shape_cast %603 : vector<1x20x128xf32> to vector<20x128xf32>
    %605 = arith.addf %602, %604 : vector<20x128xf32>
    %cst_307 = arith.constant 0.233880758 : f32
    %606 = vector.broadcast %cst_307 : f32 to vector<20x128xf32>
    %607 = arith.mulf %606, %605 : vector<20x128xf32>
    %608 = arith.addf %600, %607 : vector<20x128xf32>
    %c15_308 = arith.constant 15 : index
    %c0_309 = arith.constant 0 : index
    %c0_310 = arith.constant 0 : index
    %609 = vector.load %arg2[%c15_308, %c0_309, %c0_310] : memref<16x20x128xf32, #tpu.memory_space<vmem>>, vector<1x20x128xf32>
    %610 = vector.shape_cast %609 : vector<1x20x128xf32> to vector<20x128xf32>
    %cst_311 = arith.constant 0.292081714 : f32
    %611 = vector.broadcast %cst_311 : f32 to vector<20x128xf32>
    %612 = arith.mulf %611, %610 : vector<20x128xf32>
    %613 = arith.addf %608, %612 : vector<20x128xf32>
    %614 = vector.extract_strided_slice %613 {offsets = [0, 0], sizes = [16, 128], strides = [1, 1]} : vector<20x128xf32> to vector<16x128xf32>
    %615 = vector.extract_strided_slice %613 {offsets = [4, 0], sizes = [16, 128], strides = [1, 1]} : vector<20x128xf32> to vector<16x128xf32>
    %616 = arith.addf %614, %615 : vector<16x128xf32>
    %cst_312 = arith.constant 0.120078385 : f32
    %617 = vector.broadcast %cst_312 : f32 to vector<16x128xf32>
    %618 = arith.mulf %617, %616 : vector<16x128xf32>
    %619 = vector.extract_strided_slice %613 {offsets = [1, 0], sizes = [16, 128], strides = [1, 1]} : vector<20x128xf32> to vector<16x128xf32>
    %620 = vector.extract_strided_slice %613 {offsets = [3, 0], sizes = [16, 128], strides = [1, 1]} : vector<20x128xf32> to vector<16x128xf32>
    %621 = arith.addf %619, %620 : vector<16x128xf32>
    %cst_313 = arith.constant 0.233880758 : f32
    %622 = vector.broadcast %cst_313 : f32 to vector<16x128xf32>
    %623 = arith.mulf %622, %621 : vector<16x128xf32>
    %624 = arith.addf %618, %623 : vector<16x128xf32>
    %625 = vector.extract_strided_slice %613 {offsets = [2, 0], sizes = [16, 128], strides = [1, 1]} : vector<20x128xf32> to vector<16x128xf32>
    %cst_314 = arith.constant 0.292081714 : f32
    %626 = vector.broadcast %cst_314 : f32 to vector<16x128xf32>
    %627 = arith.mulf %626, %625 : vector<16x128xf32>
    %628 = arith.addf %624, %627 : vector<16x128xf32>
    %c13_315 = arith.constant 13 : index
    %c0_316 = arith.constant 0 : index
    %c0_317 = arith.constant 0 : index
    %629 = vector.load %arg4[%c13_315, %c0_316, %c0_317] : memref<16x16x128xf32, #tpu.memory_space<vmem>>, vector<1x16x128xf32>
    %630 = vector.shape_cast %629 : vector<1x16x128xf32> to vector<16x128xf32>
    %631 = vector.shape_cast %628 : vector<16x128xf32> to vector<1x16x128xf32>
    tpu.vector_store %arg4[%c13_315, %c0_316, %c0_317], %631 {strides = array<i32>} : memref<16x16x128xf32, #tpu.memory_space<vmem>>, vector<1x16x128xf32>,
    %c14_318 = arith.constant 14 : index
    %c0_319 = arith.constant 0 : index
    %c0_320 = arith.constant 0 : index
    %632 = vector.load %arg2[%c14_318, %c0_319, %c0_320] : memref<16x20x128xf32, #tpu.memory_space<vmem>>, vector<1x20x128xf32>
    %633 = vector.shape_cast %632 : vector<1x20x128xf32> to vector<20x128xf32>
    %c2 = arith.constant 2 : index
    %c0_321 = arith.constant 0 : index
    %c0_322 = arith.constant 0 : index
    %634 = vector.load %arg3[%c2, %c0_321, %c0_322] : memref<4x20x128xf32, #tpu.memory_space<vmem>>, vector<1x20x128xf32>
    %635 = vector.shape_cast %634 : vector<1x20x128xf32> to vector<20x128xf32>
    %636 = arith.addf %633, %635 : vector<20x128xf32>
    %cst_323 = arith.constant 0.120078385 : f32
    %637 = vector.broadcast %cst_323 : f32 to vector<20x128xf32>
    %638 = arith.mulf %637, %636 : vector<20x128xf32>
    %c15_324 = arith.constant 15 : index
    %c0_325 = arith.constant 0 : index
    %c0_326 = arith.constant 0 : index
    %639 = vector.load %arg2[%c15_324, %c0_325, %c0_326] : memref<16x20x128xf32, #tpu.memory_space<vmem>>, vector<1x20x128xf32>
    %640 = vector.shape_cast %639 : vector<1x20x128xf32> to vector<20x128xf32>
    %c1_327 = arith.constant 1 : index
    %c0_328 = arith.constant 0 : index
    %c0_329 = arith.constant 0 : index
    %641 = vector.load %arg3[%c1_327, %c0_328, %c0_329] : memref<4x20x128xf32, #tpu.memory_space<vmem>>, vector<1x20x128xf32>
    %642 = vector.shape_cast %641 : vector<1x20x128xf32> to vector<20x128xf32>
    %643 = arith.addf %640, %642 : vector<20x128xf32>
    %cst_330 = arith.constant 0.233880758 : f32
    %644 = vector.broadcast %cst_330 : f32 to vector<20x128xf32>
    %645 = arith.mulf %644, %643 : vector<20x128xf32>
    %646 = arith.addf %638, %645 : vector<20x128xf32>
    %c0_331 = arith.constant 0 : index
    %c0_332 = arith.constant 0 : index
    %c0_333 = arith.constant 0 : index
    %647 = vector.load %arg3[%c0_331, %c0_332, %c0_333] : memref<4x20x128xf32, #tpu.memory_space<vmem>>, vector<1x20x128xf32>
    %648 = vector.shape_cast %647 : vector<1x20x128xf32> to vector<20x128xf32>
    %cst_334 = arith.constant 0.292081714 : f32
    %649 = vector.broadcast %cst_334 : f32 to vector<20x128xf32>
    %650 = arith.mulf %649, %648 : vector<20x128xf32>
    %651 = arith.addf %646, %650 : vector<20x128xf32>
    %652 = vector.extract_strided_slice %651 {offsets = [0, 0], sizes = [16, 128], strides = [1, 1]} : vector<20x128xf32> to vector<16x128xf32>
    %653 = vector.extract_strided_slice %651 {offsets = [4, 0], sizes = [16, 128], strides = [1, 1]} : vector<20x128xf32> to vector<16x128xf32>
    %654 = arith.addf %652, %653 : vector<16x128xf32>
    %cst_335 = arith.constant 0.120078385 : f32
    %655 = vector.broadcast %cst_335 : f32 to vector<16x128xf32>
    %656 = arith.mulf %655, %654 : vector<16x128xf32>
    %657 = vector.extract_strided_slice %651 {offsets = [1, 0], sizes = [16, 128], strides = [1, 1]} : vector<20x128xf32> to vector<16x128xf32>
    %658 = vector.extract_strided_slice %651 {offsets = [3, 0], sizes = [16, 128], strides = [1, 1]} : vector<20x128xf32> to vector<16x128xf32>
    %659 = arith.addf %657, %658 : vector<16x128xf32>
    %cst_336 = arith.constant 0.233880758 : f32
    %660 = vector.broadcast %cst_336 : f32 to vector<16x128xf32>
    %661 = arith.mulf %660, %659 : vector<16x128xf32>
    %662 = arith.addf %656, %661 : vector<16x128xf32>
    %663 = vector.extract_strided_slice %651 {offsets = [2, 0], sizes = [16, 128], strides = [1, 1]} : vector<20x128xf32> to vector<16x128xf32>
    %cst_337 = arith.constant 0.292081714 : f32
    %664 = vector.broadcast %cst_337 : f32 to vector<16x128xf32>
    %665 = arith.mulf %664, %663 : vector<16x128xf32>
    %666 = arith.addf %662, %665 : vector<16x128xf32>
    %c14_338 = arith.constant 14 : index
    %c0_339 = arith.constant 0 : index
    %c0_340 = arith.constant 0 : index
    %667 = vector.load %arg4[%c14_338, %c0_339, %c0_340] : memref<16x16x128xf32, #tpu.memory_space<vmem>>, vector<1x16x128xf32>
    %668 = vector.shape_cast %667 : vector<1x16x128xf32> to vector<16x128xf32>
    %669 = vector.shape_cast %666 : vector<16x128xf32> to vector<1x16x128xf32>
    tpu.vector_store %arg4[%c14_338, %c0_339, %c0_340], %669 {strides = array<i32>} : memref<16x16x128xf32, #tpu.memory_space<vmem>>, vector<1x16x128xf32>,
    %c15_341 = arith.constant 15 : index
    %c0_342 = arith.constant 0 : index
    %c0_343 = arith.constant 0 : index
    %670 = vector.load %arg2[%c15_341, %c0_342, %c0_343] : memref<16x20x128xf32, #tpu.memory_space<vmem>>, vector<1x20x128xf32>
    %671 = vector.shape_cast %670 : vector<1x20x128xf32> to vector<20x128xf32>
    %c3 = arith.constant 3 : index
    %c0_344 = arith.constant 0 : index
    %c0_345 = arith.constant 0 : index
    %672 = vector.load %arg3[%c3, %c0_344, %c0_345] : memref<4x20x128xf32, #tpu.memory_space<vmem>>, vector<1x20x128xf32>
    %673 = vector.shape_cast %672 : vector<1x20x128xf32> to vector<20x128xf32>
    %674 = arith.addf %671, %673 : vector<20x128xf32>
    %cst_346 = arith.constant 0.120078385 : f32
    %675 = vector.broadcast %cst_346 : f32 to vector<20x128xf32>
    %676 = arith.mulf %675, %674 : vector<20x128xf32>
    %c0_347 = arith.constant 0 : index
    %c0_348 = arith.constant 0 : index
    %c0_349 = arith.constant 0 : index
    %677 = vector.load %arg3[%c0_347, %c0_348, %c0_349] : memref<4x20x128xf32, #tpu.memory_space<vmem>>, vector<1x20x128xf32>
    %678 = vector.shape_cast %677 : vector<1x20x128xf32> to vector<20x128xf32>
    %c2_350 = arith.constant 2 : index
    %c0_351 = arith.constant 0 : index
    %c0_352 = arith.constant 0 : index
    %679 = vector.load %arg3[%c2_350, %c0_351, %c0_352] : memref<4x20x128xf32, #tpu.memory_space<vmem>>, vector<1x20x128xf32>
    %680 = vector.shape_cast %679 : vector<1x20x128xf32> to vector<20x128xf32>
    %681 = arith.addf %678, %680 : vector<20x128xf32>
    %cst_353 = arith.constant 0.233880758 : f32
    %682 = vector.broadcast %cst_353 : f32 to vector<20x128xf32>
    %683 = arith.mulf %682, %681 : vector<20x128xf32>
    %684 = arith.addf %676, %683 : vector<20x128xf32>
    %c1_354 = arith.constant 1 : index
    %c0_355 = arith.constant 0 : index
    %c0_356 = arith.constant 0 : index
    %685 = vector.load %arg3[%c1_354, %c0_355, %c0_356] : memref<4x20x128xf32, #tpu.memory_space<vmem>>, vector<1x20x128xf32>
    %686 = vector.shape_cast %685 : vector<1x20x128xf32> to vector<20x128xf32>
    %cst_357 = arith.constant 0.292081714 : f32
    %687 = vector.broadcast %cst_357 : f32 to vector<20x128xf32>
    %688 = arith.mulf %687, %686 : vector<20x128xf32>
    %689 = arith.addf %684, %688 : vector<20x128xf32>
    %690 = vector.extract_strided_slice %689 {offsets = [0, 0], sizes = [16, 128], strides = [1, 1]} : vector<20x128xf32> to vector<16x128xf32>
    %691 = vector.extract_strided_slice %689 {offsets = [4, 0], sizes = [16, 128], strides = [1, 1]} : vector<20x128xf32> to vector<16x128xf32>
    %692 = arith.addf %690, %691 : vector<16x128xf32>
    %cst_358 = arith.constant 0.120078385 : f32
    %693 = vector.broadcast %cst_358 : f32 to vector<16x128xf32>
    %694 = arith.mulf %693, %692 : vector<16x128xf32>
    %695 = vector.extract_strided_slice %689 {offsets = [1, 0], sizes = [16, 128], strides = [1, 1]} : vector<20x128xf32> to vector<16x128xf32>
    %696 = vector.extract_strided_slice %689 {offsets = [3, 0], sizes = [16, 128], strides = [1, 1]} : vector<20x128xf32> to vector<16x128xf32>
    %697 = arith.addf %695, %696 : vector<16x128xf32>
    %cst_359 = arith.constant 0.233880758 : f32
    %698 = vector.broadcast %cst_359 : f32 to vector<16x128xf32>
    %699 = arith.mulf %698, %697 : vector<16x128xf32>
    %700 = arith.addf %694, %699 : vector<16x128xf32>
    %701 = vector.extract_strided_slice %689 {offsets = [2, 0], sizes = [16, 128], strides = [1, 1]} : vector<20x128xf32> to vector<16x128xf32>
    %cst_360 = arith.constant 0.292081714 : f32
    %702 = vector.broadcast %cst_360 : f32 to vector<16x128xf32>
    %703 = arith.mulf %702, %701 : vector<16x128xf32>
    %704 = arith.addf %700, %703 : vector<16x128xf32>
    %c15_361 = arith.constant 15 : index
    %c0_362 = arith.constant 0 : index
    %c0_363 = arith.constant 0 : index
    %705 = vector.load %arg4[%c15_361, %c0_362, %c0_363] : memref<16x16x128xf32, #tpu.memory_space<vmem>>, vector<1x16x128xf32>
    %706 = vector.shape_cast %705 : vector<1x16x128xf32> to vector<16x128xf32>
    %707 = vector.shape_cast %704 : vector<16x128xf32> to vector<1x16x128xf32>
    tpu.vector_store %arg4[%c15_361, %c0_362, %c0_363], %707 {strides = array<i32>} : memref<16x16x128xf32, #tpu.memory_space<vmem>>, vector<1x16x128xf32>,
    return
  }
  func.func @transform_0(%arg0: i32, %arg1: i32) -> (i32, i32, i32) {
    %c0_i32 = arith.constant 0 : i32
    %c0_i32_0 = arith.constant 0 : i32
    return %arg1, %c0_i32, %arg0 : i32, i32, i32
  }
  func.func @transform_1(%arg0: i32, %arg1: i32) -> (i32, i32, i32) {
    %c1_i32 = arith.constant 1 : i32
    %0 = arith.addi %arg1, %c1_i32 : i32
    %c4_i32 = arith.constant 4 : i32
    %1 = arith.muli %0, %c4_i32 : i32
    %c0_i32 = arith.constant 0 : i32
    %c0_i32_0 = arith.constant 0 : i32
    return %1, %c0_i32, %arg0 : i32, i32, i32
  }
  func.func @transform_2(%arg0: i32, %arg1: i32) -> (i32, i32, i32) {
    %c0_i32 = arith.constant 0 : i32
    %c0_i32_0 = arith.constant 0 : i32
    return %arg1, %c0_i32, %arg0 : i32, i32, i32
  }
}

</mosaic_0001>

<bundles_post_ra>
// kernel: tpu_custom_call.1
= control target key start
LH: loop header
LB: loop body
LE: loop exit
PB: predicated region body
PF: predicated region fallthrough
CT: control target
= control target key end

     0   :  { %7 = vsyncpa [#allocation3], 0  ;;  %s2149_s0 = inlined_call_operand.hbm [shape: f32[20,20,128], index: 0, kind: input, shape index: {}]   ;;  %s2150_s1 = inlined_call_operand.hbm [shape: f32[20,20,128], index: 1, kind: input, shape index: {}]   ;;  %s2151_s2 = inlined_call_operand.hbm [shape: f32[16,16,128], index: 2, kind: output, shape index: {}]  }
   0x1   :  { %8 = vsyncpa [#allocation6], 0 }
   0x2   :  { %9 = vsyncpa [#allocation4], 0  ;;  %s1727_s9 = smov [#allocation2]   ;;  %s1652_s13 = scalar_lea.hbm %s2149_s0, 6144 }
   0x3   :  { %s15_s10 = sshll.u32 %s1727_s9, 4  ;;  %p1653_p0 = scmp.ne.s32.totalorder %s2149_s0, %s1652_s13  ;;  %s16_s10 = int_to_ptr.vmem [resolvable:$true] %s15_s10 }
   0x4   :  { %s1654_s18 = scalar_lea.hbm %s2149_s0, 7680  ;;  %p1656_p2 = scmp.lt.u32.totalorder %s1652_s13, %s2149_s0 }
   0x5   :  { %p1655_p1 = scmp.lt.u32.totalorder %s1654_s18, %s1652_s13 }
   0x7   :  { %p1657_p3 = por %p1656_p2, %p1655_p1 }
   0x9   :  { %p1658_p4 = pnand %p1657_p3, %p1653_p0 }
   0xb   :  { %1661 = shalt.err (!%p1658_p4)
}
   0xc   :  { %s1662_s21 = scalar_lea.vmem %s16_s10, 6144  ;;  %p1667_p6 = scmp.lt.s32.totalorder %s16_s10, %s16_s10 }
   0xd   :  { %p1663_p5 = scmp.ne.s32.totalorder %s16_s10, %s1662_s21  ;;  %p1668_p7 = scmp.lt.s32.totalorder %s1662_s21, %s1662_s21 }
   0xf   :  { %p1669_p8 = por %p1668_p7, %p1667_p6 }
  0x11   :  { %p1670_p9 = pnand %p1669_p8, %p1663_p5 }
  0x13   :  { %1673 = shalt.err (!%p1670_p9)
}
  0x14   :  { %s1728_s22 = smov 128   ;;  %s1729_s23 = smov 8  }
  0x15   :  { %21 = dma.hbm_to_vmem [thread:$0]  %s2149_s0, 6144, %s16_s10, [#allocation3], %s1728_s22, %s1728_s22, %s1729_s23  }
  0x16   :  { %s1628_s28 = scalar_lea.hbm %s2150_s1, 6144  ;;  %s1730_s29 = smov [#allocation5]  }
  0x17   :  { %s33_s30 = sshll.u32 %s1730_s29, 4  ;;  %s1698_s5 = scalar_lea.hbm %s2150_s1, 7680  ;;  %s34_s30 = int_to_ptr.vmem [resolvable:$true] %s33_s30 }
  0x18   :  { %p1675_p10 = scmp.ne.s32.totalorder %s1628_s28, %s1698_s5  ;;  %p1677_p11 = scmp.lt.u32.totalorder %s1628_s28, %s2150_s1 }
  0x19   :  { %p1678_p12 = scmp.lt.u32.totalorder %s1698_s5, %s1698_s5  ;;  %p1680_p0 = scmp.lt.u32.totalorder %s1698_s5, %s1628_s28 }
  0x1b   :  { %p1679_p13 = por %p1678_p12, %p1677_p11 }
  0x1d   :  { %p1681_p1 = por %p1680_p0, %p1679_p13 }
  0x1f   :  { %p1682_p2 = pnand %p1681_p1, %p1675_p10 }
  0x21   :  { %1685 = shalt.err (!%p1682_p2)
}
  0x22   :  { %s1686_s0 = scalar_lea.vmem %s34_s30, 1536  ;;  %p1691_p4 = scmp.lt.s32.totalorder %s34_s30, %s34_s30 }
  0x23   :  { %p1687_p3 = scmp.ne.s32.totalorder %s34_s30, %s1686_s0  ;;  %p1692_p5 = scmp.lt.s32.totalorder %s1686_s0, %s1686_s0 }
  0x25   :  { %p1693_p6 = por %p1692_p5, %p1691_p4 }
  0x27   :  { %p1694_p7 = pnand %p1693_p6, %p1687_p3 }
  0x29   :  { %1697 = shalt.err (!%p1694_p7)
}
  0x2a   :  { %39 = dma.hbm_to_vmem [thread:$0]  %s1628_s28, 1536, %s34_s30, [#allocation6], %s1728_s22, %s1728_s22, %s1729_s23  }
  0x2b   :  { %1721 = dma.done.wait [#allocation3], 6144  }
  0x2c   :  { %1722 = vsyncadd [#allocation3], 4294961152 }
  0x2d   :  { %1723 = dma.done.wait [#allocation6], 1536  }
  0x2e   :  { %1724 = vsyncadd [#allocation6], 4294965760  ;;  %v51_v0 = vld [vmem:[#allocation2] sm:$0xff]  ;;  %v52_v1 = vld [vmem:[#allocation2 + $0x8] sm:$0xff]  ;;  %vm102_vm0 = vcmask 1043456   ;;  %vm114_vm1 = vcmask 1045504  }
  0x2f   :  { %v53_v2 = vld [vmem:[#allocation2 + $0x10] sm:$0xf]  ;;  %v1777_v3 = vld [vmem:[#allocation2 + $0x60] sm:$0xff]  ;;  %v1779_v4 = vld [vmem:[#allocation2 + $0x68] sm:$0xff]  ;;  %vm132_vm2 = vcmask 1046528   ;;  %s1731_s1 = smov [#allocation7]  }
  0x30   :  { %v59_v5 = vld [vmem:[#allocation2 + $0x70] sm:$0xf]  ;;  %v60_v6 = vadd.f32 %v1777_v3, %v51_v0  ;;  %v61_v7 = vadd.f32 %v1779_v4, %v52_v1  ;;  %v69_v9 = vld [vmem:[#allocation2 + $0x18] sm:$0xff]  ;;  %v70_v10 = vld [vmem:[#allocation2 + $0x20] sm:$0xff]  ;;  %v1784_v12 = vmul.f32 0.2920817, %v1777_v3 }
  0x31   :  { %v62_v8 = vadd.f32 %v59_v5, %v53_v2  ;;  %v71_v11 = vld [vmem:[#allocation2 + $0x28] sm:$0xf]  ;;  %v1788_v14 = vld [vmem:[#allocation2 + $0x50] sm:$0xff]  ;;  %v77_v15 = vld [vmem:[#allocation2 + $0x58] sm:$0xf]  ;;  %s1615_s8 = sshll.u32 %s1731_s1, 4  ;;  %s1616_s8 = int_to_ptr.vmem [resolvable:$true] %s1615_s8 }
  0x32   :  { %v1786_v13 = vld [vmem:[#allocation2 + $0x48] sm:$0xff]  ;;  %v1791_v16 = vmul.f32 0.2920817, %v1779_v4  ;;  %v63_v17 = vmul.f32 0.120078385, %v60_v6  ;;  %v79_v21 = vadd.f32 %v1788_v14, %v70_v10  ;;  %v80_v22 = vadd.f32 %v77_v15, %v71_v11  ;;  %v1795_v23 = vld [vmem:[#allocation2 + $0x30] sm:$0xff]  ;;  %p1704_p9 = scmp.lt.s32.totalorder %s1616_s8, %s1616_s8 }
  0x33   :  { %v64_v18 = vmul.f32 0.120078385, %v61_v7  ;;  %v65_v19 = vmul.f32 0.120078385, %v62_v8  ;;  %v78_v20 = vadd.f32 %v1786_v13, %v69_v9  ;;  %v1797_v24 = vld [vmem:[#allocation2 + $0x38] sm:$0xff]  ;;  %v182_v30 = vadd.f32 %v1795_v23, %v1777_v3  ;;  %v1810_v38 = vld [vmem:[#allocation2 + $0x80] sm:$0xff] }
  0x34   :  { %v92_v25 = vld [vmem:[#allocation2 + $0x40] sm:$0xf]  ;;  %v1800_v26 = vmul.f32 0.2920817, %v1786_v13  ;;  %v93_v28 = vmul.f32 0.2920817, %v1795_v23  ;;  %v183_v34 = vadd.f32 %v1797_v24, %v1779_v4  ;;  %v171_v44 = vadd.f32 %v1810_v38, %v70_v10 }
  0x35   :  { %v81_v27 = vmul.f32 0.23388076, %v78_v20  ;;  %v94_v29 = vmul.f32 0.2920817, %v1797_v24  ;;  %v82_v31 = vmul.f32 0.23388076, %v79_v21 }
  0x36   :  { %v83_v32 = vmul.f32 0.23388076, %v80_v22  ;;  %v95_v33 = vmul.f32 0.2920817, %v92_v25  ;;  %v163_v36 = vld [vmem:[#allocation2 + $0x28] sm:$0xf] }
  0x37   :  { %v84_v35 = vadd.f32 %v81_v27, %v63_v17  ;;  %v1808_v37 = vld [vmem:[#allocation2 + $0x78] sm:$0xff]  ;;  %v185_v39 = vmul.f32 0.23388076, %v182_v30  ;;  %v85_v40 = vadd.f32 %v82_v31, %v64_v18  ;;  %v169_v42 = vld [vmem:[#allocation2 + $0x88] sm:$0xf]  ;;  %v1819_v25 = vld [vmem:[#allocation2 + $0x90] sm:$0xff] }
  0x38   :  { %v86_v41 = vadd.f32 %v83_v32, %v65_v19  ;;  %v170_v43 = vadd.f32 %v1808_v37, %v69_v9  ;;  %v178_v45 = vld [vmem:[#allocation2 + $0x40] sm:$0xf]  ;;  %v181_v46 = vld [vmem:[#allocation2 + $0x70] sm:$0xf]  ;;  %v172_v48 = vadd.f32 %v169_v42, %v163_v36  ;;  %v186_v50 = vmul.f32 0.23388076, %v183_v34 }
  0x39   :  { %v96_v47 = vadd.f32 %v93_v28, %v84_v35  ;;  %v184_v49 = vadd.f32 %v181_v46, %v178_v45  ;;  %v97_v51 = vadd.f32 %v94_v29, %v85_v40  ;;  %v174_v54 = vmul.f32 0.120078385, %v171_v44  ;;  %v193_v17 = vld [vmem:[#allocation2 + $0x58] sm:$0xf]  ;;  %v261_v22 = vld [vmem:[#allocation2 + $0x40] sm:$0xf] }
  0x3a   :  { %v98_v52 = vadd.f32 %v95_v33, %v86_v41  ;;  %v173_v53 = vmul.f32 0.120078385, %v170_v43  ;;  %v175_v58 = vmul.f32 0.120078385, %v172_v48  ;;  %v1821_v27 = vld [vmem:[#allocation2 + $0x98] sm:$0xff]  ;;  %s1699_s9 = scalar_lea.vmem %s1616_s8, 4096 }
  0x3b   :  { %v103_v55 = vrot.slane %v96_v47, 4  ;;  %v115_v56 = vrot.slane %v96_v47, 2  ;;  %v142_v57 = vmul.f32 0.2920817, %v96_v47  ;;  %v104_v59 = vrot.slane %v97_v51, 4  ;;  %p1700_p8 = scmp.ne.s32.totalorder %s1616_s8, %s1699_s9  ;;  %p1705_p10 = scmp.lt.s32.totalorder %s1699_s9, %s1699_s9 }
  0x3c   :  { %v116_v60 = vrot.slane %v97_v51, 2  ;;  %v118_v61 = vrot.slane %v98_v52, 2  ;;  %v143_v62 = vmul.f32 0.2920817, %v97_v51  ;;  %v106_v0 = vrot.slane %v98_v52, 4 }
  0x3d   :  { %v148_v63 = vrot.slane %v142_v57, 2  ;;  %v144_v1 = vmul.f32 0.2920817, %v98_v52  ;;  %v187_v2 = vmul.f32 0.23388076, %v184_v49  ;;  %v105_v5 = vsel %vm102_vm0, %v103_v55, %v104_v59  ;;  %p1706_p11 = por %p1705_p10, %p1704_p9 }
  0x3e   :  { %v117_v6 = vsel %vm114_vm1, %v115_v56, %v116_v60  ;;  %v119_v7 = vsel %vm114_vm1, %v116_v60, %v118_v61  ;;  %v149_v8 = vrot.slane %v143_v62, 2  ;;  %v110_v9 = vadd.f32 %v105_v5, %v96_v47  ;;  %v267_v36 = vld [vmem:[#allocation2 + $0xa0] sm:$0xf] }
  0x3f   :  { %v123_v10 = vadd.f32 %v117_v6, %v96_v47  ;;  %v124_v11 = vadd.f32 %v119_v7, %v97_v51  ;;  %v107_v15 = vsel %vm102_vm0, %v104_v59, %v106_v0  ;;  %v125_v20 = vadd.f32 %v118_v61, %v98_v52  ;;  %p1707_p12 = pnand %p1706_p11, %p1700_p8 }
  0x40   :  { %v150_v18 = vsel %vm114_vm1, %v148_v63, %v149_v8  ;;  %v111_v19 = vadd.f32 %v107_v15, %v97_v51  ;;  %v151_v21 = vrot.slane %v144_v1, 2  ;;  %v112_v28 = vmul.f32 0.120078385, %v110_v9  ;;  %v291_v15 = vld [vmem:[#allocation2 + $0x70] sm:$0xf] }
  0x41   :  { %v126_v29 = vmul.f32 0.23388076, %v123_v10  ;;  %v127_v30 = vmul.f32 0.23388076, %v124_v11  ;;  %v188_v31 = vadd.f32 %v185_v39, %v173_v53  ;;  %v128_v33 = vmul.f32 0.23388076, %v125_v20 }
  0x42   :  { %v113_v32 = vmul.f32 0.120078385, %v111_v19  ;;  %v152_v34 = vsel %vm114_vm1, %v149_v8, %v151_v21  ;;  %v189_v35 = vadd.f32 %v186_v50, %v174_v54  ;;  %v190_v42 = vadd.f32 %v187_v2, %v175_v58  ;;  %v276_v10 = vld [vmem:[#allocation2 + $0x58] sm:$0xf]  ;;  %v279_v11 = vld [vmem:[#allocation2 + $0x88] sm:$0xf] }
  0x43   :  { %v133_v40 = vrot.slane %v126_v29, 1  ;;  %v134_v41 = vrot.slane %v127_v30, 1  ;;  %v195_v43 = vmul.f32 0.2920817, %v1788_v14  ;;  %v136_v44 = vrot.slane %v128_v33, 1  ;;  %v1836_v21 = vld [vmem:[#allocation2 + $0xa8] sm:$0xff] }
  0x44   :  { %v196_v45 = vmul.f32 0.2920817, %v193_v17  ;;  %v197_v46 = vadd.f32 %v1800_v26, %v188_v31  ;;  %v268_v47 = vadd.f32 %v1819_v25, %v1795_v23  ;;  %v269_v49 = vadd.f32 %v1821_v27, %v1797_v24 }
  0x45   :  { %v135_v39 = vsel %vm132_vm2, %v133_v40, %v134_v41  ;;  %v198_v48 = vadd.f32 %v195_v43, %v189_v35  ;;  %v270_v50 = vadd.f32 %v267_v36, %v261_v22  ;;  %v137_v52 = vsel %vm132_vm2, %v134_v41, %v136_v44 }
  0x46   :  { %v140_v51 = vadd.f32 %v135_v39, %v112_v28  ;;  %v199_v53 = vadd.f32 %v196_v45, %v190_v42  ;;  %v203_v54 = vrot.slane %v197_v46, 4  ;;  %v141_v55 = vadd.f32 %v137_v52, %v113_v32  ;;  %v1841_v42 = vld [vmem:[#allocation2 + $0xb0] sm:$0xff]  ;;  %v365_v39 = vld [vmem:[#allocation2 + $0xb8] sm:$0xf] }
  0x47   :  { %v204_v56 = vrot.slane %v198_v48, 4  ;;  %v214_v57 = vrot.slane %v197_v46, 2  ;;  %v215_v58 = vrot.slane %v198_v48, 2  ;;  %v240_v60 = vmul.f32 0.2920817, %v197_v46 }
  0x48   :  { %v155_v26 = vadd.f32 %v150_v18, %v140_v51  ;;  %v217_v59 = vrot.slane %v199_v53, 2  ;;  %v241_v23 = vmul.f32 0.2920817, %v198_v48  ;;  %v156_v61 = vadd.f32 %v152_v34, %v141_v55 }
  0x49   :  { %v205_v62 = vsel %vm102_vm0, %v203_v54, %v204_v56  ;;  %v216_v63 = vsel %vm114_vm1, %v214_v57, %v215_v58  ;;  %v206_v24 = vrot.slane %v199_v53, 4  ;;  %v246_v5 = vrot.slane %v240_v60, 2  ;;  %v377_v60 = vld [vmem:[#allocation2 + $0xa0] sm:$0xf] }
  0x4a   :  { %159 = vst [vmem:[#allocation7] sm:$0xff] %v155_v26  ;;  %v210_v0 = vadd.f32 %v205_v62, %v197_v46  ;;  %v218_v1 = vsel %vm114_vm1, %v215_v58, %v217_v59  ;;  %v222_v2 = vadd.f32 %v216_v63, %v197_v46  ;;  %160 = vst [vmem:[#allocation7 + $0x8] sm:$0xff] %v156_v61  ;;  %v247_v7 = vrot.slane %v241_v23, 2 }
  0x4b   :  { %v223_v6 = vadd.f32 %v218_v1, %v198_v48  ;;  %v207_v8 = vsel %vm102_vm0, %v204_v56, %v206_v24  ;;  %v224_v9 = vadd.f32 %v217_v59, %v199_v53  ;;  %v242_v20 = vmul.f32 0.2920817, %v199_v53  ;;  %v374_v59 = vld [vmem:[#allocation2 + $0x70] sm:$0xf] }
  0x4c   :  { %v212_v17 = vmul.f32 0.120078385, %v210_v0  ;;  %v225_v18 = vmul.f32 0.23388076, %v222_v2  ;;  %v211_v19 = vadd.f32 %v207_v8, %v198_v48  ;;  %v248_v28 = vsel %vm114_vm1, %v246_v5, %v247_v7 }
  0x4d   :  { %v226_v22 = vmul.f32 0.23388076, %v223_v6  ;;  %v227_v29 = vmul.f32 0.23388076, %v224_v9  ;;  %v271_v30 = vmul.f32 0.120078385, %v268_v47  ;;  %v280_v41 = vadd.f32 %v1808_v37, %v1786_v13 }
  0x4e   :  { %v231_v31 = vrot.slane %v225_v18, 1  ;;  %v213_v32 = vmul.f32 0.120078385, %v211_v19  ;;  %v249_v33 = vrot.slane %v242_v20, 2  ;;  %v272_v34 = vmul.f32 0.120078385, %v269_v49 }
  0x4f   :  { %v232_v35 = vrot.slane %v226_v22, 1  ;;  %v234_v36 = vrot.slane %v227_v29, 1  ;;  %v273_v40 = vmul.f32 0.120078385, %v270_v50  ;;  %v281_v44 = vadd.f32 %v1810_v38, %v1788_v14  ;;  %v359_v47 = vld [vmem:[#allocation2 + $0x58] sm:$0xf] }
  0x50   :  { %v250_v43 = vsel %vm114_vm1, %v247_v7, %v249_v33  ;;  %v282_v45 = vadd.f32 %v279_v11, %v276_v10  ;;  %v294_v46 = vmul.f32 0.2920817, %v291_v15  ;;  %v283_v51 = vmul.f32 0.23388076, %v280_v41 }
  0x51   :  { %v233_v48 = vsel %vm132_vm2, %v231_v31, %v232_v35  ;;  %v235_v49 = vsel %vm132_vm2, %v232_v35, %v234_v36  ;;  %v366_v50 = vadd.f32 %v1836_v21, %v1786_v13  ;;  %v284_v54 = vmul.f32 0.23388076, %v281_v44  ;;  %v1863_v44 = vld [vmem:[#allocation2 + $0xc0] sm:$0xff] }
  0x52   :  { %v238_v52 = vadd.f32 %v233_v48, %v212_v17  ;;  %v239_v53 = vadd.f32 %v235_v49, %v213_v32  ;;  %v285_v55 = vmul.f32 0.23388076, %v282_v45  ;;  %v286_v56 = vadd.f32 %v283_v51, %v271_v30  ;;  %v1865_v45 = vld [vmem:[#allocation2 + $0xc8] sm:$0xff] }
  0x53   :  { %v367_v57 = vadd.f32 %v1841_v42, %v1788_v14  ;;  %v368_v58 = vadd.f32 %v365_v39, %v359_v47  ;;  %v369_v26 = vmul.f32 0.120078385, %v366_v50  ;;  %v287_v62 = vadd.f32 %v284_v54, %v272_v34 }
  0x54   :  { %v253_v23 = vadd.f32 %v248_v28, %v238_v52  ;;  %v254_v61 = vadd.f32 %v250_v43, %v239_v53  ;;  %v288_v63 = vadd.f32 %v285_v55, %v273_v40  ;;  %v295_v24 = vadd.f32 %v1784_v12, %v286_v56  ;;  %v389_v43 = vld [vmem:[#allocation2 + $0x88] sm:$0xf] }
  0x55   :  { %v370_v0 = vmul.f32 0.120078385, %v367_v57  ;;  %v371_v13 = vmul.f32 0.120078385, %v368_v58  ;;  %v378_v1 = vadd.f32 %v1819_v25, %v1777_v3  ;;  %v296_v2 = vadd.f32 %v1791_v16, %v287_v62 }
  0x56   :  { %257 = vst [vmem:[#allocation7 + $0x10] sm:$0xff] %v253_v23  ;;  %258 = vst [vmem:[#allocation7 + $0x18] sm:$0xff] %v254_v61  ;;  %v297_v14 = vadd.f32 %v294_v46, %v288_v63  ;;  %v379_v5 = vadd.f32 %v1821_v27, %v1779_v4  ;;  %v380_v6 = vadd.f32 %v377_v60, %v374_v59  ;;  %v301_v7 = vrot.slane %v295_v24, 4 }
  0x57   :  { %v312_v8 = vrot.slane %v295_v24, 2  ;;  %v338_v9 = vmul.f32 0.2920817, %v295_v24  ;;  %v381_v10 = vmul.f32 0.23388076, %v378_v1  ;;  %v302_v11 = vrot.slane %v296_v2, 4 }
  0x58   :  { %v313_v12 = vrot.slane %v296_v2, 2  ;;  %v315_v15 = vrot.slane %v297_v14, 2  ;;  %v339_v17 = vmul.f32 0.2920817, %v296_v2  ;;  %v304_v19 = vrot.slane %v297_v14, 4 }
  0x59   :  { %v344_v18 = vrot.slane %v338_v9, 2  ;;  %v340_v20 = vmul.f32 0.2920817, %v297_v14  ;;  %v382_v22 = vmul.f32 0.23388076, %v379_v5  ;;  %v303_v28 = vsel %vm102_vm0, %v301_v7, %v302_v11 }
  0x5a   :  { %v314_v16 = vsel %vm114_vm1, %v312_v8, %v313_v12  ;;  %v316_v29 = vsel %vm114_vm1, %v313_v12, %v315_v15  ;;  %v345_v30 = vrot.slane %v339_v17, 2  ;;  %v308_v31 = vadd.f32 %v303_v28, %v295_v24  ;;  %v463_v17 = vld [vmem:[#allocation2 + $0xd0] sm:$0xf] }
  0x5b   :  { %v320_v32 = vadd.f32 %v314_v16, %v295_v24  ;;  %v321_v33 = vadd.f32 %v316_v29, %v296_v2  ;;  %v305_v34 = vsel %vm102_vm0, %v302_v11, %v304_v19  ;;  %v322_v40 = vadd.f32 %v315_v15, %v297_v14 }
  0x5c   :  { %v346_v35 = vsel %vm114_vm1, %v344_v18, %v345_v30  ;;  %v309_v36 = vadd.f32 %v305_v34, %v296_v2  ;;  %v347_v41 = vrot.slane %v340_v20, 2  ;;  %v310_v46 = vmul.f32 0.120078385, %v308_v31  ;;  %v472_v34 = vld [vmem:[#allocation2 + $0x88] sm:$0xf] }
  0x5d   :  { %v323_v47 = vmul.f32 0.23388076, %v320_v32  ;;  %v324_v39 = vmul.f32 0.23388076, %v321_v33  ;;  %v384_v48 = vadd.f32 %v381_v10, %v369_v26  ;;  %v325_v51 = vmul.f32 0.23388076, %v322_v40 }
  0x5e   :  { %v311_v49 = vmul.f32 0.120078385, %v309_v36  ;;  %v348_v50 = vsel %vm114_vm1, %v345_v30, %v347_v41  ;;  %v383_v52 = vmul.f32 0.23388076, %v380_v6  ;;  %v385_v55 = vadd.f32 %v382_v22, %v370_v0  ;;  %v457_v10 = vld [vmem:[#allocation2 + $0x70] sm:$0xf] }
  0x5f   :  { %v329_v53 = vrot.slane %v323_v47, 1  ;;  %v330_v54 = vrot.slane %v324_v39, 1  ;;  %v390_v56 = vmul.f32 0.2920817, %v1808_v37  ;;  %v332_v57 = vrot.slane %v325_v51, 1 }
  0x60   :  { %v386_v58 = vadd.f32 %v383_v52, %v371_v13  ;;  %v391_v59 = vmul.f32 0.2920817, %v1810_v38  ;;  %v392_v60 = vmul.f32 0.2920817, %v389_v43  ;;  %v464_v26 = vadd.f32 %v1863_v44, %v1777_v3 }
  0x61   :  { %v331_v23 = vsel %vm132_vm2, %v329_v53, %v330_v54  ;;  %v393_v61 = vadd.f32 %v390_v56, %v384_v48  ;;  %v465_v62 = vadd.f32 %v1865_v45, %v1779_v4  ;;  %v333_v24 = vsel %vm132_vm2, %v330_v54, %v332_v57  ;;  %v475_v48 = vld [vmem:[#allocation2 + $0xb8] sm:$0xf]  ;;  %v487_v57 = vld [vmem:[#allocation2 + $0xa0] sm:$0xf] }
  0x62   :  { %v336_v63 = vadd.f32 %v331_v23, %v310_v46  ;;  %v394_v0 = vadd.f32 %v391_v59, %v385_v55  ;;  %v395_v1 = vadd.f32 %v392_v60, %v386_v58  ;;  %v337_v2 = vadd.f32 %v333_v24, %v311_v49  ;;  %v1886_v58 = vld [vmem:[#allocation2 + $0xd8] sm:$0xff] }
  0x63   :  { %v399_v14 = vrot.slane %v393_v61, 4  ;;  %v410_v13 = vrot.slane %v393_v61, 2  ;;  %v436_v5 = vmul.f32 0.2920817, %v393_v61  ;;  %v466_v33 = vadd.f32 %v463_v17, %v457_v10 }
  0x64   :  { %v351_v6 = vadd.f32 %v346_v35, %v336_v63  ;;  %v400_v7 = vrot.slane %v394_v0, 4  ;;  %v411_v8 = vrot.slane %v394_v0, 2  ;;  %v413_v9 = vrot.slane %v395_v1, 2 }
  0x65   :  { %v352_v11 = vadd.f32 %v348_v50, %v337_v2  ;;  %v437_v12 = vmul.f32 0.2920817, %v394_v0  ;;  %v442_v3 = vrot.slane %v436_v5, 2  ;;  %v402_v15 = vrot.slane %v395_v1, 4  ;;  %v561_v2 = vld [vmem:[#allocation2 + $0xe8] sm:$0xf] }
  0x66   :  { %355 = vst [vmem:[#allocation7 + $0x20] sm:$0xff] %v351_v6  ;;  %v401_v4 = vsel %vm102_vm0, %v399_v14, %v400_v7  ;;  %v412_v18 = vsel %vm114_vm1, %v410_v13, %v411_v8  ;;  %v414_v19 = vsel %vm114_vm1, %v411_v8, %v413_v9  ;;  %v420_v20 = vadd.f32 %v413_v9, %v395_v1 }
  0x67   :  { %356 = vst [vmem:[#allocation7 + $0x28] sm:$0xff] %v352_v11  ;;  %v406_v22 = vadd.f32 %v401_v4, %v393_v61  ;;  %v418_v28 = vadd.f32 %v412_v18, %v393_v61  ;;  %v419_v16 = vadd.f32 %v414_v19, %v394_v0  ;;  %v443_v29 = vrot.slane %v437_v12, 2  ;;  %v570_v11 = vld [vmem:[#allocation2 + $0xa0] sm:$0xf]  ;;  %v573_v12 = vld [vmem:[#allocation2 + $0xd0] sm:$0xf] }
  0x68   :  { %v403_v30 = vsel %vm102_vm0, %v400_v7, %v402_v15  ;;  %v423_v31 = vmul.f32 0.23388076, %v420_v20  ;;  %v438_v32 = vmul.f32 0.2920817, %v395_v1  ;;  %v467_v39 = vmul.f32 0.120078385, %v464_v26 }
  0x69   :  { %v408_v35 = vmul.f32 0.120078385, %v406_v22  ;;  %v421_v36 = vmul.f32 0.23388076, %v418_v28  ;;  %v422_v40 = vmul.f32 0.23388076, %v419_v16  ;;  %v444_v41 = vsel %vm114_vm1, %v442_v3, %v443_v29 }
  0x6a   :  { %v407_v43 = vadd.f32 %v403_v30, %v394_v0  ;;  %v430_v46 = vrot.slane %v423_v31, 1  ;;  %v445_v47 = vrot.slane %v438_v32, 2  ;;  %v468_v50 = vmul.f32 0.120078385, %v465_v62  ;;  %v555_v26 = vld [vmem:[#allocation2 + $0x88] sm:$0xf] }
  0x6b   :  { %v427_v49 = vrot.slane %v421_v36, 1  ;;  %v428_v51 = vrot.slane %v422_v40, 1  ;;  %v469_v52 = vmul.f32 0.120078385, %v466_v33  ;;  %v476_v55 = vadd.f32 %v1836_v21, %v1808_v37  ;;  %v1891_v62 = vld [vmem:[#allocation2 + $0xe0] sm:$0xff] }
  0x6c   :  { %v409_v53 = vmul.f32 0.120078385, %v407_v43  ;;  %v446_v54 = vsel %vm114_vm1, %v443_v29, %v445_v47  ;;  %v477_v56 = vadd.f32 %v1841_v42, %v1810_v38  ;;  %v478_v23 = vadd.f32 %v475_v48, %v472_v34 }
  0x6d   :  { %v429_v59 = vsel %vm132_vm2, %v427_v49, %v428_v51  ;;  %v431_v60 = vsel %vm132_vm2, %v428_v51, %v430_v46  ;;  %v488_v61 = vmul.f32 0.2920817, %v1819_v25  ;;  %v479_v0 = vmul.f32 0.23388076, %v476_v55 }
  0x6e   :  { %v434_v63 = vadd.f32 %v429_v59, %v408_v35  ;;  %v435_v24 = vadd.f32 %v431_v60, %v409_v53  ;;  %v480_v1 = vmul.f32 0.23388076, %v477_v56  ;;  %v481_v14 = vmul.f32 0.23388076, %v478_v23  ;;  %v1906_v60 = vld [vmem:[#allocation2 + $0xf0] sm:$0xff] }
  0x6f   :  { %v489_v13 = vmul.f32 0.2920817, %v1821_v27  ;;  %v490_v5 = vmul.f32 0.2920817, %v487_v57  ;;  %v562_v6 = vadd.f32 %v1886_v58, %v1808_v37  ;;  %v482_v9 = vadd.f32 %v479_v0, %v467_v39 }
  0x70   :  { %v449_v7 = vadd.f32 %v444_v41, %v434_v63  ;;  %v450_v8 = vadd.f32 %v446_v54, %v435_v24  ;;  %v483_v10 = vadd.f32 %v480_v1, %v468_v50  ;;  %v484_v3 = vadd.f32 %v481_v14, %v469_v52  ;;  %v585_v54 = vld [vmem:[#allocation2 + $0xb8] sm:$0xf] }
  0x71   :  { %v563_v15 = vadd.f32 %v1891_v62, %v1810_v38  ;;  %v564_v17 = vadd.f32 %v561_v2, %v555_v26  ;;  %v565_v4 = vmul.f32 0.120078385, %v562_v6  ;;  %v491_v18 = vadd.f32 %v488_v61, %v482_v9  ;;  %v1910_v14 = vld [vmem:[#allocation2 + $0xf8] sm:$0xff]  ;;  %v659_v9 = vld [vmem:[#allocation2 + $0x100] sm:$0xf] }
  0x72   :  { %453 = vst [vmem:[#allocation7 + $0x30] sm:$0xff] %v449_v7  ;;  %454 = vst [vmem:[#allocation7 + $0x38] sm:$0xff] %v450_v8  ;;  %v492_v19 = vadd.f32 %v489_v13, %v483_v10  ;;  %v574_v20 = vadd.f32 %v1863_v44, %v1819_v25  ;;  %v575_v37 = vadd.f32 %v1865_v45, %v1821_v27  ;;  %v653_v8 = vld [vmem:[#allocation2 + $0xa0] sm:$0xf] }
  0x73   :  { %v493_v22 = vadd.f32 %v490_v5, %v484_v3  ;;  %v566_v28 = vmul.f32 0.120078385, %v563_v15  ;;  %v567_v16 = vmul.f32 0.120078385, %v564_v17  ;;  %v576_v29 = vadd.f32 %v573_v12, %v570_v11 }
  0x74   :  { %v497_v30 = vrot.slane %v491_v18, 4  ;;  %v498_v31 = vrot.slane %v492_v19, 4  ;;  %v508_v32 = vrot.slane %v491_v18, 2  ;;  %v509_v38 = vrot.slane %v492_v19, 2 }
  0x75   :  { %v511_v33 = vrot.slane %v493_v22, 2  ;;  %v534_v34 = vmul.f32 0.2920817, %v491_v18  ;;  %v535_v35 = vmul.f32 0.2920817, %v492_v19  ;;  %v500_v36 = vrot.slane %v493_v22, 4 }
  0x76   :  { %v499_v40 = vsel %vm102_vm0, %v497_v30, %v498_v31  ;;  %v510_v41 = vsel %vm114_vm1, %v508_v32, %v509_v38  ;;  %v536_v43 = vmul.f32 0.2920817, %v493_v22  ;;  %v577_v46 = vmul.f32 0.23388076, %v574_v20 }
  0x77   :  { %v504_v47 = vadd.f32 %v499_v40, %v491_v18  ;;  %v512_v39 = vsel %vm114_vm1, %v509_v38, %v511_v33  ;;  %v516_v48 = vadd.f32 %v510_v41, %v491_v18  ;;  %v540_v49 = vrot.slane %v534_v34, 2 }
  0x78   :  { %v517_v51 = vadd.f32 %v512_v39, %v492_v19  ;;  %v541_v50 = vrot.slane %v535_v35, 2  ;;  %v501_v52 = vsel %vm102_vm0, %v498_v31, %v500_v36  ;;  %v518_v53 = vadd.f32 %v511_v33, %v493_v22 }
  0x79   :  { %v506_v55 = vmul.f32 0.120078385, %v504_v47  ;;  %v519_v56 = vmul.f32 0.23388076, %v516_v48  ;;  %v505_v57 = vadd.f32 %v501_v52, %v492_v19  ;;  %v543_v59 = vrot.slane %v536_v43, 2 }
  0x7a   :  { %v520_v23 = vmul.f32 0.23388076, %v517_v51  ;;  %v542_v61 = vsel %vm114_vm1, %v540_v49, %v541_v50  ;;  %v521_v26 = vmul.f32 0.23388076, %v518_v53  ;;  %v578_v63 = vmul.f32 0.23388076, %v575_v37 }
  0x7b   :  { %v525_v24 = vrot.slane %v519_v56, 1  ;;  %v507_v0 = vmul.f32 0.120078385, %v505_v57  ;;  %v544_v1 = vsel %vm114_vm1, %v541_v50, %v543_v59  ;;  %v579_v2 = vmul.f32 0.23388076, %v576_v29 }
  0x7c   :  { %v526_v13 = vrot.slane %v520_v23, 1  ;;  %v528_v5 = vrot.slane %v521_v26, 1  ;;  %v580_v6 = vadd.f32 %v577_v46, %v565_v4  ;;  %v581_v7 = vadd.f32 %v578_v63, %v566_v28  ;;  %v668_v53 = vld [vmem:[#allocation2 + $0xb8] sm:$0xf]  ;;  %v671_v59 = vld [vmem:[#allocation2 + $0xe8] sm:$0xf] }
  0x7d   :  { %v582_v10 = vadd.f32 %v579_v2, %v567_v16  ;;  %v586_v11 = vmul.f32 0.2920817, %v1836_v21  ;;  %v587_v12 = vmul.f32 0.2920817, %v1841_v42  ;;  %v588_v3 = vmul.f32 0.2920817, %v585_v54 }
  0x7e   :  { %v527_v15 = vsel %vm132_vm2, %v525_v24, %v526_v13  ;;  %v529_v17 = vsel %vm132_vm2, %v526_v13, %v528_v5  ;;  %v660_v18 = vadd.f32 %v1906_v60, %v1819_v25  ;;  %v661_v19 = vadd.f32 %v1910_v14, %v1821_v27  ;;  %v1924_v23 = vld [vmem:[#allocation2 + $0x108] sm:$0xff]  ;;  %v683_v5 = vld [vmem:[#allocation2 + $0xd0] sm:$0xf] }
  0x7f   :  { %v532_v4 = vadd.f32 %v527_v15, %v506_v55  ;;  %v533_v20 = vadd.f32 %v529_v17, %v507_v0  ;;  %v589_v37 = vadd.f32 %v586_v11, %v580_v6  ;;  %v590_v22 = vadd.f32 %v587_v12, %v581_v7  ;;  %v757_v11 = vld [vmem:[#allocation2 + $0x118] sm:$0xf]  ;;  %v1933_v17 = vld [vmem:[#allocation2 + $0x110] sm:$0xff] }
  0x80   :  { %v591_v28 = vadd.f32 %v588_v3, %v582_v10  ;;  %v662_v16 = vadd.f32 %v659_v9, %v653_v8  ;;  %v663_v29 = vmul.f32 0.120078385, %v660_v18  ;;  %v664_v30 = vmul.f32 0.120078385, %v661_v19  ;;  %v751_v10 = vld [vmem:[#allocation2 + $0xb8] sm:$0xf] }
  0x81   :  { %v547_v31 = vadd.f32 %v542_v61, %v532_v4  ;;  %v548_v32 = vadd.f32 %v544_v1, %v533_v20  ;;  %v595_v38 = vrot.slane %v589_v37, 4  ;;  %v596_v33 = vrot.slane %v590_v22, 4 }
  0x82   :  { %v606_v34 = vrot.slane %v589_v37, 2  ;;  %v607_v35 = vrot.slane %v590_v22, 2  ;;  %v609_v36 = vrot.slane %v591_v28, 2  ;;  %v632_v40 = vmul.f32 0.2920817, %v589_v37 }
  0x83   :  { %551 = vst [vmem:[#allocation7 + $0x40] sm:$0xff] %v547_v31  ;;  %552 = vst [vmem:[#allocation7 + $0x48] sm:$0xff] %v548_v32  ;;  %v597_v25 = vsel %vm102_vm0, %v595_v38, %v596_v33  ;;  %v633_v27 = vmul.f32 0.2920817, %v590_v22  ;;  %v598_v41 = vrot.slane %v591_v28, 4  ;;  %v672_v13 = vadd.f32 %v1886_v58, %v1836_v21 }
  0x84   :  { %v634_v43 = vmul.f32 0.2920817, %v591_v28  ;;  %v602_v46 = vadd.f32 %v597_v25, %v589_v37  ;;  %v608_v47 = vsel %vm114_vm1, %v606_v34, %v607_v35  ;;  %v610_v39 = vsel %vm114_vm1, %v607_v35, %v609_v36 }
  0x85   :  { %v638_v48 = vrot.slane %v632_v40, 2  ;;  %v614_v49 = vadd.f32 %v608_v47, %v589_v37  ;;  %v615_v51 = vadd.f32 %v610_v39, %v590_v22  ;;  %v639_v50 = vrot.slane %v633_v27, 2 }
  0x86   :  { %v599_v52 = vsel %vm102_vm0, %v596_v33, %v598_v41  ;;  %v604_v54 = vmul.f32 0.120078385, %v602_v46  ;;  %v616_v56 = vadd.f32 %v609_v36, %v591_v28  ;;  %v641_v57 = vrot.slane %v634_v43, 2 }
  0x87   :  { %v603_v55 = vadd.f32 %v599_v52, %v590_v22  ;;  %v617_v61 = vmul.f32 0.23388076, %v614_v49  ;;  %v618_v26 = vmul.f32 0.23388076, %v615_v51  ;;  %v640_v63 = vsel %vm114_vm1, %v638_v48, %v639_v50 }
  0x88   :  { %v665_v24 = vmul.f32 0.120078385, %v662_v16  ;;  %v619_v1 = vmul.f32 0.23388076, %v616_v56  ;;  %v642_v2 = vsel %vm114_vm1, %v639_v50, %v641_v57  ;;  %v673_v8 = vadd.f32 %v1891_v62, %v1841_v42 }
  0x89   :  { %v605_v0 = vmul.f32 0.120078385, %v603_v55  ;;  %v623_v6 = vrot.slane %v617_v61, 1  ;;  %v624_v7 = vrot.slane %v618_v26, 1  ;;  %v674_v9 = vadd.f32 %v671_v59, %v668_v53 }
  0x8a   :  { %v626_v12 = vrot.slane %v619_v1, 1  ;;  %v675_v3 = vmul.f32 0.23388076, %v672_v13  ;;  %v684_v15 = vmul.f32 0.2920817, %v1863_v44  ;;  %v758_v18 = vadd.f32 %v1924_v23, %v1836_v21 }
  0x8b   :  { %v625_v19 = vsel %vm132_vm2, %v623_v6, %v624_v7  ;;  %v676_v4 = vmul.f32 0.23388076, %v673_v8  ;;  %v677_v20 = vmul.f32 0.23388076, %v674_v9  ;;  %v685_v37 = vmul.f32 0.2920817, %v1865_v45 }
  0x8c   :  { %v630_v22 = vadd.f32 %v625_v19, %v604_v54  ;;  %v627_v28 = vsel %vm132_vm2, %v624_v7, %v626_v12  ;;  %v678_v16 = vadd.f32 %v675_v3, %v663_v29  ;;  %v686_v31 = vmul.f32 0.2920817, %v683_v5  ;;  %v1949_v6 = vld [vmem:[#allocation2 + $0x120] sm:$0xff] }
  0x8d   :  { %v631_v32 = vadd.f32 %v627_v28, %v605_v0  ;;  %v679_v38 = vadd.f32 %v676_v4, %v664_v30  ;;  %v680_v33 = vadd.f32 %v677_v20, %v665_v24  ;;  %v759_v34 = vadd.f32 %v1933_v17, %v1841_v42  ;;  %v766_v24 = vld [vmem:[#allocation2 + $0xd0] sm:$0xf]  ;;  %v769_v0 = vld [vmem:[#allocation2 + $0x100] sm:$0xf] }
  0x8e   :  { %v645_v35 = vadd.f32 %v640_v63, %v630_v22  ;;  %v687_v36 = vadd.f32 %v684_v15, %v678_v16  ;;  %v760_v21 = vadd.f32 %v757_v11, %v751_v10  ;;  %v761_v40 = vmul.f32 0.120078385, %v758_v18  ;;  %v781_v18 = vld [vmem:[#allocation2 + $0xe8] sm:$0xf] }
  0x8f   :  { %v646_v25 = vadd.f32 %v642_v2, %v631_v32  ;;  %v688_v27 = vadd.f32 %v685_v37, %v679_v38  ;;  %v689_v41 = vadd.f32 %v686_v31, %v680_v33  ;;  %v762_v43 = vmul.f32 0.120078385, %v759_v34  ;;  %v1955_v31 = vld [vmem:[#allocation2 + $0x128] sm:$0xff] }
  0x90   :  { %649 = vst [vmem:[#allocation7 + $0x50] sm:$0xff] %v645_v35  ;;  %v693_v46 = vrot.slane %v687_v36, 4  ;;  %v704_v47 = vrot.slane %v687_v36, 2  ;;  %v730_v39 = vmul.f32 0.2920817, %v687_v36  ;;  %v770_v53 = vadd.f32 %v1906_v60, %v1863_v44 }
  0x91   :  { %v763_v29 = vmul.f32 0.120078385, %v760_v21  ;;  %650 = vst [vmem:[#allocation7 + $0x58] sm:$0xff] %v646_v25  ;;  %v694_v48 = vrot.slane %v688_v27, 4  ;;  %v705_v30 = vrot.slane %v688_v27, 2  ;;  %v707_v49 = vrot.slane %v689_v41, 2 }
  0x92   :  { %v731_v51 = vmul.f32 0.2920817, %v688_v27  ;;  %v736_v50 = vrot.slane %v730_v39, 2  ;;  %v696_v42 = vrot.slane %v689_v41, 4  ;;  %v732_v52 = vmul.f32 0.2920817, %v689_v41 }
  0x93   :  { %v695_v54 = vsel %vm102_vm0, %v693_v46, %v694_v48  ;;  %v706_v55 = vsel %vm114_vm1, %v704_v47, %v705_v30  ;;  %v708_v56 = vsel %vm114_vm1, %v705_v30, %v707_v49  ;;  %v714_v13 = vadd.f32 %v707_v49, %v689_v41  ;;  %v854_v21 = vld [vmem:[#allocation2 + $0x130] sm:$0xf] }
  0x94   :  { %v737_v57 = vrot.slane %v731_v51, 2  ;;  %v700_v59 = vadd.f32 %v695_v54, %v687_v36  ;;  %v712_v61 = vadd.f32 %v706_v55, %v687_v36  ;;  %v713_v26 = vadd.f32 %v708_v56, %v688_v27  ;;  %v850_v36 = vld [vmem:[#allocation2 + $0xd0] sm:$0xf] }
  0x95   :  { %v697_v63 = vsel %vm102_vm0, %v694_v48, %v696_v42  ;;  %v739_v5 = vrot.slane %v732_v52, 2  ;;  %v771_v10 = vadd.f32 %v1910_v14, %v1865_v45  ;;  %v717_v12 = vmul.f32 0.23388076, %v714_v13 }
  0x96   :  { %v738_v1 = vsel %vm114_vm1, %v736_v50, %v737_v57  ;;  %v701_v2 = vadd.f32 %v697_v63, %v688_v27  ;;  %v702_v7 = vmul.f32 0.120078385, %v700_v59  ;;  %v715_v8 = vmul.f32 0.23388076, %v712_v61 }
  0x97   :  { %v716_v9 = vmul.f32 0.23388076, %v713_v26  ;;  %v740_v3 = vsel %vm114_vm1, %v737_v57, %v739_v5  ;;  %v772_v15 = vadd.f32 %v769_v0, %v766_v24  ;;  %v773_v20 = vmul.f32 0.23388076, %v770_v53  ;;  %v864_v5 = vld [vmem:[#allocation2 + $0xe8] sm:$0xf] }
  0x98   :  { %v703_v11 = vmul.f32 0.120078385, %v701_v2  ;;  %v721_v19 = vrot.slane %v715_v8, 1  ;;  %v774_v37 = vmul.f32 0.23388076, %v771_v10  ;;  %v724_v22 = vrot.slane %v717_v12, 1 }
  0x99   :  { %v722_v4 = vrot.slane %v716_v9, 1  ;;  %v775_v28 = vmul.f32 0.23388076, %v772_v15  ;;  %v782_v16 = vmul.f32 0.2920817, %v1886_v58  ;;  %v855_v32 = vadd.f32 %v1949_v6, %v1863_v44  ;;  %v1968_v12 = vld [vmem:[#allocation2 + $0x138] sm:$0xff] }
  0x9a   :  { %v776_v33 = vadd.f32 %v773_v20, %v761_v40  ;;  %v777_v34 = vadd.f32 %v774_v37, %v762_v43  ;;  %v783_v35 = vmul.f32 0.2920817, %v1891_v62  ;;  %v784_v46 = vmul.f32 0.2920817, %v781_v18 }
  0x9b   :  { %v723_v38 = vsel %vm132_vm2, %v721_v19, %v722_v4  ;;  %v725_v27 = vsel %vm132_vm2, %v722_v4, %v724_v22  ;;  %v778_v41 = vadd.f32 %v775_v28, %v763_v29  ;;  %v856_v30 = vadd.f32 %v1955_v31, %v1865_v45  ;;  %v881_v28 = vld [vmem:[#allocation2 + $0x100] sm:$0xf] }
  0x9c   :  { %v728_v25 = vadd.f32 %v723_v38, %v702_v7  ;;  %v729_v47 = vadd.f32 %v725_v27, %v703_v11  ;;  %v785_v39 = vadd.f32 %v782_v16, %v776_v33  ;;  %v786_v48 = vadd.f32 %v783_v35, %v777_v34  ;;  %v868_v11 = vld [vmem:[#allocation2 + $0x118] sm:$0xf]  ;;  %v948_v34 = vld [vmem:[#allocation2 + $0xe8] sm:$0xf]  ;;  %v1977_v27 = vld [vmem:[#allocation2 + $0x140] sm:$0xff] }
  0x9d   :  { %v787_v49 = vadd.f32 %v784_v46, %v778_v41  ;;  %v857_v51 = vadd.f32 %v854_v21, %v850_v36  ;;  %v858_v40 = vmul.f32 0.120078385, %v855_v32  ;;  %v859_v61 = vmul.f32 0.120078385, %v856_v30  ;;  %v952_v35 = vld [vmem:[#allocation2 + $0x148] sm:$0xf] }
  0x9e   :  { %v743_v44 = vadd.f32 %v738_v1, %v728_v25  ;;  %v744_v43 = vadd.f32 %v740_v3, %v729_v47  ;;  %v791_v50 = vrot.slane %v785_v39, 4  ;;  %v792_v42 = vrot.slane %v786_v48, 4 }
  0x9f   :  { %v802_v52 = vrot.slane %v785_v39, 2  ;;  %v803_v53 = vrot.slane %v786_v48, 2  ;;  %v805_v54 = vrot.slane %v787_v49, 2  ;;  %v828_v55 = vmul.f32 0.2920817, %v785_v39 }
  0xa0   :  { %747 = vst [vmem:[#allocation7 + $0x60] sm:$0xff] %v743_v44  ;;  %v829_v29 = vmul.f32 0.2920817, %v786_v48  ;;  %748 = vst [vmem:[#allocation7 + $0x68] sm:$0xff] %v744_v43  ;;  %v793_v56 = vsel %vm102_vm0, %v791_v50, %v792_v42  ;;  %v794_v57 = vrot.slane %v787_v49, 4  ;;  %v869_v22 = vadd.f32 %v1924_v23, %v1886_v58 }
  0xa1   :  { %v830_v59 = vmul.f32 0.2920817, %v787_v49  ;;  %v798_v45 = vadd.f32 %v793_v56, %v785_v39  ;;  %v804_v26 = vsel %vm114_vm1, %v802_v52, %v803_v53  ;;  %v806_v63 = vsel %vm114_vm1, %v803_v53, %v805_v54 }
  0xa2   :  { %v834_v24 = vrot.slane %v828_v55, 2  ;;  %v810_v0 = vadd.f32 %v804_v26, %v785_v39  ;;  %v811_v1 = vadd.f32 %v806_v63, %v786_v48  ;;  %v835_v2 = vrot.slane %v829_v29, 2 }
  0xa3   :  { %v795_v13 = vsel %vm102_vm0, %v792_v42, %v794_v57  ;;  %v800_v7 = vmul.f32 0.120078385, %v798_v45  ;;  %v812_v9 = vadd.f32 %v805_v54, %v787_v49  ;;  %v837_v10 = vrot.slane %v830_v59, 2 }
  0xa4   :  { %v799_v8 = vadd.f32 %v795_v13, %v786_v48  ;;  %v813_v3 = vmul.f32 0.23388076, %v810_v0  ;;  %v814_v15 = vmul.f32 0.23388076, %v811_v1  ;;  %v836_v18 = vsel %vm114_vm1, %v834_v24, %v835_v2 }
  0xa5   :  { %v860_v19 = vmul.f32 0.120078385, %v857_v51  ;;  %v815_v20 = vmul.f32 0.23388076, %v812_v9  ;;  %v838_v37 = vsel %vm114_vm1, %v835_v2, %v837_v10  ;;  %v870_v38 = vadd.f32 %v1933_v17, %v1891_v62 }
  0xa6   :  { %v801_v4 = vmul.f32 0.120078385, %v799_v8  ;;  %v819_v16 = vrot.slane %v813_v3, 1  ;;  %v820_v32 = vrot.slane %v814_v15, 1  ;;  %v871_v33 = vadd.f32 %v868_v11, %v864_v5 }
  0xa7   :  { %v822_v36 = vrot.slane %v815_v20, 1  ;;  %v872_v21 = vmul.f32 0.23388076, %v869_v22  ;;  %v882_v25 = vmul.f32 0.2920817, %v1906_v60  ;;  %v953_v41 = vadd.f32 %v1968_v12, %v1886_v58 }
  0xa8   :  { %v821_v46 = vsel %vm132_vm2, %v819_v16, %v820_v32  ;;  %v873_v47 = vmul.f32 0.23388076, %v870_v38  ;;  %v874_v39 = vmul.f32 0.23388076, %v871_v33  ;;  %v883_v48 = vmul.f32 0.2920817, %v1910_v14 }
  0xa9   :  { %v826_v30 = vadd.f32 %v821_v46, %v800_v7  ;;  %v823_v44 = vsel %vm132_vm2, %v820_v32, %v822_v36  ;;  %v875_v49 = vadd.f32 %v872_v21, %v858_v40  ;;  %v884_v51 = vmul.f32 0.2920817, %v881_v28  ;;  %v1993_v16 = vld [vmem:[#allocation2 + $0x150] sm:$0xff] }
  0xaa   :  { %v827_v43 = vadd.f32 %v823_v44, %v801_v4  ;;  %v876_v50 = vadd.f32 %v873_v47, %v859_v61  ;;  %v877_v42 = vadd.f32 %v874_v39, %v860_v19  ;;  %v954_v52 = vadd.f32 %v1977_v27, %v1891_v62  ;;  %v961_v19 = vld [vmem:[#allocation2 + $0x100] sm:$0xf]  ;;  %v964_v4 = vld [vmem:[#allocation2 + $0x130] sm:$0xf] }
  0xab   :  { %v841_v53 = vadd.f32 %v836_v18, %v826_v30  ;;  %v885_v54 = vadd.f32 %v882_v25, %v875_v49  ;;  %v955_v58 = vadd.f32 %v952_v35, %v948_v34  ;;  %v956_v55 = vmul.f32 0.120078385, %v953_v41  ;;  %v976_v41 = vld [vmem:[#allocation2 + $0x118] sm:$0xf] }
  0xac   :  { %v842_v29 = vadd.f32 %v838_v37, %v827_v43  ;;  %v886_v56 = vadd.f32 %v883_v48, %v876_v50  ;;  %v887_v57 = vadd.f32 %v884_v51, %v877_v42  ;;  %v957_v59 = vmul.f32 0.120078385, %v954_v52  ;;  %v1999_v51 = vld [vmem:[#allocation2 + $0x158] sm:$0xff] }
  0xad   :  { %845 = vst [vmem:[#allocation7 + $0x70] sm:$0xff] %v841_v53  ;;  %v891_v45 = vrot.slane %v885_v54, 4  ;;  %v902_v26 = vrot.slane %v885_v54, 2  ;;  %v928_v63 = vmul.f32 0.2920817, %v885_v54  ;;  %v965_v5 = vadd.f32 %v1949_v6, %v1906_v60 }
  0xae   :  { %v958_v40 = vmul.f32 0.120078385, %v955_v58  ;;  %846 = vst [vmem:[#allocation7 + $0x78] sm:$0xff] %v842_v29  ;;  %v892_v24 = vrot.slane %v886_v56, 4  ;;  %v903_v61 = vrot.slane %v886_v56, 2  ;;  %v905_v0 = vrot.slane %v887_v57, 2 }
  0xaf   :  { %v929_v1 = vmul.f32 0.2920817, %v886_v56  ;;  %v934_v2 = vrot.slane %v928_v63, 2  ;;  %v894_v62 = vrot.slane %v887_v57, 4  ;;  %v930_v13 = vmul.f32 0.2920817, %v887_v57 }
  0xb0   :  { %v893_v7 = vsel %vm102_vm0, %v891_v45, %v892_v24  ;;  %v904_v8 = vsel %vm114_vm1, %v902_v26, %v903_v61  ;;  %v906_v9 = vsel %vm114_vm1, %v903_v61, %v905_v0  ;;  %v912_v22 = vadd.f32 %v905_v0, %v887_v57  ;;  %v1047_v58 = vld [vmem:[#allocation2 + $0x160] sm:$0xf] }
  0xb1   :  { %v935_v10 = vrot.slane %v929_v1, 2  ;;  %v898_v11 = vadd.f32 %v893_v7, %v885_v54  ;;  %v910_v3 = vadd.f32 %v904_v8, %v885_v54  ;;  %v911_v15 = vadd.f32 %v906_v9, %v886_v56  ;;  %v1043_v54 = vld [vmem:[#allocation2 + $0x100] sm:$0xf] }
  0xb2   :  { %v895_v18 = vsel %vm102_vm0, %v892_v24, %v894_v62  ;;  %v937_v28 = vrot.slane %v930_v13, 2  ;;  %v966_v34 = vadd.f32 %v1955_v31, %v1910_v14  ;;  %v915_v36 = vmul.f32 0.23388076, %v912_v22 }
  0xb3   :  { %v936_v20 = vsel %vm114_vm1, %v934_v2, %v935_v10  ;;  %v899_v37 = vadd.f32 %v895_v18, %v886_v56  ;;  %v900_v32 = vmul.f32 0.120078385, %v898_v11  ;;  %v913_v38 = vmul.f32 0.23388076, %v910_v3 }
  0xb4   :  { %v914_v33 = vmul.f32 0.23388076, %v911_v15  ;;  %v938_v21 = vsel %vm114_vm1, %v935_v10, %v937_v28  ;;  %v967_v25 = vadd.f32 %v964_v4, %v961_v19  ;;  %v968_v39 = vmul.f32 0.23388076, %v965_v5  ;;  %v1056_v28 = vld [vmem:[#allocation2 + $0x118] sm:$0xf] }
  0xb5   :  { %v901_v35 = vmul.f32 0.120078385, %v899_v37  ;;  %v919_v46 = vrot.slane %v913_v38, 1  ;;  %v969_v48 = vmul.f32 0.23388076, %v966_v34  ;;  %v922_v30 = vrot.slane %v915_v36, 1 }
  0xb6   :  { %v920_v47 = vrot.slane %v914_v33, 1  ;;  %v970_v44 = vmul.f32 0.23388076, %v967_v25  ;;  %v977_v49 = vmul.f32 0.2920817, %v1924_v23  ;;  %v1048_v43 = vadd.f32 %v1993_v16, %v1906_v60  ;;  %v2012_v36 = vld [vmem:[#allocation2 + $0x168] sm:$0xff] }
  0xb7   :  { %v971_v42 = vadd.f32 %v968_v39, %v956_v55  ;;  %v972_v52 = vadd.f32 %v969_v48, %v957_v59  ;;  %v978_v53 = vmul.f32 0.2920817, %v1933_v17  ;;  %v979_v45 = vmul.f32 0.2920817, %v976_v41 }
  0xb8   :  { %v921_v50 = vsel %vm132_vm2, %v919_v46, %v920_v47  ;;  %v923_v56 = vsel %vm132_vm2, %v920_v47, %v922_v30  ;;  %v973_v57 = vadd.f32 %v970_v44, %v958_v40  ;;  %v1049_v61 = vadd.f32 %v1999_v51, %v1910_v14  ;;  %v1071_v44 = vld [vmem:[#allocation2 + $0x130] sm:$0xf] }
  0xb9   :  { %v926_v29 = vadd.f32 %v921_v50, %v900_v32  ;;  %v927_v26 = vadd.f32 %v923_v56, %v901_v35  ;;  %v980_v63 = vadd.f32 %v977_v49, %v971_v42  ;;  %v981_v24 = vadd.f32 %v978_v53, %v972_v52  ;;  %v1059_v35 = vld [vmem:[#allocation2 + $0x148] sm:$0xf]  ;;  %v1138_v52 = vld [vmem:[#allocation2 + $0x118] sm:$0xf]  ;;  %v2021_v56 = vld [vmem:[#allocation2 + $0x170] sm:$0xff] }
  0xba   :  { %v982_v0 = vadd.f32 %v979_v45, %v973_v57  ;;  %v1050_v1 = vadd.f32 %v1047_v58, %v1043_v54  ;;  %v1051_v55 = vmul.f32 0.120078385, %v1048_v43  ;;  %v1052_v3 = vmul.f32 0.120078385, %v1049_v61  ;;  %v1142_v53 = vld [vmem:[#allocation2 + $0x178] sm:$0xf] }
  0xbb   :  { %v941_v60 = vadd.f32 %v936_v20, %v926_v29  ;;  %v942_v59 = vadd.f32 %v938_v21, %v927_v26  ;;  %v986_v2 = vrot.slane %v980_v63, 4  ;;  %v987_v62 = vrot.slane %v981_v24, 4 }
  0xbc   :  { %v997_v13 = vrot.slane %v980_v63, 2  ;;  %v998_v5 = vrot.slane %v981_v24, 2  ;;  %v1000_v7 = vrot.slane %v982_v0, 2  ;;  %v1023_v8 = vmul.f32 0.2920817, %v980_v63 }
  0xbd   :  { %944 = vst [vmem:[#allocation7 + $0x80] sm:$0xff] %v941_v60  ;;  %v1024_v40 = vmul.f32 0.2920817, %v981_v24  ;;  %945 = vst [vmem:[#allocation7 + $0x88] sm:$0xff] %v942_v59  ;;  %v988_v9 = vsel %vm102_vm0, %v986_v2, %v987_v62  ;;  %v989_v10 = vrot.slane %v982_v0, 4  ;;  %v1060_v30 = vadd.f32 %v1968_v12, %v1924_v23 }
  0xbe   :  { %v1025_v11 = vmul.f32 0.2920817, %v982_v0  ;;  %v993_v14 = vadd.f32 %v988_v9, %v980_v63  ;;  %v999_v15 = vsel %vm114_vm1, %v997_v13, %v998_v5  ;;  %v1001_v18 = vsel %vm114_vm1, %v998_v5, %v1000_v7 }
  0xbf   :  { %v1029_v19 = vrot.slane %v1023_v8, 2  ;;  %v1005_v4 = vadd.f32 %v999_v15, %v980_v63  ;;  %v1006_v20 = vadd.f32 %v1001_v18, %v981_v24  ;;  %v1030_v37 = vrot.slane %v1024_v40, 2 }
  0xc0   :  { %v990_v22 = vsel %vm102_vm0, %v987_v62, %v989_v10  ;;  %v995_v32 = vmul.f32 0.120078385, %v993_v14  ;;  %v1007_v33 = vadd.f32 %v1000_v7, %v982_v0  ;;  %v1032_v34 = vrot.slane %v1025_v11, 2 }
  0xc1   :  { %v994_v38 = vadd.f32 %v990_v22, %v981_v24  ;;  %v1008_v21 = vmul.f32 0.23388076, %v1005_v4  ;;  %v1009_v25 = vmul.f32 0.23388076, %v1006_v20  ;;  %v1031_v41 = vsel %vm114_vm1, %v1029_v19, %v1030_v37 }
  0xc2   :  { %v1053_v46 = vmul.f32 0.120078385, %v1050_v1  ;;  %v1010_v39 = vmul.f32 0.23388076, %v1007_v33  ;;  %v1033_v48 = vsel %vm114_vm1, %v1030_v37, %v1032_v34  ;;  %v1061_v50 = vadd.f32 %v1977_v27, %v1933_v17 }
  0xc3   :  { %v996_v47 = vmul.f32 0.120078385, %v994_v38  ;;  %v1014_v49 = vrot.slane %v1008_v21, 1  ;;  %v1015_v43 = vrot.slane %v1009_v25, 1  ;;  %v1062_v42 = vadd.f32 %v1059_v35, %v1056_v28 }
  0xc4   :  { %v1017_v54 = vrot.slane %v1010_v39, 1  ;;  %v1063_v58 = vmul.f32 0.23388076, %v1060_v30  ;;  %v1072_v29 = vmul.f32 0.2920817, %v1949_v6  ;;  %v1143_v57 = vadd.f32 %v2012_v36, %v1924_v23 }
  0xc5   :  { %v1016_v45 = vsel %vm132_vm2, %v1014_v49, %v1015_v43  ;;  %v1064_v26 = vmul.f32 0.23388076, %v1061_v50  ;;  %v1065_v63 = vmul.f32 0.23388076, %v1062_v42  ;;  %v1073_v24 = vmul.f32 0.2920817, %v1955_v31 }
  0xc6   :  { %v1021_v61 = vadd.f32 %v1016_v45, %v995_v32  ;;  %v1018_v60 = vsel %vm132_vm2, %v1015_v43, %v1017_v54  ;;  %v1066_v0 = vadd.f32 %v1063_v58, %v1051_v55  ;;  %v1074_v1 = vmul.f32 0.2920817, %v1071_v44  ;;  %v2037_v49 = vld [vmem:[#allocation5] sm:$0xff] }
  0xc7   :  { %v1022_v59 = vadd.f32 %v1018_v60, %v996_v47  ;;  %v1067_v2 = vadd.f32 %v1064_v26, %v1052_v3  ;;  %v1068_v62 = vadd.f32 %v1065_v63, %v1053_v46  ;;  %v1144_v13 = vadd.f32 %v2021_v56, %v1933_v17  ;;  %v1151_v46 = vld [vmem:[#allocation2 + $0x130] sm:$0xf]  ;;  %v1154_v47 = vld [vmem:[#allocation2 + $0x160] sm:$0xf] }
  0xc8   :  { %v1036_v5 = vadd.f32 %v1031_v41, %v1021_v61  ;;  %v1075_v7 = vadd.f32 %v1072_v29, %v1066_v0  ;;  %v1145_v23 = vadd.f32 %v1142_v53, %v1138_v52  ;;  %v1146_v8 = vmul.f32 0.120078385, %v1143_v57  ;;  %v1166_v57 = vld [vmem:[#allocation2 + $0x148] sm:$0xf] }
  0xc9   :  { %v1037_v40 = vadd.f32 %v1033_v48, %v1022_v59  ;;  %v1076_v9 = vadd.f32 %v1073_v24, %v1067_v2  ;;  %v1077_v10 = vadd.f32 %v1074_v1, %v1068_v62  ;;  %v1147_v11 = vmul.f32 0.120078385, %v1144_v13  ;;  %v2043_v1 = vld [vmem:[#allocation5 + $0x8] sm:$0xff] }
  0xca   :  { %1039 = vst [vmem:[#allocation7 + $0x90] sm:$0xff] %v1036_v5  ;;  %v1081_v14 = vrot.slane %v1075_v7, 4  ;;  %v1092_v15 = vrot.slane %v1075_v7, 2  ;;  %v1118_v18 = vmul.f32 0.2920817, %v1075_v7  ;;  %v1155_v28 = vadd.f32 %v1993_v16, %v1949_v6 }
  0xcb   :  { %v1148_v55 = vmul.f32 0.120078385, %v1145_v23  ;;  %1040 = vst [vmem:[#allocation7 + $0x98] sm:$0xff] %v1037_v40  ;;  %v1082_v19 = vrot.slane %v1076_v9, 4  ;;  %v1093_v3 = vrot.slane %v1076_v9, 2  ;;  %v1095_v4 = vrot.slane %v1077_v10, 2 }
  0xcc   :  { %v1119_v20 = vmul.f32 0.2920817, %v1076_v9  ;;  %v1124_v37 = vrot.slane %v1118_v18, 2  ;;  %v1084_v17 = vrot.slane %v1077_v10, 4  ;;  %v1120_v22 = vmul.f32 0.2920817, %v1077_v10 }
  0xcd   :  { %v1083_v32 = vsel %vm102_vm0, %v1081_v14, %v1082_v19  ;;  %v1094_v38 = vsel %vm114_vm1, %v1092_v15, %v1093_v3  ;;  %v1096_v33 = vsel %vm114_vm1, %v1093_v3, %v1095_v4  ;;  %v1102_v30 = vadd.f32 %v1095_v4, %v1077_v10  ;;  %v1236_v23 = vld [vmem:[#allocation5 + $0x10] sm:$0xf] }
  0xce   :  { %v1125_v34 = vrot.slane %v1119_v20, 2  ;;  %v1088_v35 = vadd.f32 %v1083_v32, %v1075_v7  ;;  %v1100_v21 = vadd.f32 %v1094_v38, %v1075_v7  ;;  %v1101_v25 = vadd.f32 %v1096_v33, %v1076_v9  ;;  %v1233_v7 = vld [vmem:[#allocation2 + $0x130] sm:$0xf] }
  0xcf   :  { %v1085_v41 = vsel %vm102_vm0, %v1082_v19, %v1084_v17  ;;  %v1127_v44 = vrot.slane %v1120_v22, 2  ;;  %v1156_v52 = vadd.f32 %v1999_v51, %v1955_v31  ;;  %v1105_v54 = vmul.f32 0.23388076, %v1102_v30 }
  0xd0   :  { %v1126_v39 = vsel %vm114_vm1, %v1124_v37, %v1125_v34  ;;  %v1089_v48 = vadd.f32 %v1085_v41, %v1076_v9  ;;  %v1090_v43 = vmul.f32 0.120078385, %v1088_v35  ;;  %v1103_v50 = vmul.f32 0.23388076, %v1100_v21 }
  0xd1   :  { %v1104_v42 = vmul.f32 0.23388076, %v1101_v25  ;;  %v1128_v58 = vsel %vm114_vm1, %v1125_v34, %v1127_v44  ;;  %v1157_v29 = vadd.f32 %v1154_v47, %v1151_v46  ;;  %v1158_v63 = vmul.f32 0.23388076, %v1155_v28  ;;  %v1245_v44 = vld [vmem:[#allocation2 + $0x148] sm:$0xf] }
  0xd2   :  { %v1091_v53 = vmul.f32 0.120078385, %v1089_v48  ;;  %v1109_v45 = vrot.slane %v1103_v50, 1  ;;  %v1159_v24 = vmul.f32 0.23388076, %v1156_v52  ;;  %v1112_v61 = vrot.slane %v1105_v54, 1 }
  0xd3   :  { %v1110_v26 = vrot.slane %v1104_v42, 1  ;;  %v1160_v60 = vmul.f32 0.23388076, %v1157_v29  ;;  %v1167_v0 = vmul.f32 0.2920817, %v1968_v12  ;;  %v1237_v59 = vadd.f32 %v2037_v49, %v1949_v6  ;;  %v2056_v54 = vld [vmem:[#allocation5 + $0x18] sm:$0xff] }
  0xd4   :  { %v1161_v62 = vadd.f32 %v1158_v63, %v1146_v8  ;;  %v1162_v13 = vadd.f32 %v1159_v24, %v1147_v11  ;;  %v1168_v5 = vmul.f32 0.2920817, %v1977_v27  ;;  %v1169_v14 = vmul.f32 0.2920817, %v1166_v57 }
  0xd5   :  { %v1111_v2 = vsel %vm132_vm2, %v1109_v45, %v1110_v26  ;;  %v1113_v9 = vsel %vm132_vm2, %v1110_v26, %v1112_v61  ;;  %v1163_v10 = vadd.f32 %v1160_v60, %v1148_v55  ;;  %v1238_v3 = vadd.f32 %v2043_v1, %v1955_v31  ;;  %v1260_v60 = vld [vmem:[#allocation2 + $0x160] sm:$0xf] }
  0xd6   :  { %v1116_v40 = vadd.f32 %v1111_v2, %v1090_v43  ;;  %v1117_v15 = vadd.f32 %v1113_v9, %v1091_v53  ;;  %v1170_v18 = vadd.f32 %v1167_v0, %v1161_v62  ;;  %v1171_v19 = vadd.f32 %v1168_v5, %v1162_v13  ;;  %v1248_v53 = vld [vmem:[#allocation2 + $0x178] sm:$0xf]  ;;  %v1327_v13 = vld [vmem:[#allocation2 + $0x148] sm:$0xf]  ;;  %v2065_v9 = vld [vmem:[#allocation5 + $0x20] sm:$0xff] }
  0xd7   :  { %v1172_v4 = vadd.f32 %v1169_v14, %v1163_v10  ;;  %v1239_v20 = vadd.f32 %v1236_v23, %v1233_v7  ;;  %v1240_v8 = vmul.f32 0.120078385, %v1237_v59  ;;  %v1241_v21 = vmul.f32 0.120078385, %v1238_v3  ;;  %v1331_v5 = vld [vmem:[#allocation5 + $0x28] sm:$0xf] }
  0xd8   :  { %v1131_v6 = vadd.f32 %v1126_v39, %v1116_v40  ;;  %v1132_v11 = vadd.f32 %v1128_v58, %v1117_v15  ;;  %v1176_v37 = vrot.slane %v1170_v18, 4  ;;  %v1177_v17 = vrot.slane %v1171_v19, 4 }
  0xd9   :  { %v1187_v22 = vrot.slane %v1170_v18, 2  ;;  %v1188_v28 = vrot.slane %v1171_v19, 2  ;;  %v1190_v32 = vrot.slane %v1172_v4, 2  ;;  %v1213_v38 = vmul.f32 0.2920817, %v1170_v18 }
  0xda   :  { %1134 = vst [vmem:[#allocation7 + $0xa0] sm:$0xff] %v1131_v6  ;;  %v1214_v55 = vmul.f32 0.2920817, %v1171_v19  ;;  %1135 = vst [vmem:[#allocation7 + $0xa8] sm:$0xff] %v1132_v11  ;;  %v1178_v33 = vsel %vm102_vm0, %v1176_v37, %v1177_v17  ;;  %v1179_v34 = vrot.slane %v1172_v4, 4  ;;  %v1249_v61 = vadd.f32 %v2012_v36, %v1968_v12 }
  0xdb   :  { %v1215_v35 = vmul.f32 0.2920817, %v1172_v4  ;;  %v1183_v31 = vadd.f32 %v1178_v33, %v1170_v18  ;;  %v1189_v25 = vsel %vm114_vm1, %v1187_v22, %v1188_v28  ;;  %v1191_v41 = vsel %vm114_vm1, %v1188_v28, %v1190_v32 }
  0xdc   :  { %v1219_v46 = vrot.slane %v1213_v38, 2  ;;  %v1195_v47 = vadd.f32 %v1189_v25, %v1170_v18  ;;  %v1196_v39 = vadd.f32 %v1191_v41, %v1171_v19  ;;  %v1220_v48 = vrot.slane %v1214_v55, 2 }
  0xdd   :  { %v1180_v30 = vsel %vm102_vm0, %v1177_v17, %v1179_v34  ;;  %v1185_v43 = vmul.f32 0.120078385, %v1183_v31  ;;  %v1197_v42 = vadd.f32 %v1190_v32, %v1172_v4  ;;  %v1222_v52 = vrot.slane %v1215_v35, 2 }
  0xde   :  { %v1184_v50 = vadd.f32 %v1180_v30, %v1171_v19  ;;  %v1198_v58 = vmul.f32 0.23388076, %v1195_v47  ;;  %v1199_v29 = vmul.f32 0.23388076, %v1196_v39  ;;  %v1221_v57 = vsel %vm114_vm1, %v1219_v46, %v1220_v48 }
  0xdf   :  { %v1242_v45 = vmul.f32 0.120078385, %v1239_v20  ;;  %v1200_v63 = vmul.f32 0.23388076, %v1197_v42  ;;  %v1223_v24 = vsel %vm114_vm1, %v1220_v48, %v1222_v52  ;;  %v1250_v2 = vadd.f32 %v2021_v56, %v1977_v27 }
  0xe0   :  { %v1186_v26 = vmul.f32 0.120078385, %v1184_v50  ;;  %v1204_v0 = vrot.slane %v1198_v58, 1  ;;  %v1205_v59 = vrot.slane %v1199_v29, 1  ;;  %v1251_v62 = vadd.f32 %v1248_v53, %v1245_v44 }
  0xe1   :  { %v1207_v7 = vrot.slane %v1200_v63, 1  ;;  %v1252_v23 = vmul.f32 0.23388076, %v1249_v61  ;;  %v1261_v40 = vmul.f32 0.2920817, %v1993_v16  ;;  %v1332_v10 = vadd.f32 %v2056_v54, %v1968_v12 }
  0xe2   :  { %v1206_v14 = vsel %vm132_vm2, %v1204_v0, %v1205_v59  ;;  %v1253_v15 = vmul.f32 0.23388076, %v1250_v2  ;;  %v1254_v18 = vmul.f32 0.23388076, %v1251_v62  ;;  %v1262_v19 = vmul.f32 0.2920817, %v1999_v51 }
  0xe3   :  { %v1211_v3 = vadd.f32 %v1206_v14, %v1185_v43  ;;  %v1208_v6 = vsel %vm132_vm2, %v1205_v59, %v1207_v7  ;;  %v1255_v4 = vadd.f32 %v1252_v23, %v1240_v8  ;;  %v1263_v20 = vmul.f32 0.2920817, %v1260_v60  ;;  %v2081_v0 = vld [vmem:[#allocation5 + $0x30] sm:$0xff] }
  0xe4   :  { %v1212_v11 = vadd.f32 %v1208_v6, %v1186_v26  ;;  %v1256_v37 = vadd.f32 %v1253_v15, %v1241_v21  ;;  %v1257_v17 = vadd.f32 %v1254_v18, %v1242_v45  ;;  %v1333_v22 = vadd.f32 %v2065_v9, %v1977_v27  ;;  %v1340_v45 = vld [vmem:[#allocation2 + $0x160] sm:$0xf]  ;;  %v1343_v26 = vld [vmem:[#allocation5 + $0x10] sm:$0xf] }
  0xe5   :  { %v1226_v28 = vadd.f32 %v1221_v57, %v1211_v3  ;;  %v1264_v32 = vadd.f32 %v1261_v40, %v1255_v4  ;;  %v1334_v12 = vadd.f32 %v1331_v5, %v1327_v13  ;;  %v1335_v38 = vmul.f32 0.120078385, %v1332_v10  ;;  %v1355_v10 = vld [vmem:[#allocation2 + $0x178] sm:$0xf] }
  0xe6   :  { %v1227_v55 = vadd.f32 %v1223_v24, %v1212_v11  ;;  %v1265_v33 = vadd.f32 %v1262_v19, %v1256_v37  ;;  %v1266_v34 = vadd.f32 %v1263_v20, %v1257_v17  ;;  %v1336_v35 = vmul.f32 0.120078385, %v1333_v22  ;;  %v2087_v20 = vld [vmem:[#allocation5 + $0x38] sm:$0xff] }
  0xe7   :  { %1229 = vst [vmem:[#allocation7 + $0xb0] sm:$0xff] %v1226_v28  ;;  %v1270_v31 = vrot.slane %v1264_v32, 4  ;;  %v1281_v25 = vrot.slane %v1264_v32, 2  ;;  %v1307_v41 = vmul.f32 0.2920817, %v1264_v32  ;;  %v1344_v44 = vadd.f32 %v2037_v49, %v1993_v16 }
  0xe8   :  { %v1337_v8 = vmul.f32 0.120078385, %v1334_v12  ;;  %1230 = vst [vmem:[#allocation7 + $0xb8] sm:$0xff] %v1227_v55  ;;  %v1271_v46 = vrot.slane %v1265_v33, 4  ;;  %v1282_v21 = vrot.slane %v1265_v33, 2  ;;  %v1284_v47 = vrot.slane %v1266_v34, 2 }
  0xe9   :  { %v1308_v39 = vmul.f32 0.2920817, %v1265_v33  ;;  %v1313_v48 = vrot.slane %v1307_v41, 2  ;;  %v1273_v27 = vrot.slane %v1266_v34, 4  ;;  %v1309_v30 = vmul.f32 0.2920817, %v1266_v34 }
  0xea   :  { %v1272_v43 = vsel %vm102_vm0, %v1270_v31, %v1271_v46  ;;  %v1283_v50 = vsel %vm114_vm1, %v1281_v25, %v1282_v21  ;;  %v1285_v42 = vsel %vm114_vm1, %v1282_v21, %v1284_v47  ;;  %v1291_v61 = vadd.f32 %v1284_v47, %v1266_v34  ;;  %v1426_v12 = vld [vmem:[#allocation5 + $0x40] sm:$0xf] }
  0xeb   :  { %v1314_v52 = vrot.slane %v1308_v39, 2  ;;  %v1277_v53 = vadd.f32 %v1272_v43, %v1264_v32  ;;  %v1289_v58 = vadd.f32 %v1283_v50, %v1264_v32  ;;  %v1290_v29 = vadd.f32 %v1285_v42, %v1265_v33  ;;  %v1422_v32 = vld [vmem:[#allocation2 + $0x160] sm:$0xf] }
  0xec   :  { %v1274_v57 = vsel %vm102_vm0, %v1271_v46, %v1273_v27  ;;  %v1316_v60 = vrot.slane %v1309_v30, 2  ;;  %v1345_v13 = vadd.f32 %v2043_v1, %v1999_v51  ;;  %v1294_v7 = vmul.f32 0.23388076, %v1291_v61 }
  0xed   :  { %v1315_v63 = vsel %vm114_vm1, %v1313_v48, %v1314_v52  ;;  %v1278_v24 = vadd.f32 %v1274_v57, %v1265_v33  ;;  %v1279_v59 = vmul.f32 0.120078385, %v1277_v53  ;;  %v1292_v2 = vmul.f32 0.23388076, %v1289_v58 }
  0xee   :  { %v1293_v62 = vmul.f32 0.23388076, %v1290_v29  ;;  %v1317_v23 = vsel %vm114_vm1, %v1314_v52, %v1316_v60  ;;  %v1346_v40 = vadd.f32 %v1343_v26, %v1340_v45  ;;  %v1347_v18 = vmul.f32 0.23388076, %v1344_v44  ;;  %v1435_v60 = vld [vmem:[#allocation2 + $0x178] sm:$0xf] }
  0xef   :  { %v1280_v5 = vmul.f32 0.120078385, %v1278_v24  ;;  %v1298_v14 = vrot.slane %v1292_v2, 1  ;;  %v1348_v19 = vmul.f32 0.23388076, %v1345_v13  ;;  %v1301_v3 = vrot.slane %v1294_v7, 1 }
  0xf0   :  { %v1299_v15 = vrot.slane %v1293_v62, 1  ;;  %v1349_v6 = vmul.f32 0.23388076, %v1346_v40  ;;  %v1356_v4 = vmul.f32 0.2920817, %v2012_v36  ;;  %v1427_v11 = vadd.f32 %v2081_v0, %v1993_v16  ;;  %v1519_v7 = vld [vmem:[#allocation5 + $0x48] sm:$0xff] }
  0xf1   :  { %v1350_v17 = vadd.f32 %v1347_v18, %v1335_v38  ;;  %v1351_v22 = vadd.f32 %v1348_v19, %v1336_v35  ;;  %v1357_v28 = vmul.f32 0.2920817, %v2021_v56  ;;  %v1358_v31 = vmul.f32 0.2920817, %v1355_v10 }
  0xf2   :  { %v1300_v37 = vsel %vm132_vm2, %v1298_v14, %v1299_v15  ;;  %v1302_v33 = vsel %vm132_vm2, %v1299_v15, %v1301_v3  ;;  %v1352_v34 = vadd.f32 %v1349_v6, %v1337_v8  ;;  %v1428_v21 = vadd.f32 %v2087_v20, %v1999_v51 }
  0xf3   :  { %v1305_v55 = vadd.f32 %v1300_v37, %v1279_v59  ;;  %v1306_v25 = vadd.f32 %v1302_v33, %v1280_v5  ;;  %v1359_v41 = vadd.f32 %v1356_v4, %v1350_v17  ;;  %v1360_v46 = vadd.f32 %v1357_v28, %v1351_v22  ;;  %v1438_v5 = vld [vmem:[#allocation5 + $0x28] sm:$0xf]  ;;  %v1450_v17 = vld [vmem:[#allocation5 + $0x10] sm:$0xf]  ;;  %v1517_v22 = vld [vmem:[#allocation2 + $0x178] sm:$0xf] }
  0xf4   :  { %v1361_v47 = vadd.f32 %v1358_v31, %v1352_v34  ;;  %v1429_v39 = vadd.f32 %v1426_v12, %v1422_v32  ;;  %v1430_v38 = vmul.f32 0.120078385, %v1427_v11  ;;  %v1431_v58 = vmul.f32 0.120078385, %v1428_v21  ;;  %v1521_v28 = vld [vmem:[#allocation5 + $0x58] sm:$0xf] }
  0xf5   :  { %v1320_v16 = vadd.f32 %v1315_v63, %v1305_v55  ;;  %v1321_v35 = vadd.f32 %v1317_v23, %v1306_v25  ;;  %v1365_v48 = vrot.slane %v1359_v41, 4  ;;  %v1366_v27 = vrot.slane %v1360_v46, 4  ;;  %v1520_v33 = vld [vmem:[#allocation5 + $0x50] sm:$0xff] }
  0xf6   :  { %v1376_v30 = vrot.slane %v1359_v41, 2  ;;  %v1377_v44 = vrot.slane %v1360_v46, 2  ;;  %v1379_v43 = vrot.slane %v1361_v47, 2  ;;  %v1402_v50 = vmul.f32 0.2920817, %v1359_v41 }
  0xf7   :  { %1323 = vst [vmem:[#allocation7 + $0xc0] sm:$0xff] %v1320_v16  ;;  %v1403_v8 = vmul.f32 0.2920817, %v1360_v46  ;;  %1324 = vst [vmem:[#allocation7 + $0xc8] sm:$0xff] %v1321_v35  ;;  %v1367_v42 = vsel %vm102_vm0, %v1365_v48, %v1366_v27  ;;  %v1368_v52 = vrot.slane %v1361_v47, 4  ;;  %v1439_v3 = vadd.f32 %v2056_v54, %v2012_v36 }
  0xf8   :  { %v1404_v53 = vmul.f32 0.2920817, %v1361_v47  ;;  %v1372_v51 = vadd.f32 %v1367_v42, %v1359_v41  ;;  %v1378_v29 = vsel %vm114_vm1, %v1376_v30, %v1377_v44  ;;  %v1380_v57 = vsel %vm114_vm1, %v1377_v44, %v1379_v43 }
  0xf9   :  { %v1408_v45 = vrot.slane %v1402_v50, 2  ;;  %v1384_v26 = vadd.f32 %v1378_v29, %v1359_v41  ;;  %v1385_v63 = vadd.f32 %v1380_v57, %v1360_v46  ;;  %v1409_v24 = vrot.slane %v1403_v8, 2 }
  0xfa   :  { %v1369_v61 = vsel %vm102_vm0, %v1366_v27, %v1368_v52  ;;  %v1374_v59 = vmul.f32 0.120078385, %v1372_v51  ;;  %v1386_v62 = vadd.f32 %v1379_v43, %v1361_v47  ;;  %v1411_v13 = vrot.slane %v1404_v53, 2 }
  0xfb   :  { %v1373_v2 = vadd.f32 %v1369_v61, %v1360_v46  ;;  %v1387_v23 = vmul.f32 0.23388076, %v1384_v26  ;;  %v1388_v40 = vmul.f32 0.23388076, %v1385_v63  ;;  %v1410_v10 = vsel %vm114_vm1, %v1408_v45, %v1409_v24 }
  0xfc   :  { %v1432_v14 = vmul.f32 0.120078385, %v1429_v39  ;;  %v1389_v18 = vmul.f32 0.23388076, %v1386_v62  ;;  %v1412_v19 = vsel %vm114_vm1, %v1409_v24, %v1411_v13  ;;  %v1440_v11 = vadd.f32 %v2065_v9, %v2021_v56 }
  0xfd   :  { %v1375_v15 = vmul.f32 0.120078385, %v1373_v2  ;;  %v1393_v6 = vrot.slane %v1387_v23, 1  ;;  %v1394_v4 = vrot.slane %v1388_v40, 1  ;;  %v1441_v37 = vadd.f32 %v1438_v5, %v1435_v60  ;;  %v1530_v40 = vld [vmem:[#allocation5 + $0x10] sm:$0xf] }
  0xfe   :  { %v1396_v32 = vrot.slane %v1389_v18, 1  ;;  %v1442_v12 = vmul.f32 0.23388076, %v1439_v3  ;;  %v1451_v55 = vmul.f32 0.2920817, %v2037_v49  ;;  %v1522_v34 = vadd.f32 %v1519_v7, %v2012_v36 }
  0xff   :  { %v1395_v31 = vsel %vm132_vm2, %v1393_v6, %v1394_v4  ;;  %v1443_v25 = vmul.f32 0.23388076, %v1440_v11  ;;  %v1444_v41 = vmul.f32 0.23388076, %v1441_v37  ;;  %v1452_v46 = vmul.f32 0.2920817, %v2043_v1 }
 0x100   :  { %v1400_v21 = vadd.f32 %v1395_v31, %v1374_v59  ;;  %v1397_v16 = vsel %vm132_vm2, %v1394_v4, %v1396_v32  ;;  %v1445_v47 = vadd.f32 %v1442_v12, %v1430_v38  ;;  %v1453_v39 = vmul.f32 0.2920817, %v1450_v17  ;;  %v1545_v4 = vld [vmem:[#allocation5 + $0x28] sm:$0xf] }
 0x101   :  { %v1401_v35 = vadd.f32 %v1397_v16, %v1375_v15  ;;  %v1446_v48 = vadd.f32 %v1443_v25, %v1431_v58  ;;  %v1447_v27 = vadd.f32 %v1444_v41, %v1432_v14  ;;  %v1523_v30 = vadd.f32 %v1520_v33, %v2021_v56 }
 0x102   :  { %v1415_v44 = vadd.f32 %v1410_v10, %v1400_v21  ;;  %v1454_v43 = vadd.f32 %v1451_v55, %v1445_v47  ;;  %v1524_v50 = vadd.f32 %v1521_v28, %v1517_v22  ;;  %v1525_v52 = vmul.f32 0.120078385, %v1522_v34  ;;  %v1533_v10 = vld [vmem:[#allocation5 + $0x40] sm:$0xf] }
 0x103   :  { %v1416_v36 = vadd.f32 %v1412_v19, %v1401_v35  ;;  %v1455_v8 = vadd.f32 %v1452_v46, %v1446_v48  ;;  %v1456_v42 = vadd.f32 %v1453_v39, %v1447_v27  ;;  %v1526_v57 = vmul.f32 0.120078385, %v1523_v30 }
 0x104   :  { %1418 = vst [vmem:[#allocation7 + $0xd0] sm:$0xff] %v1415_v44  ;;  %v1460_v53 = vrot.slane %v1454_v43, 4  ;;  %v1471_v51 = vrot.slane %v1454_v43, 2  ;;  %v1497_v29 = vmul.f32 0.2920817, %v1454_v43  ;;  %v1534_v61 = vadd.f32 %v2081_v0, %v2037_v49 }
 0x105   :  { %1419 = vst [vmem:[#allocation7 + $0xd8] sm:$0xff] %v1416_v36  ;;  %v1461_v38 = vrot.slane %v1455_v8, 4  ;;  %v1472_v45 = vrot.slane %v1455_v8, 2  ;;  %v1474_v26 = vrot.slane %v1456_v42, 2  ;;  %v1498_v58 = vmul.f32 0.2920817, %v1455_v8 }
 0x106   :  { %v1503_v63 = vrot.slane %v1497_v29, 2  ;;  %v1463_v24 = vrot.slane %v1456_v42, 4  ;;  %v1499_v56 = vmul.f32 0.2920817, %v1456_v42  ;;  %v1527_v19 = vmul.f32 0.120078385, %v1524_v50 }
 0x107   :  { %v1462_v60 = vsel %vm102_vm0, %v1460_v53, %v1461_v38  ;;  %v1473_v59 = vsel %vm114_vm1, %v1471_v51, %v1472_v45  ;;  %v1475_v2 = vsel %vm114_vm1, %v1472_v45, %v1474_v26  ;;  %v1504_v62 = vrot.slane %v1498_v58, 2 }
 0x108   :  { %v1467_v13 = vadd.f32 %v1462_v60, %v1454_v43  ;;  %v1479_v5 = vadd.f32 %v1473_v59, %v1454_v43  ;;  %v1480_v7 = vadd.f32 %v1475_v2, %v1455_v8  ;;  %v1464_v23 = vsel %vm102_vm0, %v1461_v38, %v1463_v24 }
 0x109   :  { %v1468_v14 = vadd.f32 %v1464_v23, %v1455_v8  ;;  %v1481_v15 = vadd.f32 %v1474_v26, %v1456_v42  ;;  %v1506_v18 = vrot.slane %v1499_v56, 2  ;;  %v1505_v0 = vsel %vm114_vm1, %v1503_v63, %v1504_v62 }
 0x10a   :  { %v1482_v3 = vmul.f32 0.23388076, %v1479_v5  ;;  %v1483_v49 = vmul.f32 0.23388076, %v1480_v7  ;;  %v1535_v6 = vadd.f32 %v2087_v20, %v2043_v1  ;;  %v1469_v11 = vmul.f32 0.120078385, %v1467_v13 }
 0x10b   :  { %v1470_v37 = vmul.f32 0.120078385, %v1468_v14  ;;  %v1484_v17 = vmul.f32 0.23388076, %v1481_v15  ;;  %v1536_v22 = vadd.f32 %v1533_v10, %v1530_v40  ;;  %v1537_v12 = vmul.f32 0.23388076, %v1534_v61 }
 0x10c   :  { %v1488_v28 = vrot.slane %v1482_v3, 1  ;;  %v1489_v32 = vrot.slane %v1483_v49, 1  ;;  %v1538_v55 = vmul.f32 0.23388076, %v1535_v6  ;;  %v1507_v34 = vsel %vm114_vm1, %v1504_v62, %v1506_v18 }
 0x10d   :  { %v1491_v33 = vrot.slane %v1484_v17, 1  ;;  %v1539_v31 = vmul.f32 0.23388076, %v1536_v22  ;;  %v1546_v25 = vmul.f32 0.2920817, %v2056_v54  ;;  %v1540_v46 = vadd.f32 %v1537_v12, %v1525_v52 }
 0x10e   :  { %v1490_v41 = vsel %vm132_vm2, %v1488_v28, %v1489_v32  ;;  %v1541_v21 = vadd.f32 %v1538_v55, %v1526_v57  ;;  %v1547_v1 = vmul.f32 0.2920817, %v2065_v9  ;;  %v1548_v39 = vmul.f32 0.2920817, %v1545_v4 }
 0x10f   :  { %v1495_v20 = vadd.f32 %v1490_v41, %v1469_v11  ;;  %v1492_v16 = vsel %vm132_vm2, %v1489_v32, %v1491_v33  ;;  %v1542_v47 = vadd.f32 %v1539_v31, %v1527_v19  ;;  %v1549_v48 = vadd.f32 %v1546_v25, %v1540_v46 }
 0x110   :  { %v1496_v35 = vadd.f32 %v1492_v16, %v1470_v37  ;;  %v1550_v27 = vadd.f32 %v1547_v1, %v1541_v21 }
 0x111   :  { %v1510_v30 = vadd.f32 %v1505_v0, %v1495_v20  ;;  %v1551_v44 = vadd.f32 %v1548_v39, %v1542_v47  ;;  %v1555_v50 = vrot.slane %v1549_v48, 4  ;;  %v1566_v54 = vrot.slane %v1549_v48, 2 }
 0x112   :  { %v1511_v43 = vadd.f32 %v1507_v34, %v1496_v35  ;;  %v1556_v36 = vrot.slane %v1550_v27, 4  ;;  %v1567_v8 = vrot.slane %v1550_v27, 2  ;;  %v1592_v52 = vmul.f32 0.2920817, %v1549_v48 }
 0x113   :  { %1513 = vst [vmem:[#allocation7 + $0xe0] sm:$0xff] %v1510_v30  ;;  %v1569_v42 = vrot.slane %v1551_v44, 2  ;;  %v1593_v53 = vmul.f32 0.2920817, %v1550_v27  ;;  %v1558_v51 = vrot.slane %v1551_v44, 4 }
 0x114   :  { %1514 = vst [vmem:[#allocation7 + $0xe8] sm:$0xff] %v1511_v43  ;;  %v1557_v9 = vsel %vm102_vm0, %v1555_v50, %v1556_v36  ;;  %v1568_v57 = vsel %vm114_vm1, %v1566_v54, %v1567_v8  ;;  %v1594_v45 = vmul.f32 0.2920817, %v1551_v44  ;;  %v1598_v59 = vrot.slane %v1592_v52, 2 }
 0x115   :  { %v1562_v29 = vadd.f32 %v1557_v9, %v1549_v48  ;;  %v1570_v38 = vsel %vm114_vm1, %v1567_v8, %v1569_v42  ;;  %v1574_v26 = vadd.f32 %v1568_v57, %v1549_v48  ;;  %v1559_v63 = vsel %vm102_vm0, %v1556_v36, %v1558_v51 }
 0x116   :  { %v1575_v58 = vadd.f32 %v1570_v38, %v1550_v27  ;;  %v1563_v24 = vadd.f32 %v1559_v63, %v1550_v27  ;;  %v1576_v56 = vadd.f32 %v1569_v42, %v1551_v44  ;;  %v1599_v2 = vrot.slane %v1593_v53, 2 }
 0x117   :  { %v1577_v61 = vmul.f32 0.23388076, %v1574_v26  ;;  %v1564_v62 = vmul.f32 0.120078385, %v1562_v29  ;;  %v1601_v5 = vrot.slane %v1594_v45, 2 }
 0x118   :  { %v1578_v60 = vmul.f32 0.23388076, %v1575_v58  ;;  %v1579_v13 = vmul.f32 0.23388076, %v1576_v56  ;;  %v1565_v40 = vmul.f32 0.120078385, %v1563_v24  ;;  %v1600_v15 = vsel %vm114_vm1, %v1598_v59, %v1599_v2 }
 0x119   :  { %v1583_v7 = vrot.slane %v1577_v61, 1  ;;  %v1602_v3 = vsel %vm114_vm1, %v1599_v2, %v1601_v5 }
 0x11a   :  { %v1584_v23 = vrot.slane %v1578_v60, 1  ;;  %v1586_v10 = vrot.slane %v1579_v13, 1 }
 0x11c   :  { %v1585_v14 = vsel %vm132_vm2, %v1583_v7, %v1584_v23  ;;  %v1587_v19 = vsel %vm132_vm2, %v1584_v23, %v1586_v10 }
 0x11d   :  { %v1590_v18 = vadd.f32 %v1585_v14, %v1564_v62  ;;  %v1591_v49 = vadd.f32 %v1587_v19, %v1565_v40 }
 0x11f   :  { %v1605_v0 = vadd.f32 %v1600_v15, %v1590_v18  ;;  %v1606_v6 = vadd.f32 %v1602_v3, %v1591_v49 }
 0x121   :  { %1608 = vst [vmem:[#allocation7 + $0xf0] sm:$0xff] %v1605_v0  ;;  %1609 = vst [vmem:[#allocation7 + $0xf8] sm:$0xff] %v1606_v6 }
 0x122   :  { %1710 = shalt.err (!%p1707_p12)
}
 0x123   :  { %s1711_s12 = scalar_lea.hbm %s2151_s2, 4096 }
 0x124   :  { %p1712_p13 = scmp.ne.s32.totalorder %s2151_s2, %s1711_s12  ;;  %p1715_p0 = scmp.lt.u32.totalorder %s1711_s12, %s2151_s2 }
 0x126   :  { %p1717_p1 = pnand %p1715_p0, %p1712_p13 }
 0x128   :  { %1720 = shalt.err (!%p1717_p1)
}
 0x129   :  { %1621 = dma.vmem_to_hbm [thread:$0]  %s1616_s8, 4096, %s2151_s2, [#allocation4], %s1728_s22, %s1728_s22, %s1729_s23  }
 0x12a   :  { %1725 = dma.done.wait [#allocation4], 4096  }
 0x12b   :  { %1726 = vsyncadd [#allocation4], 4294963200 }
 0x12c   :  { %1625 = vsyncpa [#allocation3], 1 }
 0x12d   :  { %1626 = vsyncpa [#allocation6], 1 }
 0x12e   :  { %1627 = vsyncpa [#allocation4], 1 }

</bundles_post_ra>
